<compile_context>
chip_gen: v7x
topology: tpu7x:2x2x1
jax: 0.10.0
libtpu: 0.0.40
codegen_flags: <defaults>
</compile_context>

<pallas_src>
import functools

import jax
import jax.numpy as jnp
from jax.experimental import pallas as pl
from jax.experimental.pallas import tpu as pltpu

C_IN = 3
C_OUT = 512          # conv out_channels == "sequence_length" downstream
KSIZE = 5
STRIDE = 2
WIDTH = 24           # spatial extent after conv+pool (hard-coded in the torch module)
K_RAW = KSIZE * KSIZE * C_IN   # 75
K_B = K_RAW + 1                # 76: +1 constant row that carries the conv bias
N_TAPS = 4                     # 2x2 max-pool taps
TM = 128                       # row tile over the 512 conv channels


# ------------------------------------------------------------------
# Fully-fused kernel (per (batch, 128-row tile) grid step):
#   conv(im2col matmul, bias folded into K) + 2x2 maxpool + ReLU
#   -> merged [W_hv_img|W_v] + W_hv_te matmuls + gating
#   -> norms + alpha + residual + LayerNorm
# ------------------------------------------------------------------
def _fused_kernel(p_ref, wt_ref, te_ref, wm_ref, wte_ref, bm_ref, g_ref, bln_ref,
                  o_ref, *, beta_shift, hidden):
    wt = wt_ref[...]                                                    # (TM, 76)

    # conv as im2col matmul; max over the 4 pooling taps BEFORE ReLU (monotone, and
    # the folded bias is a per-row constant so the max/bias order is exact).
    m = jnp.dot(wt, p_ref[0, 0], preferred_element_type=jnp.float32)    # (TM, S)
    for t in range(1, N_TAPS):
        m = jnp.maximum(m, jnp.dot(wt, p_ref[0, t],
                                   preferred_element_type=jnp.float32))
    iv = jnp.maximum(m, 0.0)                                            # image_vector tile

    te = te_ref[...]                                                    # (TM, H)

    # one (TM, 2H) accumulator:
    #   columns [:H]  -> W_hv pre-activation (image half + text half)
    #   columns [H:]  -> W_v projection (text half of wte is zero-padded)
    z = (jnp.dot(iv, wm_ref[...], preferred_element_type=jnp.float32)
         + jnp.dot(te, wte_ref[...], preferred_element_type=jnp.float32)
         + bm_ref[...])                                                 # (TM, 2H)

    weight_v = jnp.maximum(z[:, :hidden], 0.0)
    h_m = weight_v * z[:, hidden:]

    em_norm = jnp.sqrt(jnp.sum(te * te, axis=-1, keepdims=True))
    hm_norm = jnp.sqrt(jnp.sum(h_m * h_m, axis=-1, keepdims=True))
    hm_norm = jnp.where(hm_norm == 0.0, jnp.ones_like(hm_norm), hm_norm)

    thresh = em_norm / (hm_norm + 1e-6) * beta_shift
    alpha = jnp.minimum(thresh, 1.0)

    x = alpha * h_m + te

    # LayerNorm, one-pass statistics (PyTorch default eps=1e-5, biased variance)
    mean = jnp.mean(x, axis=-1, keepdims=True)
    mean_sq = jnp.mean(x * x, axis=-1, keepdims=True)
    var = mean_sq - mean * mean
    xn = (x - mean) * jax.lax.rsqrt(var + 1e-5)
    o_ref[...] = xn * g_ref[...] + bln_ref[...]
    # TODO(synk): dropout is applied as identity (inference mode); training-mode
    # dropout would use pltpu.prng_seed / pltpu.stateful_bernoulli here.


def fused_forward(patches, wt, te, wm, wte, bm, gamma, beta, *, beta_shift, hidden):
    """patches: (B, 4, 76, S); wt: (C_OUT, 76); te: (B*C_OUT, H);
    wm: (S, 2H); wte: (H, 2H); bm: (1, 2H); gamma/beta: (1, H)."""
    B, T, Kb, S = patches.shape
    assert C_OUT % TM == 0 and hidden % 128 == 0
    R = C_OUT // TM
    kern = functools.partial(_fused_kernel, beta_shift=float(beta_shift),
                             hidden=hidden)
    return pl.pallas_call(
        kern,
        out_shape=jax.ShapeDtypeStruct((B * C_OUT, hidden), jnp.float32),
        grid=(B, R),
        in_specs=[
            # patches indexed only by b -> fetched once per batch, revisited over r
            pl.BlockSpec((1, T, Kb, S), lambda b, r: (b, 0, 0, 0)),
            pl.BlockSpec((TM, Kb), lambda b, r: (r, 0)),             # conv W (+bias col)
            pl.BlockSpec((TM, hidden), lambda b, r: (b * R + r, 0)),  # text rows
            pl.BlockSpec((S, 2 * hidden), lambda b, r: (0, 0)),       # [W_hv_img | W_v]
            pl.BlockSpec((hidden, 2 * hidden), lambda b, r: (0, 0)),  # [W_hv_te | 0]
            pl.BlockSpec((1, 2 * hidden), lambda b, r: (0, 0)),       # [b_hv | b_v]
            pl.BlockSpec((1, hidden), lambda b, r: (0, 0)),           # LN gamma
            pl.BlockSpec((1, hidden), lambda b, r: (0, 0)),           # LN beta
        ],
        out_specs=pl.BlockSpec((TM, hidden), lambda b, r: (b * R + r, 0)),
        compiler_params=pltpu.CompilerParams(
            dimension_semantics=("parallel", "parallel")),
    )(patches, wt, te, wm, wte, bm, gamma, beta)


# ------------------------------------------------------------------
# Glue: pool-tap-grouped im2col patches built DIRECTLY from NCHW (no transposes):
#   patch[b, tap=(ph,pw), k=c*25+dy*5+dx, s=hp*Wp+wp] = x[b, c, 4hp+2ph+dy, 4wp+2pw+dx]
#   plus one trailing constant-1 row (k = 75) that carries the conv bias.
# ------------------------------------------------------------------
def _build_pooled_patches(image, Hp, Wp):
    B = image.shape[0]
    taps = []
    for ph in range(2):
        for pw in range(2):
            cols = []
            for dy in range(KSIZE):
                for dx in range(KSIZE):
                    y0 = 2 * ph + dy
                    x0 = 2 * pw + dx
                    cols.append(image[:, :, y0:y0 + 4 * Hp:4, x0:x0 + 4 * Wp:4])
            taps.append(jnp.stack(cols, axis=2))        # (B, 3, 25, Hp, Wp)
    p = jnp.stack(taps, axis=1)                         # (B, 4, 3, 25, Hp, Wp)
    p = p.reshape(B, N_TAPS, K_RAW, Hp * Wp)            # contiguous merges only
    p = jnp.pad(p, ((0, 0), (0, 0), (0, 1), (0, 0)), constant_values=1.0)
    return p                                            # (B, 4, 76, Hp*Wp)


# ------------------------------------------------------------------
# Forward pass
# ------------------------------------------------------------------
def image_model_forward(text_embedding, image, params, *, beta_shift):
    B = image.shape[0]
    Ho = (image.shape[2] - KSIZE) // STRIDE + 1
    Wo = (image.shape[3] - KSIZE) // STRIDE + 1
    Hp, Wp = Ho // 2, Wo // 2
    hidden = text_embedding.shape[-1]

    patches = _build_pooled_patches(image, Hp, Wp)              # (B, 4, 76, S)
    te = text_embedding.reshape(B * C_OUT, hidden)

    out = fused_forward(
        patches, params["wt_conv_b"], te,
        params["w_iv_merged"], params["w_te_merged"],
        params["b_merged"].reshape(1, 2 * hidden),
        params["gamma"].reshape(1, hidden), params["beta"].reshape(1, hidden),
        beta_shift=beta_shift, hidden=hidden)
    return out.reshape(B, C_OUT, hidden)


# ------------------------------------------------------------------
# Deterministic parameter init (synthetic; shapes from the module __init__)
# ------------------------------------------------------------------
def init_params(key, hidden):
    ks = jax.random.split(key, 7)
    w_conv = 0.05 * jax.random.normal(ks[0], (C_OUT, C_IN, KSIZE, KSIZE), jnp.float32)
    b_conv = 0.05 * jax.random.normal(ks[1], (C_OUT,), jnp.float32)
    w_hv_iv = 0.05 * jax.random.normal(ks[2], (WIDTH * WIDTH, hidden), jnp.float32)
    w_hv_te = 0.05 * jax.random.normal(ks[3], (hidden, hidden), jnp.float32)
    b_hv = 0.05 * jax.random.normal(ks[4], (hidden,), jnp.float32)
    w_v = 0.05 * jax.random.normal(ks[5], (WIDTH * WIDTH, hidden), jnp.float32)
    b_v = 0.05 * jax.random.normal(ks[6], (hidden,), jnp.float32)

    # conv weight for the fused kernel: OIHW flattened to (O, I*KH*KW) -- same k
    # ordering the patch builder uses -- with the bias folded in as column 75.
    wt_conv_b = jnp.concatenate(
        [w_conv.reshape(C_OUT, K_RAW), b_conv[:, None]], axis=1)   # (512, 76)

    # merged fusion weights: one (S, 2H) image-side matmul + one (H, 2H) text-side
    # matmul into the same accumulator (text half of W_v is zero).
    w_iv_merged = jnp.concatenate([w_hv_iv, w_v], axis=1)          # (576, 2H)
    w_te_merged = jnp.concatenate(
        [w_hv_te, jnp.zeros((hidden, hidden), jnp.float32)], axis=1)  # (H, 2H)
    b_merged = jnp.concatenate([b_hv, b_v], axis=0)                # (2H,)

    return dict(w_conv=w_conv, b_conv=b_conv,
                w_hv_iv=w_hv_iv, w_hv_te=w_hv_te, b_hv=b_hv,
                w_v=w_v, b_v=b_v,
                wt_conv_b=wt_conv_b, w_iv_merged=w_iv_merged,
                w_te_merged=w_te_merged, b_merged=b_merged,
                gamma=jnp.ones((hidden,), jnp.float32),
                beta=jnp.zeros((hidden,), jnp.float32))


# ------------------------------------------------------------------
# Pure-JAX reference (mirrors the PyTorch forward, eval-mode dropout)
# ------------------------------------------------------------------
def reference(text_embedding, image, params, beta_shift):
    conv = jax.lax.conv_general_dilated(
        image, params["w_conv"], window_strides=(STRIDE, STRIDE), padding="VALID",
        dimension_numbers=("NCHW", "OIHW", "NCHW"))
    conv = jnp.maximum(conv + params["b_conv"][None, :, None, None], 0.0)
    pooled = jax.lax.reduce_window(conv, -jnp.inf, jax.lax.max,
                                   (1, 1, 2, 2), (1, 1, 2, 2), "VALID")
    B = image.shape[0]
    iv = pooled.reshape(B, C_OUT, -1)
    whv_full = jnp.concatenate([params["w_hv_iv"], params["w_hv_te"]], axis=0)
    cat = jnp.concatenate([iv, text_embedding], axis=-1)
    weight_v = jnp.maximum(cat @ whv_full + params["b_hv"], 0.0)
    h_m = weight_v * (iv @ params["w_v"] + params["b_v"])
    em_norm = jnp.linalg.norm(text_embedding, axis=-1)
    hm_norm = jnp.linalg.norm(h_m, axis=-1)
    hm_norm = jnp.where(hm_norm == 0.0, 1.0, hm_norm)
    alpha = jnp.minimum(em_norm / (hm_norm + 1e-6) * beta_shift, 1.0)[..., None]
    x = alpha * h_m + text_embedding
    mean = jnp.mean(x, -1, keepdims=True)
    var = jnp.mean((x - mean) ** 2, -1, keepdims=True)
    return (x - mean) / jnp.sqrt(var + 1e-5) * params["gamma"] + params["beta"]


if __name__ == "__main__":
    B = 2
    HIDDEN_SIZE = 128    # lane-dense hidden size (multiple of 128)
    BETA_SHIFT = 0.5
    DROPOUT_PROB = 0.1   # identity at inference

    key = jax.random.PRNGKey(0)
    k_img, k_txt, k_par = jax.random.split(key, 3)
    # 100x100 input -> conv(5,s2): 48x48 -> maxpool(2,2): 24x24  (== module's self.width)
    image = jax.random.normal(k_img, (B, C_IN, 100, 100), jnp.float32)
    text = jax.random.normal(k_txt, (B, C_OUT, HIDDEN_SIZE), jnp.float32)
    params = init_params(k_par, HIDDEN_SIZE)

    fwd = jax.jit(functools.partial(image_model_forward, beta_shift=BETA_SHIFT))
    out = jax.block_until_ready(fwd(text, image, params))

    ref = reference(text, image, params, BETA_SHIFT)
    err = float(jnp.max(jnp.abs(out - ref)))
    assert out.shape == (B, C_OUT, HIDDEN_SIZE), out.shape
    assert err < 2e-3, f"max abs err vs reference: {err}"
    print("KERNEL_OK")
</pallas_src>

<mosaic_0001>
module attributes {stable_mosaic.version = 11 : i64} {
  func.func @_fused_kernel(%arg0: i32, %arg1: i32, %arg2: memref<1x4x76x576xf32, #tpu.memory_space<vmem>>, %arg3: memref<128x76xf32, #tpu.memory_space<vmem>>, %arg4: memref<128x128xf32, #tpu.memory_space<vmem>>, %arg5: memref<576x256xf32, #tpu.memory_space<vmem>>, %arg6: memref<128x256xf32, #tpu.memory_space<vmem>>, %arg7: memref<1x256xf32, #tpu.memory_space<vmem>>, %arg8: memref<1x128xf32, #tpu.memory_space<vmem>>, %arg9: memref<1x128xf32, #tpu.memory_space<vmem>>, %arg10: memref<128x128xf32, #tpu.memory_space<vmem>>) attributes {dimension_semantics = [#tpu.dimension_semantics<parallel>, #tpu.dimension_semantics<parallel>], iteration_bounds = array<i64: 2, 4>, scalar_prefetch = 0 : i64, scratch_operands = 0 : i64, tpu.core_type = #tpu.core_type<tc>, window_params = [{transform_indices = @transform_0, window_bounds = array<i64: 1, 4, 76, 576>}, {transform_indices = @transform_1, window_bounds = array<i64: 128, 76>}, {transform_indices = @transform_2, window_bounds = array<i64: 128, 128>}, {pipeline_mode = #tpu.pipeline_mode<synchronous>, transform_indices = @transform_3, window_bounds = array<i64: 576, 256>}, {pipeline_mode = #tpu.pipeline_mode<synchronous>, transform_indices = @transform_4, window_bounds = array<i64: 128, 256>}, {pipeline_mode = #tpu.pipeline_mode<synchronous>, transform_indices = @transform_5, window_bounds = array<i64: 1, 256>}, {pipeline_mode = #tpu.pipeline_mode<synchronous>, transform_indices = @transform_6, window_bounds = array<i64: 1, 128>}, {pipeline_mode = #tpu.pipeline_mode<synchronous>, transform_indices = @transform_7, window_bounds = array<i64: 1, 128>}, {transform_indices = @transform_8, window_bounds = array<i64: 128, 128>}]} {
    %c0 = arith.constant 0 : index
    %c0_0 = arith.constant 0 : index
    %0 = vector.load %arg3[%c0, %c0_0] : memref<128x76xf32, #tpu.memory_space<vmem>>, vector<128x76xf32>
    %c0_1 = arith.constant 0 : index
    %c0_2 = arith.constant 0 : index
    %c0_3 = arith.constant 0 : index
    %c0_4 = arith.constant 0 : index
    %1 = vector.load %arg2[%c0_1, %c0_2, %c0_3, %c0_4] : memref<1x4x76x576xf32, #tpu.memory_space<vmem>>, vector<1x1x76x576xf32>
    %2 = vector.shape_cast %1 : vector<1x1x76x576xf32> to vector<76x576xf32>
    %cst = arith.constant dense<0.000000e+00> : vector<128x576xf32>
    %3 = tpu.matmul %0, %2, %cst {dimension_numbers = #tpu.dot_dimension_numbers<[1], [0], [0], [1], [0, 0, 1, 1], [], []>} : vector<128x76xf32>, vector<76x576xf32>, vector<128x576xf32> -> vector<128x576xf32>
    %c0_5 = arith.constant 0 : index
    %c1 = arith.constant 1 : index
    %c0_6 = arith.constant 0 : index
    %c0_7 = arith.constant 0 : index
    %4 = vector.load %arg2[%c0_5, %c1, %c0_6, %c0_7] : memref<1x4x76x576xf32, #tpu.memory_space<vmem>>, vector<1x1x76x576xf32>
    %5 = vector.shape_cast %4 : vector<1x1x76x576xf32> to vector<76x576xf32>
    %cst_8 = arith.constant dense<0.000000e+00> : vector<128x576xf32>
    %6 = tpu.matmul %0, %5, %cst_8 {dimension_numbers = #tpu.dot_dimension_numbers<[1], [0], [0], [1], [0, 0, 1, 1], [], []>} : vector<128x76xf32>, vector<76x576xf32>, vector<128x576xf32> -> vector<128x576xf32>
    %7 = arith.maximumf %3, %6 : vector<128x576xf32>
    %c0_9 = arith.constant 0 : index
    %c2 = arith.constant 2 : index
    %c0_10 = arith.constant 0 : index
    %c0_11 = arith.constant 0 : index
    %8 = vector.load %arg2[%c0_9, %c2, %c0_10, %c0_11] : memref<1x4x76x576xf32, #tpu.memory_space<vmem>>, vector<1x1x76x576xf32>
    %9 = vector.shape_cast %8 : vector<1x1x76x576xf32> to vector<76x576xf32>
    %cst_12 = arith.constant dense<0.000000e+00> : vector<128x576xf32>
    %10 = tpu.matmul %0, %9, %cst_12 {dimension_numbers = #tpu.dot_dimension_numbers<[1], [0], [0], [1], [0, 0, 1, 1], [], []>} : vector<128x76xf32>, vector<76x576xf32>, vector<128x576xf32> -> vector<128x576xf32>
    %11 = arith.maximumf %7, %10 : vector<128x576xf32>
    %c0_13 = arith.constant 0 : index
    %c3 = arith.constant 3 : index
    %c0_14 = arith.constant 0 : index
    %c0_15 = arith.constant 0 : index
    %12 = vector.load %arg2[%c0_13, %c3, %c0_14, %c0_15] : memref<1x4x76x576xf32, #tpu.memory_space<vmem>>, vector<1x1x76x576xf32>
    %13 = vector.shape_cast %12 : vector<1x1x76x576xf32> to vector<76x576xf32>
    %cst_16 = arith.constant dense<0.000000e+00> : vector<128x576xf32>
    %14 = tpu.matmul %0, %13, %cst_16 {dimension_numbers = #tpu.dot_dimension_numbers<[1], [0], [0], [1], [0, 0, 1, 1], [], []>} : vector<128x76xf32>, vector<76x576xf32>, vector<128x576xf32> -> vector<128x576xf32>
    %15 = arith.maximumf %11, %14 : vector<128x576xf32>
    %cst_17 = arith.constant 0.000000e+00 : f32
    %16 = vector.broadcast %cst_17 : f32 to vector<128x576xf32>
    %17 = arith.maximumf %15, %16 : vector<128x576xf32>
    %c0_18 = arith.constant 0 : index
    %c0_19 = arith.constant 0 : index
    %18 = vector.load %arg4[%c0_18, %c0_19] : memref<128x128xf32, #tpu.memory_space<vmem>>, vector<128x128xf32>
    %c0_20 = arith.constant 0 : index
    %c0_21 = arith.constant 0 : index
    %19 = vector.load %arg5[%c0_20, %c0_21] : memref<576x256xf32, #tpu.memory_space<vmem>>, vector<576x256xf32>
    %cst_22 = arith.constant dense<0.000000e+00> : vector<128x256xf32>
    %20 = tpu.matmul %17, %19, %cst_22 {dimension_numbers = #tpu.dot_dimension_numbers<[1], [0], [0], [1], [0, 0, 1, 1], [], []>} : vector<128x576xf32>, vector<576x256xf32>, vector<128x256xf32> -> vector<128x256xf32>
    %c0_23 = arith.constant 0 : index
    %c0_24 = arith.constant 0 : index
    %21 = vector.load %arg6[%c0_23, %c0_24] : memref<128x256xf32, #tpu.memory_space<vmem>>, vector<128x256xf32>
    %cst_25 = arith.constant dense<0.000000e+00> : vector<128x256xf32>
    %22 = tpu.matmul %18, %21, %cst_25 {dimension_numbers = #tpu.dot_dimension_numbers<[1], [0], [0], [1], [0, 0, 1, 1], [], []>} : vector<128x128xf32>, vector<128x256xf32>, vector<128x256xf32> -> vector<128x256xf32>
    %23 = arith.addf %20, %22 : vector<128x256xf32>
    %c0_26 = arith.constant 0 : index
    %c0_27 = arith.constant 0 : index
    %24 = vector.load %arg7[%c0_26, %c0_27] : memref<1x256xf32, #tpu.memory_space<vmem>>, vector<1x256xf32>
    %25 = vector.broadcast %24 : vector<1x256xf32> to vector<128x256xf32>
    %26 = arith.addf %23, %25 : vector<128x256xf32>
    %27 = vector.extract_strided_slice %26 {offsets = [0, 0], sizes = [128, 128], strides = [1, 1]} : vector<128x256xf32> to vector<128x128xf32>
    %cst_28 = arith.constant 0.000000e+00 : f32
    %28 = vector.broadcast %cst_28 : f32 to vector<128x128xf32>
    %29 = arith.maximumf %27, %28 : vector<128x128xf32>
    %30 = vector.extract_strided_slice %26 {offsets = [0, 128], sizes = [128, 128], strides = [1, 1]} : vector<128x256xf32> to vector<128x128xf32>
    %31 = arith.mulf %29, %30 : vector<128x128xf32>
    %32 = arith.mulf %18, %18 : vector<128x128xf32>
    %cst_29 = arith.constant dense<0.000000e+00> : vector<128xf32>
    %33 = vector.multi_reduction <add>, %32, %cst_29 [1] : vector<128x128xf32> to vector<128xf32>
    %34 = vector.shape_cast %33 : vector<128xf32> to vector<128x1xf32>
    %35 = math.sqrt %34 : vector<128x1xf32>
    %36 = arith.mulf %31, %31 : vector<128x128xf32>
    %cst_30 = arith.constant dense<0.000000e+00> : vector<128xf32>
    %37 = vector.multi_reduction <add>, %36, %cst_30 [1] : vector<128x128xf32> to vector<128xf32>
    %38 = vector.shape_cast %37 : vector<128xf32> to vector<128x1xf32>
    %39 = math.sqrt %38 : vector<128x1xf32>
    %cst_31 = arith.constant 0.000000e+00 : f32
    %40 = vector.broadcast %cst_31 : f32 to vector<128x1xf32>
    %41 = arith.cmpf oeq, %39, %40 : vector<128x1xf32>
    %cst_32 = arith.constant 1.000000e+00 : f32
    %42 = vector.broadcast %cst_32 : f32 to vector<128x1xf32>
    %43 = arith.select %41, %42, %39 : vector<128x1xi1>, vector<128x1xf32>
    %cst_33 = arith.constant 9.99999997E-7 : f32
    %44 = vector.broadcast %cst_33 : f32 to vector<128x1xf32>
    %45 = arith.addf %43, %44 : vector<128x1xf32>
    %46 = arith.divf %35, %45 : vector<128x1xf32>
    %cst_34 = arith.constant 5.000000e-01 : f32
    %47 = vector.broadcast %cst_34 : f32 to vector<128x1xf32>
    %48 = arith.mulf %46, %47 : vector<128x1xf32>
    %cst_35 = arith.constant 1.000000e+00 : f32
    %49 = vector.broadcast %cst_35 : f32 to vector<128x1xf32>
    %50 = arith.minimumf %48, %49 : vector<128x1xf32>
    %51 = vector.broadcast %50 : vector<128x1xf32> to vector<128x128xf32>
    %52 = arith.mulf %51, %31 : vector<128x128xf32>
    %53 = arith.addf %52, %18 : vector<128x128xf32>
    %cst_36 = arith.constant dense<0.000000e+00> : vector<128xf32>
    %54 = vector.multi_reduction <add>, %53, %cst_36 [1] : vector<128x128xf32> to vector<128xf32>
    %55 = vector.shape_cast %54 : vector<128xf32> to vector<128x1xf32>
    %cst_37 = arith.constant 1.280000e+02 : f32
    %56 = vector.broadcast %cst_37 : f32 to vector<128x1xf32>
    %57 = arith.divf %55, %56 : vector<128x1xf32>
    %58 = arith.mulf %53, %53 : vector<128x128xf32>
    %cst_38 = arith.constant dense<0.000000e+00> : vector<128xf32>
    %59 = vector.multi_reduction <add>, %58, %cst_38 [1] : vector<128x128xf32> to vector<128xf32>
    %60 = vector.shape_cast %59 : vector<128xf32> to vector<128x1xf32>
    %cst_39 = arith.constant 1.280000e+02 : f32
    %61 = vector.broadcast %cst_39 : f32 to vector<128x1xf32>
    %62 = arith.divf %60, %61 : vector<128x1xf32>
    %63 = arith.mulf %57, %57 : vector<128x1xf32>
    %64 = arith.subf %62, %63 : vector<128x1xf32>
    %65 = vector.broadcast %57 : vector<128x1xf32> to vector<128x128xf32>
    %66 = arith.subf %53, %65 : vector<128x128xf32>
    %cst_40 = arith.constant 9.99999974E-6 : f32
    %67 = vector.broadcast %cst_40 : f32 to vector<128x1xf32>
    %68 = arith.addf %64, %67 : vector<128x1xf32>
    %69 = math.rsqrt %68 : vector<128x1xf32>
    %70 = vector.broadcast %69 : vector<128x1xf32> to vector<128x128xf32>
    %71 = arith.mulf %66, %70 : vector<128x128xf32>
    %c0_41 = arith.constant 0 : index
    %c0_42 = arith.constant 0 : index
    %72 = vector.load %arg8[%c0_41, %c0_42] : memref<1x128xf32, #tpu.memory_space<vmem>>, vector<1x128xf32>
    %73 = vector.broadcast %72 : vector<1x128xf32> to vector<128x128xf32>
    %74 = arith.mulf %71, %73 : vector<128x128xf32>
    %c0_43 = arith.constant 0 : index
    %c0_44 = arith.constant 0 : index
    %75 = vector.load %arg9[%c0_43, %c0_44] : memref<1x128xf32, #tpu.memory_space<vmem>>, vector<1x128xf32>
    %76 = vector.broadcast %75 : vector<1x128xf32> to vector<128x128xf32>
    %77 = arith.addf %74, %76 : vector<128x128xf32>
    %c0_45 = arith.constant 0 : index
    %c0_46 = arith.constant 0 : index
    %78 = vector.load %arg10[%c0_45, %c0_46] : memref<128x128xf32, #tpu.memory_space<vmem>>, vector<128x128xf32>
    tpu.vector_store %arg10[%c0_45, %c0_46], %77 {strides = array<i32>} : memref<128x128xf32, #tpu.memory_space<vmem>>, vector<128x128xf32>,
    return
  }
  func.func @transform_0(%arg0: i32, %arg1: i32) -> (i32, i32, i32, i32) {
    %c0_i32 = arith.constant 0 : i32
    %c0_i32_0 = arith.constant 0 : i32
    %c0_i32_1 = arith.constant 0 : i32
    %c0_i32_2 = arith.constant 0 : i32
    return %arg0, %c0_i32, %c0_i32_0, %c0_i32_1 : i32, i32, i32, i32
  }
  func.func @transform_1(%arg0: i32, %arg1: i32) -> (i32, i32) {
    %c0_i32 = arith.constant 0 : i32
    %c0_i32_0 = arith.constant 0 : i32
    return %arg1, %c0_i32 : i32, i32
  }
  func.func @transform_2(%arg0: i32, %arg1: i32) -> (i32, i32) {
    %c4_i32 = arith.constant 4 : i32
    %0 = arith.muli %arg0, %c4_i32 : i32
    %1 = arith.addi %0, %arg1 : i32
    %c0_i32 = arith.constant 0 : i32
    %c0_i32_0 = arith.constant 0 : i32
    return %1, %c0_i32 : i32, i32
  }
  func.func @transform_3(%arg0: i32, %arg1: i32) -> (i32, i32) {
    %c0_i32 = arith.constant 0 : i32
    %c0_i32_0 = arith.constant 0 : i32
    %c0_i32_1 = arith.constant 0 : i32
    return %c0_i32, %c0_i32_0 : i32, i32
  }
  func.func @transform_4(%arg0: i32, %arg1: i32) -> (i32, i32) {
    %c0_i32 = arith.constant 0 : i32
    %c0_i32_0 = arith.constant 0 : i32
    %c0_i32_1 = arith.constant 0 : i32
    return %c0_i32, %c0_i32_0 : i32, i32
  }
  func.func @transform_5(%arg0: i32, %arg1: i32) -> (i32, i32) {
    %c0_i32 = arith.constant 0 : i32
    %c0_i32_0 = arith.constant 0 : i32
    %c0_i32_1 = arith.constant 0 : i32
    return %c0_i32, %c0_i32_0 : i32, i32
  }
  func.func @transform_6(%arg0: i32, %arg1: i32) -> (i32, i32) {
    %c0_i32 = arith.constant 0 : i32
    %c0_i32_0 = arith.constant 0 : i32
    %c0_i32_1 = arith.constant 0 : i32
    return %c0_i32, %c0_i32_0 : i32, i32
  }
  func.func @transform_7(%arg0: i32, %arg1: i32) -> (i32, i32) {
    %c0_i32 = arith.constant 0 : i32
    %c0_i32_0 = arith.constant 0 : i32
    %c0_i32_1 = arith.constant 0 : i32
    return %c0_i32, %c0_i32_0 : i32, i32
  }
  func.func @transform_8(%arg0: i32, %arg1: i32) -> (i32, i32) {
    %c4_i32 = arith.constant 4 : i32
    %0 = arith.muli %arg0, %c4_i32 : i32
    %1 = arith.addi %0, %arg1 : i32
    %c0_i32 = arith.constant 0 : i32
    %c0_i32_0 = arith.constant 0 : i32
    return %1, %c0_i32 : i32, i32
  }
}

</mosaic_0001>

<bundles_post_ra>
// kernel: image_model_forward.1
= control target key start
LH: loop header
LB: loop body
LE: loop exit
PB: predicated region body
PF: predicated region fallthrough
CT: control target
= control target key end

     0   :  { %13 = vsyncpa [#allocation3], 0  ;;  %s9764_s0 = inlined_call_operand.vmem [shape: f32[2,4,76,576], index: 0, kind: input, shape index: {}]   ;;  %s9765_s1 = inlined_call_operand.vmem [shape: f32[512,76], index: 1, kind: input, shape index: {}]   ;;  %s9766_s2 = inlined_call_operand.vmem [shape: f32[1024,128], index: 2, kind: input, shape index: {}]   ;;  %s9767_s3 = inlined_call_operand.vmem [shape: f32[576,256], index: 3, kind: input, shape index: {}]   ;;  %s9768_s4 = inlined_call_operand.vmem [shape: f32[128,256], index: 4, kind: input, shape index: {}]   ;;  %s9769_s5 = inlined_call_operand.vmem [shape: f32[1,256], index: 5, kind: input, shape index: {}]   ;;  %s9770_s6 = inlined_call_operand.vmem [shape: f32[1,128], index: 6, kind: input, shape index: {}]   ;;  %s9771_s7 = inlined_call_operand.vmem [shape: f32[1,128], index: 7, kind: input, shape index: {}]   ;;  %s9772_s8 = inlined_call_operand.hbm [shape: f32[1024,128], index: 8, kind: output, shape index: {}]  }
   0x1   :  { %15 = vsyncpa [#allocation3 + $0x1], 0  ;;  %s6316_s27 = smov 0   ;;  %s6318_s28 = smov 0  }
   0x2   :  { %s6320_s29 = smov 0   ;;  %s6322_s30 = smov 0  }
   0x3   :  { %s6324_s9 = smov 0   ;;  %s6326_s10 = smov 0  }
   0x4   :  { %s6328_s11 = smov 0   ;;  %s6330_s12 = smov 0  }
   0x5 LB: > { %s4709_s13 = sadd.s32 4294967295, %s6264_s12   ;;  %s30_s14 = sadd.s32 1, %s6256_s10  ;;  %s6264_s12 = sphi %s6330_s12, %s21_s12   ;;  %s6260_s11 = sphi %s6328_s11, %s10346_s11   ;;  %s6256_s10 = sphi %s6326_s10, %s10345_s10   ;;  %s6252_s9 = sphi %s6324_s9, %s10344_s9   ;;  %s6248_s30 = sphi %s6322_s30, %s10343_s30   ;;  %s6244_s29 = sphi %s6320_s29, %s10342_s29   ;;  %s6240_s28 = sphi %s6318_s28, %s10341_s28   ;;  %s6236_s27 = sphi %s6316_s27, %s10340_s27  }
   0x6   : > { %s33_s15 = sadd.s32 1, %s6260_s11  ;;  %p31_p0 = scmp.ge.s32.totalorder %s30_s14, 4 }
   0x7   : > { %s4713_s16 = sshll.u32 %s6260_s11, 2  ;;  %s4710_s17 = sadd.s32 4294967294, %s6264_s12  }
   0x8   : > { %s225_s18 = sadd.s32 %s6256_s10, %s4713_s16  ;;  %s10348_s14 = smov (%p31_p0, %s30_s14), 0 }
   0x9   : > { %s10350_s15 = smov (!%p31_p0, %s33_s15), %s6260_s11  ;;  %p241_p1 = scmp.ne.s32.totalorder %s6244_s29, %s6240_s28 }
   0xa   : > { %p242_p2 = scmp.eq.s32.totalorder %s4709_s13, 7  ;;  %p35_p3 = scmp.ge.s32.totalorder %s10350_s15, 2 }
   0xb   : > { %p247_p4 = scmp.ne.s32.totalorder %s6240_s28, %s6236_s27  ;;  %p248_p6 = scmp.eq.s32.totalorder %s4710_s17, 7 }
   0xc   : > { %p6369_p5 = por %p242_p2, %p241_p1  ;;  %s10352_s15 = smov (%p35_p3, %s10350_s15), 0 }
   0xd   : > { %p6375_p7 = por %p248_p6, %p247_p4  ;;  %p4717_p8 = scmp.ge.s32.totalorder %s6264_s12, 1 }
   0xe   : > { %s4714_s21 = sshll.u32 %s10352_s15, 2  ;;  %p311_p9 = scmp.lt.s32.totalorder %s6264_s12, 9 }
   0xf   : > { %s227_s22 = sadd.s32 %s4714_s21, %s10348_s14  ;;  %s231_s23 = sadd.s32 1, %s6244_s29 }
  0x10   : > { %s228_s24 = ssub.s32 %s225_s18, %s227_s22  ;;  %p312_p10 = pnand %p4717_p8, %p311_p9 }
  0x11   : > { %p229_p11 = scmp.eq.s32.totalorder %s228_s24, 0 }
  0x12   : > { %315 = sbr.rel (%p312_p10) target bundleno = 1416 (0x588), region = 52 }
  0x13   : > { %s6385_s25 = scalar_select %p229_p11, %s6244_s29, %s231_s23  }
  0x19   : > { %p357_p12 = scmp.lt.s32.totalorder %s6252_s9, 1  ;;  %s4720_s26 = sshll.u32 %s6248_s30, 4  ;;  %v9773_v0 = vmov 0.0   ;;  %vm447_vm0 = vcmask 621568   ;;  %vm496_vm1 = vcmask 1043456   ;;  %vm6267_vm2 = vmmov 1  }
  0x1a   : > { %576 = vmatprep.mubr.f32.mxu1 %v9773_v0  ;;  %p363_p13 = scmp.lt.s32.totalorder %s4720_s26, 63  ;;  %vm6426_vm3 = vmpackc.low %vm496_vm1, %vm6267_vm2  ;;  %v3087_v31 = vld [vmem:[%s9768_s4 + $0xe8] sm:$0xff]  ;;  %vm3251_vm4 = vcmask 523264   ;;  %s6268_s21 = smov [#allocation2]  }
  0x1b   : > { %s358_s13 = scalar_select %p357_p12, %s6252_s9, 1 }
  0x1c   : > { %s10354_s26 = smov (!%p363_p13, %s4720_s26), 63 }
  0x1d   : > { %s5928_s16 = smul.u32 1600, %s358_s13  ;;  %s4721_s22 = sshll.u32 %s10354_s26, 3 }
  0x1e   : > { %s6409_s13 = scalar_lea.vmem %s9765_s1, %s4721_s22 }
  0x1f   : > { %s6394_s18 = scalar_lea.vmem %s9764_s0, %s5928_s16  ;;  %v6416_v20 = vld [vmem:[%s6409_s13] sm:$0xff]  ;;  %v6452_v52 = vld [vmem:[%s6409_s13 + $0x8] sm:$0xff]  ;;  %v6464_v62 = vld [vmem:[%s6409_s13 + $0x10] sm:$0xff] }
  0x20   : > { %v398_v1 = vld [vmem:[%s6394_s18 + $0x8] sm:$0xff]  ;;  %v403_v2 = vld [vmem:[%s6394_s18 + $0x30] sm:$0xff]  ;;  %v397_v3 = vld [vmem:[%s6394_s18] sm:$0xff]  ;;  %5236 = vmatprep.mubr.msk.f32.mxu0 %vm447_vm0, %v6416_v20 }
  0x21   : > { %v5392_v4 = vpack.c.bf16 %v403_v2, %v398_v1  ;;  %v402_v5 = vld [vmem:[%s6394_s18 + $0x28] sm:$0xff]  ;;  %v408_v6 = vld [vmem:[%s6394_s18 + $0x58] sm:$0xff]  ;;  %v413_v7 = vld [vmem:[%s6394_s18 + $0x80] sm:$0xff] }
  0x22   : > { %v5394_v8 = vpack.c.bf16 %v402_v5, %v397_v3  ;;  %v5396_v9 = vpack.c.bf16 %v413_v7, %v408_v6  ;;  %v407_v10 = vld [vmem:[%s6394_s18 + $0x50] sm:$0xff]  ;;  %v412_v11 = vld [vmem:[%s6394_s18 + $0x78] sm:$0xff]  ;;  %v418_v12 = vld [vmem:[%s6394_s18 + $0xa8] sm:$0xff] }
  0x23   : > { %5393 = vmatprep.subr.bf16.mxu1 %v5392_v4  ;;  %v423_v13 = vld [vmem:[%s6394_s18 + $0xd0] sm:$0xff]  ;;  %v5398_v14 = vpack.c.bf16 %v412_v11, %v407_v10  ;;  %v417_v16 = vld [vmem:[%s6394_s18 + $0xa0] sm:$0xff]  ;;  %v422_v17 = vld [vmem:[%s6394_s18 + $0xc8] sm:$0xff] }
  0x24   : > { %5395 = vmatpush1.bf16.msra.mxu1 %v5394_v8  ;;  %v5400_v15 = vpack.c.bf16 %v423_v13, %v418_v12  ;;  %v428_v18 = vld [vmem:[%s6394_s18 + $0xf8] sm:$0xff]  ;;  %v433_v19 = vld [vmem:[%s6394_s18 + $0x120] sm:$0xff]  ;;  %v5402_v21 = vpack.c.bf16 %v422_v17, %v417_v16  ;;  %v427_v23 = vld [vmem:[%s6394_s18 + $0xf0] sm:$0xff] }
  0x25   : > { %5397 = vmatprep.subr.bf16.mxu1 %v5396_v9  ;;  %v5404_v22 = vpack.c.bf16 %v433_v19, %v428_v18  ;;  %v432_v24 = vld [vmem:[%s6394_s18 + $0x118] sm:$0xff]  ;;  %v438_v25 = vld [vmem:[%s6394_s18 + $0x148] sm:$0xff]  ;;  %v443_v26 = vld [vmem:[%s6394_s18 + $0x170] sm:$0xf] }
  0x26   : > { %v5406_v27 = vpack.c.bf16 %v432_v24, %v427_v23  ;;  %v5408_v28 = vpack.c.bf16 %v443_v26, %v438_v25  ;;  %v437_v29 = vld [vmem:[%s6394_s18 + $0x140] sm:$0xff]  ;;  %v442_v30 = vld [vmem:[%s6394_s18 + $0x168] sm:$0xf]  ;;  %v400_v32 = vld [vmem:[%s6394_s18 + $0x18] sm:$0xff] }
  0x27   : > { %v405_v33 = vld [vmem:[%s6394_s18 + $0x40] sm:$0xff]  ;;  %v5411_v34 = vpack.c.bf16 %v442_v30, %v437_v29  ;;  %v399_v36 = vld [vmem:[%s6394_s18 + $0x10] sm:$0xff]  ;;  %v404_v37 = vld [vmem:[%s6394_s18 + $0x38] sm:$0xff] }
  0x28   : > { %5399 = vmatpush1.bf16.msra.mxu1 %v5398_v14  ;;  %v5414_v35 = vpack.c.bf16 %v405_v33, %v400_v32  ;;  %v410_v38 = vld [vmem:[%s6394_s18 + $0x68] sm:$0xff]  ;;  %v415_v39 = vld [vmem:[%s6394_s18 + $0x90] sm:$0xff]  ;;  %v5416_v40 = vpack.c.bf16 %v404_v37, %v399_v36  ;;  %v409_v41 = vld [vmem:[%s6394_s18 + $0x60] sm:$0xff] }
  0x29   : > { %5401 = vmatprep.subr.bf16.mxu1 %v5400_v15  ;;  %v401_v42 = vld [vmem:[%s6394_s18 + $0x20] sm:$0xff]  ;;  %v5418_v43 = vpack.c.bf16 %v415_v39, %v410_v38  ;;  %v414_v44 = vld [vmem:[%s6394_s18 + $0x88] sm:$0xff]  ;;  %v420_v45 = vld [vmem:[%s6394_s18 + $0xb8] sm:$0xff] }
  0x2a   : > { %v406_v46 = vld [vmem:[%s6394_s18 + $0x48] sm:$0xff]  ;;  %v425_v47 = vld [vmem:[%s6394_s18 + $0xe0] sm:$0xff]  ;;  %v411_v49 = vld [vmem:[%s6394_s18 + $0x70] sm:$0xff]  ;;  %v5420_v53 = vpack.c.bf16 %v414_v44, %v409_v41 }
  0x2b   : > { %v5436_v48 = vpack.c.bf16 %v406_v46, %v401_v42  ;;  %v416_v50 = vld [vmem:[%s6394_s18 + $0x98] sm:$0xff]  ;;  %v421_v54 = vld [vmem:[%s6394_s18 + $0xc0] sm:$0xff]  ;;  %v426_v55 = vld [vmem:[%s6394_s18 + $0xe8] sm:$0xff]  ;;  %v5422_v56 = vpack.c.bf16 %v425_v47, %v420_v45 }
  0x2c   : > { %5403 = vmatpush1.bf16.msra.mxu1 %v5402_v21  ;;  %v5440_v51 = vpack.c.bf16 %v416_v50, %v411_v49  ;;  %v419_v57 = vld [vmem:[%s6394_s18 + $0xb0] sm:$0xff]  ;;  %v424_v58 = vld [vmem:[%s6394_s18 + $0xd8] sm:$0xff]  ;;  %v430_v59 = vld [vmem:[%s6394_s18 + $0x108] sm:$0xff]  ;;  %v5444_v61 = vpack.c.bf16 %v426_v55, %v421_v54 }
  0x2d   : > { %5405 = vmatprep.subr.bf16.mxu1 %v5404_v22  ;;  %5437 = vmatprep.subr.bf16.mxu0 %v5436_v48  ;;  %v435_v60 = vld [vmem:[%s6394_s18 + $0x130] sm:$0xff]  ;;  %v5424_v63 = vpack.c.bf16 %v424_v58, %v419_v57  ;;  %v436_v2 = vld [vmem:[%s6394_s18 + $0x138] sm:$0xff]  ;;  %v429_v4 = vld [vmem:[%s6394_s18 + $0x100] sm:$0xff] }
  0x2e   : > { %5439 = vmatpush3.bf16.msra.mxu0 %v5436_v48  ;;  %v431_v1 = vld [vmem:[%s6394_s18 + $0x110] sm:$0xff]  ;;  %v5426_v3 = vpack.c.bf16 %v435_v60, %v430_v59  ;;  %v434_v5 = vld [vmem:[%s6394_s18 + $0x128] sm:$0xff]  ;;  %v440_v6 = vld [vmem:[%s6394_s18 + $0x158] sm:$0xff] }
  0x2f   : > { %5441 = vmatprep.subr.bf16.mxu0 %v5440_v51  ;;  %v445_v7 = vld [vmem:[%s6394_s18 + $0x180] sm:$0xf]  ;;  %v5448_v8 = vpack.c.bf16 %v436_v2, %v431_v1  ;;  %v6476_v9 = vld [vmem:[%s6409_s13 + $0x18] sm:$0xff]  ;;  %v5428_v10 = vpack.c.bf16 %v434_v5, %v429_v4  ;;  %v446_v12 = vld [vmem:[%s6394_s18 + $0x188] sm:$0xf] }
  0x30   : > { %5407 = vmatpush1.bf16.msra.mxu1 %v5406_v27  ;;  %v441_v11 = vld [vmem:[%s6394_s18 + $0x160] sm:$0xff]  ;;  %v5430_v13 = vpack.c.bf16 %v445_v7, %v440_v6  ;;  %v439_v14 = vld [vmem:[%s6394_s18 + $0x150] sm:$0xff]  ;;  %v444_v15 = vld [vmem:[%s6394_s18 + $0x178] sm:$0xf] }
  0x31   : > { %5410 = vmatprep.subr.msk.bf16.mxu1 %vm6426_vm3, %v5408_v28  ;;  %v4779_v16 = vld [vmem:[%s6394_s18 + $0x198] sm:$0xff]  ;;  %v4784_v17 = vld [vmem:[%s6394_s18 + $0x1c0] sm:$0xff]  ;;  %v5452_v18 = vpack.c.bf16 %v446_v12, %v441_v11  ;;  %v5433_v21 = vpack.c.bf16 %v444_v15, %v439_v14  ;;  %v4882_v22 = vld [vmem:[%s6394_s18 + $0x328] sm:$0xff] }
  0x32   : > { %5443 = vmatpush3.bf16.msra.mxu0 %v5440_v51  ;;  %v6488_v19 = vld [vmem:[%s6409_s13 + $0x20] sm:$0xff]  ;;  %v4887_v23 = vld [vmem:[%s6394_s18 + $0x350] sm:$0xff]  ;;  %v5458_v24 = vpack.c.bf16 %v4784_v17, %v4779_v16  ;;  %v4886_v27 = vld [vmem:[%s6394_s18 + $0x348] sm:$0xff] }
  0x33   : > { %5445 = vmatprep.subr.bf16.mxu0 %v5444_v61  ;;  %v5524_v25 = vpack.c.bf16 %v4887_v23, %v4882_v22  ;;  %v4881_v26 = vld [vmem:[%s6394_s18 + $0x320] sm:$0xff]  ;;  %v6502_v28 = vld [vmem:[%s6409_s13 + $0x28] sm:$0xff]  ;;  %v4892_v29 = vld [vmem:[%s6394_s18 + $0x378] sm:$0xff] }
  0x34   : > { %5413 = vmatpush1.bf16.msk.msra.mxu1 %vm6426_vm3, %v5411_v34  ;;  %v4897_v30 = vld [vmem:[%s6394_s18 + $0x3a0] sm:$0xff]  ;;  %v5526_v32 = vpack.c.bf16 %v4886_v27, %v4881_v26  ;;  %v4891_v34 = vld [vmem:[%s6394_s18 + $0x370] sm:$0xff]  ;;  %v4902_v37 = vld [vmem:[%s6394_s18 + $0x3c8] sm:$0xff] }
  0x35   : > { %5415 = vmatprep.subr.bf16.mxu1 %v5414_v35  ;;  %v5528_v33 = vpack.c.bf16 %v4897_v30, %v4892_v29  ;;  %v4896_v35 = vld [vmem:[%s6394_s18 + $0x398] sm:$0xff]  ;;  %v6516_v36 = vld [vmem:[%s6409_s13 + $0x30] sm:$0xff]  ;;  %v4901_v41 = vld [vmem:[%s6394_s18 + $0x3c0] sm:$0xff] }
  0x36   : > { %5447 = vmatpush3.bf16.msra.mxu0 %v5444_v61  ;;  %v4907_v38 = vld [vmem:[%s6394_s18 + $0x3f0] sm:$0xff]  ;;  %v5530_v39 = vpack.c.bf16 %v4896_v35, %v4891_v34  ;;  %v4906_v42 = vld [vmem:[%s6394_s18 + $0x3e8] sm:$0xff]  ;;  %v4912_v44 = vld [vmem:[%s6394_s18 + $0x418] sm:$0xff] }
  0x37   : > { %4727 = vmatmul.mubr.msk.f32.vlgmr.msra.gmra.mrb[0].mxu1 %vm447_vm0, %v6416_v20  ;;  %5449 = vmatprep.subr.bf16.mxu0 %v5448_v8  ;;  %v4917_v45 = vld [vmem:[%s6394_s18 + $0x440] sm:$0xff]  ;;  %v5534_v46 = vpack.c.bf16 %v4906_v42, %v4901_v41  ;;  %v4911_v48 = vld [vmem:[%s6394_s18 + $0x410] sm:$0xff]  ;;  %v4916_v49 = vld [vmem:[%s6394_s18 + $0x438] sm:$0xff] }
  0x38   : > { %5417 = vmatpush1.bf16.msra.mxu1 %v5416_v40  ;;  %582 = vmatprep.mubr.f32.mxu1 %v9773_v0  ;;  %v5532_v40 = vpack.c.bf16 %v4907_v38, %v4902_v37  ;;  %v5536_v47 = vpack.c.bf16 %v4917_v45, %v4912_v44  ;;  %v6544_v50 = vld [vmem:[%s6409_s13 + $0x40] sm:$0xff]  ;;  %v4922_v51 = vld [vmem:[%s6394_s18 + $0x468] sm:$0xff]  ;;  %v5538_v54 = vpack.c.bf16 %v4916_v49, %v4911_v48  ;;  %v6570_v60 = vld [vmem:[%s6409_s13 + $0x50] sm:$0xff] }
  0x39   : > { %5419 = vmatprep.subr.bf16.mxu1 %v5418_v43  ;;  %v6530_v43 = vld [vmem:[%s6409_s13 + $0x38] sm:$0xff]  ;;  %v4926_v57 = vld [vmem:[%s6394_s18 + $0x488] sm:$0xf]  ;;  %v6598_v2 = vld [vmem:[%s6409_s13 + $0x70] sm:$0xff] }
  0x3a   : > { %5451 = vmatpush3.bf16.msra.mxu0 %v5448_v8  ;;  %v6558_v58 = vld [vmem:[%s6409_s13 + $0x48] sm:$0xff]  ;;  %v6582_v61 = vld [vmem:[%s6409_s13 + $0x58] sm:$0xff]  ;;  %v4778_v4 = vld [vmem:[%s6394_s18 + $0x190] sm:$0xff] }
  0x3b   : > { %4728 = vmatmul.mubr.msk.f32.gmra.mrb[2].mxu1 %vm447_vm0, %v6452_v52  ;;  %5454 = vmatprep.subr.msk.bf16.mxu0 %vm6426_vm3, %v5452_v18  ;;  %v6595_v1 = vld [vmem:[%s6409_s13 + $0x68] sm:$0xff]  ;;  %v4783_v5 = vld [vmem:[%s6394_s18 + $0x1b8] sm:$0xff]  ;;  %v4794_v7 = vld [vmem:[%s6394_s18 + $0x210] sm:$0xff] }
  0x3c   : > { %588 = vmatprep.mubr.f32.mxu1 %v9773_v0  ;;  %5421 = vmatpush1.bf16.msra.mxu1 %v5420_v53  ;;  %v4927_v53 = vld [vmem:[%s6394_s18 + $0x490] sm:$0xf]  ;;  %v4789_v6 = vld [vmem:[%s6394_s18 + $0x1e8] sm:$0xff]  ;;  %v5460_v8 = vpack.c.bf16 %v4783_v5, %v4778_v4  ;;  %v4788_v11 = vld [vmem:[%s6394_s18 + $0x1e0] sm:$0xff] }
  0x3d   : > { %5423 = vmatprep.subr.bf16.mxu1 %v5422_v56  ;;  %v5540_v55 = vpack.c.bf16 %v4927_v53, %v4922_v51  ;;  %v4921_v56 = vld [vmem:[%s6394_s18 + $0x460] sm:$0xff]  ;;  %v4793_v12 = vld [vmem:[%s6394_s18 + $0x208] sm:$0xff]  ;;  %v4798_v17 = vld [vmem:[%s6394_s18 + $0x230] sm:$0xff] }
  0x3e   : > { %5457 = vmatpush3.bf16.msk.msra.mxu0 %vm6426_vm3, %v5452_v18  ;;  %v5543_v59 = vpack.c.bf16 %v4926_v57, %v4921_v56  ;;  %v4804_v14 = vld [vmem:[%s6394_s18 + $0x260] sm:$0xff]  ;;  %v5464_v15 = vpack.c.bf16 %v4793_v12, %v4788_v11  ;;  %v4803_v18 = vld [vmem:[%s6394_s18 + $0x258] sm:$0xff]  ;;  %v4814_v22 = vld [vmem:[%s6394_s18 + $0x2b0] sm:$0xff] }
  0x3f   : > { %4729 = vmatmul.mubr.msk.f32.gmra.mrb[4].mxu1 %vm447_vm0, %v6464_v62  ;;  %5525 = vmatprep.subr.bf16.mxu0 %v5524_v25  ;;  %v5468_v23 = vpack.c.bf16 %v4803_v18, %v4798_v17  ;;  %v4808_v25 = vld [vmem:[%s6394_s18 + $0x280] sm:$0xff]  ;;  %v4813_v26 = vld [vmem:[%s6394_s18 + $0x2a8] sm:$0xff]  ;;  %v4819_v27 = vld [vmem:[%s6394_s18 + $0x2d8] sm:$0xff] }
  0x40   : > { %594 = vmatprep.mubr.f32.mxu1 %v9773_v0  ;;  %5425 = vmatpush1.bf16.msra.mxu1 %v5424_v63  ;;  %v6585_v63 = vld [vmem:[%s6409_s13 + $0x60] sm:$0xff]  ;;  %v5472_v30 = vpack.c.bf16 %v4813_v26, %v4808_v25  ;;  %v4823_v34 = vld [vmem:[%s6394_s18 + $0x2f8] sm:$0xf]  ;;  %v4781_v35 = vld [vmem:[%s6394_s18 + $0x1a8] sm:$0xff] }
  0x41   : > { %5427 = vmatprep.subr.bf16.mxu1 %v5426_v3  ;;  %5237 = vmatmul.mubr.msk.f32.vlgmr.msra.gmra.mrb[0].mxu0 %vm447_vm0, %v6452_v52  ;;  %v6608_v3 = vld [vmem:[%s6409_s13 + $0x78] sm:$0xff]  ;;  %v4824_v29 = vld [vmem:[%s6394_s18 + $0x300] sm:$0xf]  ;;  %v4786_v37 = vld [vmem:[%s6394_s18 + $0x1d0] sm:$0xff] }
  0x42   : > { %5239 = vmatprep.mubr.msk.f32.mxu0 %vm447_vm0, %v6464_v62  ;;  %5527 = vmatpush1.bf16.msra.mxu0 %v5526_v32  ;;  %v5474_v32 = vpack.c.bf16 %v4824_v29, %v4819_v27  ;;  %v4890_v41 = vld [vmem:[%s6394_s18 + $0x368] sm:$0xff]  ;;  %v4895_v44 = vld [vmem:[%s6394_s18 + $0x390] sm:$0xff]  ;;  %v4900_v45 = vld [vmem:[%s6394_s18 + $0x3b8] sm:$0xff] }
  0x43   : > { %4730 = vmatmul.mubr.msk.f32.gmra.mrb[6].mxu1 %vm447_vm0, %v6476_v9  ;;  %5529 = vmatprep.subr.bf16.mxu0 %v5528_v33  ;;  %v4818_v33 = vld [vmem:[%s6394_s18 + $0x2d0] sm:$0xff]  ;;  %v4910_v48 = vld [vmem:[%s6394_s18 + $0x408] sm:$0xff]  ;;  %v4920_v53 = vld [vmem:[%s6394_s18 + $0x458] sm:$0xff] }
  0x44   : > { %600 = vmatprep.mubr.f32.mxu1 %v9773_v0  ;;  %5429 = vmatpush1.bf16.msra.mxu1 %v5428_v10  ;;  %v5462_v10 = vpack.c.bf16 %v4794_v7, %v4789_v6  ;;  %v5477_v38 = vpack.c.bf16 %v4823_v34, %v4818_v33  ;;  %v4915_v51 = vld [vmem:[%s6394_s18 + $0x430] sm:$0xff]  ;;  %v4785_v56 = vld [vmem:[%s6394_s18 + $0x1c8] sm:$0xff]  ;;  %v4791_v57 = vld [vmem:[%s6394_s18 + $0x1f8] sm:$0xff] }
  0x45   : > { %5432 = vmatprep.subr.msk.bf16.mxu1 %vm6426_vm3, %v5430_v13  ;;  %5240 = vmatmul.mubr.msk.f32.gmra.mrb[2].mxu0 %vm447_vm0, %v6476_v9  ;;  %v4799_v13 = vld [vmem:[%s6394_s18 + $0x238] sm:$0xff]  ;;  %v4925_v4 = vld [vmem:[%s6394_s18 + $0x480] sm:$0xff]  ;;  %v4930_v5 = vld [vmem:[%s6394_s18 + $0x4a8] sm:$0xf] }
  0x46   : > { %5242 = vmatprep.mubr.msk.f32.mxu0 %vm447_vm0, %v6488_v19  ;;  %5531 = vmatpush1.bf16.msra.mxu0 %v5530_v39  ;;  %v5466_v16 = vpack.c.bf16 %v4804_v14, %v4799_v13  ;;  %v5480_v39 = vpack.c.bf16 %v4786_v37, %v4781_v35  ;;  %v5584_v6 = vpack.c.bf16 %v4930_v5, %v4925_v4  ;;  %v4795_v11 = vld [vmem:[%s6394_s18 + $0x218] sm:$0xff]  ;;  %v4801_v12 = vld [vmem:[%s6394_s18 + $0x248] sm:$0xff]  ;;  %v4806_v13 = vld [vmem:[%s6394_s18 + $0x270] sm:$0xff] }
  0x47   : > { %4731 = vmatmul.mubr.msk.f32.gmra.mrb[8].mxu1 %vm447_vm0, %v6488_v19  ;;  %5533 = vmatprep.subr.bf16.mxu0 %v5532_v40  ;;  %v4885_v40 = vld [vmem:[%s6394_s18 + $0x340] sm:$0xff]  ;;  %v4805_v17 = vld [vmem:[%s6394_s18 + $0x268] sm:$0xff]  ;;  %v4811_v18 = vld [vmem:[%s6394_s18 + $0x298] sm:$0xff] }
  0x48   : > { %606 = vmatprep.mubr.f32.mxu1 %v9773_v0  ;;  %5435 = vmatpush1.bf16.msk.msra.mxu1 %vm6426_vm3, %v5433_v21  ;;  %v4809_v21 = vld [vmem:[%s6394_s18 + $0x288] sm:$0xff]  ;;  %v5568_v42 = vpack.c.bf16 %v4890_v41, %v4885_v40  ;;  %v4815_v25 = vld [vmem:[%s6394_s18 + $0x2b8] sm:$0xff]  ;;  %v4826_v27 = vld [vmem:[%s6394_s18 + $0x310] sm:$0xf] }
  0x49   : > { %5459 = vmatprep.subr.bf16.mxu1 %v5458_v24  ;;  %5243 = vmatmul.mubr.msk.f32.gmra.mrb[4].mxu0 %vm447_vm0, %v6502_v28  ;;  %v5470_v24 = vpack.c.bf16 %v4814_v22, %v4809_v21  ;;  %v4816_v21 = vld [vmem:[%s6394_s18 + $0x2c0] sm:$0xff]  ;;  %v4821_v26 = vld [vmem:[%s6394_s18 + $0x2e8] sm:$0xff]  ;;  %v4782_v34 = vld [vmem:[%s6394_s18 + $0x1b0] sm:$0xff] }
  0x4a   : > { %5245 = vmatprep.mubr.msk.f32.mxu0 %vm447_vm0, %v6516_v36  ;;  %5535 = vmatpush1.bf16.msra.mxu0 %v5534_v46  ;;  %v5572_v46 = vpack.c.bf16 %v4900_v45, %v4895_v44  ;;  %v4825_v33 = vld [vmem:[%s6394_s18 + $0x308] sm:$0xf]  ;;  %v4787_v35 = vld [vmem:[%s6394_s18 + $0x1d8] sm:$0xff]  ;;  %v4986_v41 = vld [vmem:[%s6394_s18 + $0x4c0] sm:$0xff] }
  0x4b   : > { %4732 = vmatmul.mubr.msk.f32.gmra.mrb[10].mxu1 %vm447_vm0, %v6502_v28  ;;  %5537 = vmatprep.subr.bf16.mxu0 %v5536_v47  ;;  %v4905_v47 = vld [vmem:[%s6394_s18 + $0x3e0] sm:$0xff]  ;;  %v4987_v37 = vld [vmem:[%s6394_s18 + $0x4c8] sm:$0xff]  ;;  %v6807_v44 = vpack.c.bf16 %v4787_v35, %v4782_v34  ;;  %v5017_v5 = vld [vmem:[%s6394_s18 + $0x5b8] sm:$0xff] }
  0x4c   : > { %612 = vmatprep.mubr.f32.mxu1 %v9773_v0  ;;  %v5576_v49 = vpack.c.bf16 %v4910_v48, %v4905_v47  ;;  %v5002_v47 = vld [vmem:[%s6394_s18 + $0x540] sm:$0xff] }
  0x4d   : > { %5246 = vmatmul.mubr.msk.f32.gmra.mrb[6].mxu0 %vm447_vm0, %v6530_v43 }
  0x4e   : > { %5248 = vmatprep.mubr.msk.f32.mxu0 %vm447_vm0, %v6544_v50  ;;  %5539 = vmatpush1.bf16.msra.mxu0 %v5538_v54  ;;  %v5580_v54 = vpack.c.bf16 %v4920_v53, %v4915_v51  ;;  %v5001_v51 = vld [vmem:[%s6394_s18 + $0x538] sm:$0xff] }
  0x4f   : > { %4733 = vmatmul.mubr.msk.f32.gmra.mrb[12].mxu1 %vm447_vm0, %v6516_v36  ;;  %5542 = vmatprep.subr.msk.bf16.mxu0 %vm6426_vm3, %v5540_v55  ;;  %v4780_v55 = vld [vmem:[%s6394_s18 + $0x1a0] sm:$0xff] }
  0x50   : > { %618 = vmatprep.mubr.f32.mxu1 %v9773_v0  ;;  %v5482_v7 = vpack.c.bf16 %v4785_v56, %v4780_v55  ;;  %v5012_v55 = vld [vmem:[%s6394_s18 + $0x590] sm:$0xff] }
  0x51   : > { %5249 = vmatmul.mubr.msk.f32.gmra.mrb[8].mxu0 %vm447_vm0, %v6558_v58 }
  0x52   : > { %5251 = vmatprep.mubr.msk.f32.mxu0 %vm447_vm0, %v6570_v60  ;;  %5545 = vmatpush1.bf16.msk.msra.mxu0 %vm6426_vm3, %v5543_v59  ;;  %v4796_v59 = vld [vmem:[%s6394_s18 + $0x220] sm:$0xff] }
  0x53   : > { %4734 = vmatmul.mubr.msk.f32.gmra.mrb[14].mxu1 %vm447_vm0, %v6530_v43  ;;  %5569 = vmatprep.subr.bf16.mxu0 %v5568_v42 }
  0x54   : > { %624 = vmatprep.mubr.f32.mxu1 %v9773_v0 }
  0x55   : > { %5252 = vmatmul.mubr.msk.f32.gmra.mrb[10].mxu0 %vm447_vm0, %v6582_v61 }
  0x56   : > { %5254 = vmatprep.mubr.msk.f32.mxu0 %vm447_vm0, %v6585_v63 }
  0x57   : > { %4735 = vmatmul.mubr.msk.f32.gmra.mrb[16].mxu1 %vm447_vm0, %v6544_v50 }
  0x58   : > { %630 = vmatprep.mubr.f32.mxu1 %v9773_v0 }
  0x59   : > { %5255 = vmatmul.mubr.msk.f32.gmra.mrb[12].mxu0 %vm447_vm0, %v6595_v1 }
  0x5a   : > { %5257 = vmatprep.mubr.msk.f32.mxu0 %vm447_vm0, %v6598_v2 }
  0x5b   : > { %4736 = vmatmul.mubr.msk.f32.gmra.mrb[18].mxu1 %vm447_vm0, %v6558_v58 }
  0x5c   : > { %636 = vmatprep.mubr.f32.mxu1 %v9773_v0 }
  0x5d   : > { %5258 = vmatmul.mubr.msk.f32.gmra.mrb[14].mxu0 %vm447_vm0, %v6608_v3 }
  0x5e   : > { %1722 = vmatprep.mubr.f32.mxu0 %v9773_v0 }
  0x5f   : > { %4737 = vmatmul.mubr.msk.f32.gmra.mrb[20].mxu1 %vm447_vm0, %v6570_v60 }
  0x60   : > { %642 = vmatprep.mubr.f32.mxu1 %v9773_v0 }
  0x61   : > { %4933 = vmatmul.mubr.msk.f32.vlgmr.msra.gmra.mrb[16].mxu0 %vm447_vm0, %v6416_v20 }
  0x62   : > { %1728 = vmatprep.mubr.f32.mxu0 %v9773_v0  ;;  %5571 = vmatpush3.bf16.msra.mxu0 %v5568_v42  ;;  %v4991_v42 = vld [vmem:[%s6394_s18 + $0x4e8] sm:$0xff] }
  0x63   : > { %4738 = vmatmul.mubr.msk.f32.gmra.mrb[22].mxu1 %vm447_vm0, %v6582_v61  ;;  %5573 = vmatprep.subr.bf16.mxu0 %v5572_v46  ;;  %v5614_v45 = vpack.c.bf16 %v4991_v42, %v4986_v41 }
  0x64   : > { %648 = vmatprep.mubr.f32.mxu1 %v9773_v0 }
  0x65   : > { %4934 = vmatmul.mubr.msk.f32.gmra.mrb[18].mxu0 %vm447_vm0, %v6452_v52 }
  0x66   : > { %1734 = vmatprep.mubr.f32.mxu0 %v9773_v0  ;;  %5575 = vmatpush3.bf16.msra.mxu0 %v5572_v46  ;;  %v4997_v46 = vld [vmem:[%s6394_s18 + $0x518] sm:$0xff] }
  0x67   : > { %4739 = vmatmul.mubr.msk.f32.gmra.mrb[24].mxu1 %vm447_vm0, %v6585_v63  ;;  %5577 = vmatprep.subr.bf16.mxu0 %v5576_v49  ;;  %v5616_v48 = vpack.c.bf16 %v5002_v47, %v4997_v46 }
  0x68   : > { %654 = vmatprep.mubr.f32.mxu1 %v9773_v0 }
  0x69   : > { %4935 = vmatmul.mubr.msk.f32.gmra.mrb[20].mxu0 %vm447_vm0, %v6464_v62 }
  0x6a   : > { %1740 = vmatprep.mubr.f32.mxu0 %v9773_v0  ;;  %5579 = vmatpush3.bf16.msra.mxu0 %v5576_v49  ;;  %v4996_v49 = vld [vmem:[%s6394_s18 + $0x510] sm:$0xff] }
  0x6b   : > { %4740 = vmatmul.mubr.msk.f32.gmra.mrb[26].mxu1 %vm447_vm0, %v6595_v1  ;;  %5581 = vmatprep.subr.bf16.mxu0 %v5580_v54  ;;  %v5618_v53 = vpack.c.bf16 %v5001_v51, %v4996_v49 }
  0x6c   : > { %660 = vmatprep.mubr.f32.mxu1 %v9773_v0 }
  0x6d   : > { %4936 = vmatmul.mubr.msk.f32.gmra.mrb[22].mxu0 %vm447_vm0, %v6476_v9 }
  0x6e   : > { %1746 = vmatprep.mubr.f32.mxu0 %v9773_v0  ;;  %5583 = vmatpush3.bf16.msra.mxu0 %v5580_v54  ;;  %v5007_v54 = vld [vmem:[%s6394_s18 + $0x568] sm:$0xff] }
  0x6f   : > { %4741 = vmatmul.mubr.msk.f32.gmra.mrb[28].mxu1 %vm447_vm0, %v6598_v2  ;;  %5586 = vmatprep.subr.msk.bf16.mxu0 %vm6426_vm3, %v5584_v6  ;;  %v5620_v56 = vpack.c.bf16 %v5012_v55, %v5007_v54 }
  0x70   : > { %666 = vmatprep.mubr.f32.mxu1 %v9773_v0 }
  0x71   : > { %4937 = vmatmul.mubr.msk.f32.gmra.mrb[24].mxu0 %vm447_vm0, %v6488_v19 }
  0x72   : > { %1752 = vmatprep.mubr.f32.mxu0 %v9773_v0  ;;  %5589 = vmatpush3.bf16.msk.msra.mxu0 %vm6426_vm3, %v5584_v6  ;;  %v5022_v6 = vld [vmem:[%s6394_s18 + $0x5e0] sm:$0xff] }
  0x73   : > { %4742 = vmatmul.mubr.msk.f32.gmra.mrb[30].mxu1 %vm447_vm0, %v6608_v3 }
  0x74   : > { %737 = vmatprep.mubr.f32.mxu1 %v9773_v0 }
  0x75   : > { %4938 = vmatmul.mubr.msk.f32.gmra.mrb[26].mxu0 %vm447_vm0, %v6502_v28 }
  0x76   : > { %1758 = vmatprep.mubr.f32.mxu0 %v9773_v0 }
  0x77   : > { %4745 = vmatmul.mubr.msk.f32.vlgmr.msra.gmra.mrb[32].mxu1 %vm447_vm0, %v6416_v20 }
  0x78   : > { %5461 = vmatpush1.bf16.msra.mxu1 %v5460_v8  ;;  %743 = vmatprep.mubr.f32.mxu1 %v9773_v0  ;;  %v5484_v8 = vpack.c.bf16 %v4796_v59, %v4791_v57  ;;  %v5006_v57 = vld [vmem:[%s6394_s18 + $0x560] sm:$0xff]  ;;  %v5011_v59 = vld [vmem:[%s6394_s18 + $0x588] sm:$0xff] }
  0x79   : > { %5463 = vmatprep.subr.bf16.mxu1 %v5462_v10  ;;  %4939 = vmatmul.mubr.msk.f32.gmra.mrb[28].mxu0 %vm447_vm0, %v6516_v36  ;;  %v4790_v10 = vld [vmem:[%s6394_s18 + $0x1f0] sm:$0xff]  ;;  %v5622_v4 = vpack.c.bf16 %v5011_v59, %v5006_v57 }
  0x7a   : > { %1764 = vmatprep.mubr.f32.mxu0 %v9773_v0  ;;  %v5486_v14 = vpack.c.bf16 %v4795_v11, %v4790_v10  ;;  %v5021_v10 = vld [vmem:[%s6394_s18 + $0x5d8] sm:$0xff] }
  0x7b   : > { %4746 = vmatmul.mubr.msk.f32.gmra.mrb[34].mxu1 %vm447_vm0, %v6452_v52 }
  0x7c   : > { %749 = vmatprep.mubr.f32.mxu1 %v9773_v0  ;;  %5465 = vmatpush1.bf16.msra.mxu1 %v5464_v15  ;;  %v5488_v15 = vpack.c.bf16 %v4806_v13, %v4801_v12  ;;  %v5027_v12 = vld [vmem:[%s6394_s18 + $0x608] sm:$0xff]  ;;  %v5032_v13 = vld [vmem:[%s6394_s18 + $0x630] sm:$0xf] }
  0x7d   : > { %5467 = vmatprep.subr.bf16.mxu1 %v5466_v16  ;;  %4940 = vmatmul.mubr.msk.f32.gmra.mrb[30].mxu0 %vm447_vm0, %v6530_v43  ;;  %v4800_v16 = vld [vmem:[%s6394_s18 + $0x240] sm:$0xff] }
  0x7e   : > { %1770 = vmatprep.mubr.f32.mxu0 %v9773_v0  ;;  %v5490_v22 = vpack.c.bf16 %v4805_v17, %v4800_v16  ;;  %v5031_v16 = vld [vmem:[%s6394_s18 + $0x628] sm:$0xf] }
  0x7f   : > { %4747 = vmatmul.mubr.msk.f32.gmra.mrb[36].mxu1 %vm447_vm0, %v6464_v62 }
  0x80   : > { %755 = vmatprep.mubr.f32.mxu1 %v9773_v0  ;;  %5469 = vmatpush1.bf16.msra.mxu1 %v5468_v23  ;;  %v5492_v23 = vpack.c.bf16 %v4816_v21, %v4811_v18  ;;  %v4792_v18 = vld [vmem:[%s6394_s18 + $0x200] sm:$0xff]  ;;  %v4797_v21 = vld [vmem:[%s6394_s18 + $0x228] sm:$0xff] }
  0x81   : > { %5471 = vmatprep.subr.bf16.mxu1 %v5470_v24  ;;  %4941 = vmatmul.mubr.msk.f32.gmra.mrb[32].mxu0 %vm447_vm0, %v6544_v50  ;;  %v4810_v24 = vld [vmem:[%s6394_s18 + $0x290] sm:$0xff] }
  0x82   : > { %1776 = vmatprep.mubr.f32.mxu0 %v9773_v0  ;;  %v5494_v29 = vpack.c.bf16 %v4815_v25, %v4810_v24  ;;  %v4807_v24 = vld [vmem:[%s6394_s18 + $0x278] sm:$0xff] }
  0x83   : > { %4748 = vmatmul.mubr.msk.f32.gmra.mrb[38].mxu1 %vm447_vm0, %v6476_v9 }
  0x84   : > { %761 = vmatprep.mubr.f32.mxu1 %v9773_v0  ;;  %5473 = vmatpush1.bf16.msra.mxu1 %v5472_v30  ;;  %v5496_v30 = vpack.c.bf16 %v4826_v27, %v4821_v26  ;;  %v4812_v26 = vld [vmem:[%s6394_s18 + $0x2a0] sm:$0xff]  ;;  %v4817_v27 = vld [vmem:[%s6394_s18 + $0x2c8] sm:$0xff] }
  0x85   : > { %5476 = vmatprep.subr.msk.bf16.mxu1 %vm6426_vm3, %v5474_v32  ;;  %4942 = vmatmul.mubr.msk.f32.gmra.mrb[34].mxu0 %vm447_vm0, %v6558_v58  ;;  %v4820_v32 = vld [vmem:[%s6394_s18 + $0x2e0] sm:$0xff] }
  0x86   : > { %1782 = vmatprep.mubr.f32.mxu0 %v9773_v0  ;;  %v5499_v40 = vpack.c.bf16 %v4825_v33, %v4820_v32  ;;  %v4884_v32 = vld [vmem:[%s6394_s18 + $0x338] sm:$0xff]  ;;  %v4889_v33 = vld [vmem:[%s6394_s18 + $0x360] sm:$0xff] }
  0x87   : > { %4749 = vmatmul.mubr.msk.f32.gmra.mrb[40].mxu1 %vm447_vm0, %v6488_v19 }
  0x88   : > { %767 = vmatprep.mubr.f32.mxu1 %v9773_v0  ;;  %5479 = vmatpush1.bf16.msk.msra.mxu1 %vm6426_vm3, %v5477_v38  ;;  %v4992_v38 = vld [vmem:[%s6394_s18 + $0x4f0] sm:$0xff] }
  0x89   : > { %5481 = vmatprep.subr.bf16.mxu1 %v5480_v39  ;;  %4943 = vmatmul.mubr.msk.f32.gmra.mrb[36].mxu0 %vm447_vm0, %v6570_v60  ;;  %v5612_v39 = vpack.c.bf16 %v4992_v38, %v4987_v37 }
  0x8a   : > { %1788 = vmatprep.mubr.f32.mxu0 %v9773_v0 }
  0x8b   : > { %4750 = vmatmul.mubr.msk.f32.gmra.mrb[42].mxu1 %vm447_vm0, %v6502_v28  ;;  %5613 = vmatprep.subr.bf16.mxu0 %v5612_v39 }
  0x8c   : > { %773 = vmatprep.mubr.f32.mxu1 %v9773_v0 }
  0x8d   : > { %4944 = vmatmul.mubr.msk.f32.gmra.mrb[38].mxu0 %vm447_vm0, %v6582_v61 }
  0x8e   : > { %1794 = vmatprep.mubr.f32.mxu0 %v9773_v0 }
  0x8f   : > { %4751 = vmatmul.mubr.msk.f32.gmra.mrb[44].mxu1 %vm447_vm0, %v6516_v36 }
  0x90   : > { %779 = vmatprep.mubr.f32.mxu1 %v9773_v0 }
  0x91   : > { %4945 = vmatmul.mubr.msk.f32.gmra.mrb[40].mxu0 %vm447_vm0, %v6585_v63 }
  0x92   : > { %1800 = vmatprep.mubr.f32.mxu0 %v9773_v0 }
  0x93   : > { %4752 = vmatmul.mubr.msk.f32.gmra.mrb[46].mxu1 %vm447_vm0, %v6530_v43 }
  0x94   : > { %785 = vmatprep.mubr.f32.mxu1 %v9773_v0 }
  0x95   : > { %4946 = vmatmul.mubr.msk.f32.gmra.mrb[42].mxu0 %vm447_vm0, %v6595_v1 }
  0x96   : > { %1806 = vmatprep.mubr.f32.mxu0 %v9773_v0 }
  0x97   : > { %4753 = vmatmul.mubr.msk.f32.gmra.mrb[48].mxu1 %vm447_vm0, %v6544_v50 }
  0x98   : > { %791 = vmatprep.mubr.f32.mxu1 %v9773_v0 }
  0x99   : > { %4947 = vmatmul.mubr.msk.f32.gmra.mrb[44].mxu0 %vm447_vm0, %v6598_v2 }
  0x9a   : > { %1812 = vmatprep.mubr.f32.mxu0 %v9773_v0 }
  0x9b   : > { %4754 = vmatmul.mubr.msk.f32.gmra.mrb[50].mxu1 %vm447_vm0, %v6558_v58 }
  0x9c   : > { %797 = vmatprep.mubr.f32.mxu1 %v9773_v0 }
  0x9d   : > { %4948 = vmatmul.mubr.msk.f32.gmra.mrb[46].mxu0 %vm447_vm0, %v6608_v3 }
  0x9e   : > { %5324 = vmatprep.mubr.msk.f32.mxu0 %vm447_vm0, %v6416_v20 }
  0x9f   : > { %4755 = vmatmul.mubr.msk.f32.gmra.mrb[52].mxu1 %vm447_vm0, %v6570_v60 }
  0xa0   : > { %803 = vmatprep.mubr.f32.mxu1 %v9773_v0 }
  0xa1   : > { %5325 = vmatmul.mubr.msk.f32.vlgmr.msra.gmra.mrb[48].mxu0 %vm447_vm0, %v6452_v52 }
  0xa2   : > { %5327 = vmatprep.mubr.msk.f32.mxu0 %vm447_vm0, %v6464_v62  ;;  %5615 = vmatpush1.bf16.msra.mxu0 %v5614_v45 }
  0xa3   : > { %4756 = vmatmul.mubr.msk.f32.gmra.mrb[54].mxu1 %vm447_vm0, %v6582_v61  ;;  %5617 = vmatprep.subr.bf16.mxu0 %v5616_v48 }
  0xa4   : > { %809 = vmatprep.mubr.f32.mxu1 %v9773_v0 }
  0xa5   : > { %5328 = vmatmul.mubr.msk.f32.gmra.mrb[50].mxu0 %vm447_vm0, %v6476_v9 }
  0xa6   : > { %5330 = vmatprep.mubr.msk.f32.mxu0 %vm447_vm0, %v6488_v19  ;;  %5619 = vmatpush1.bf16.msra.mxu0 %v5618_v53 }
  0xa7   : > { %4757 = vmatmul.mubr.msk.f32.gmra.mrb[56].mxu1 %vm447_vm0, %v6585_v63  ;;  %5621 = vmatprep.subr.bf16.mxu0 %v5620_v56 }
  0xa8   : > { %815 = vmatprep.mubr.f32.mxu1 %v9773_v0 }
  0xa9   : > { %5331 = vmatmul.mubr.msk.f32.gmra.mrb[52].mxu0 %vm447_vm0, %v6502_v28 }
  0xaa   : > { %5333 = vmatprep.mubr.msk.f32.mxu0 %vm447_vm0, %v6516_v36  ;;  %5623 = vmatpush1.bf16.msra.mxu0 %v5622_v4 }
  0xab   : > { %4758 = vmatmul.mubr.msk.f32.gmra.mrb[58].mxu1 %vm447_vm0, %v6595_v1 }
  0xac   : > { %821 = vmatprep.mubr.f32.mxu1 %v9773_v0 }
  0xad   : > { %5334 = vmatmul.mubr.msk.f32.gmra.mrb[54].mxu0 %vm447_vm0, %v6530_v43 }
  0xae   : > { %5336 = vmatprep.mubr.msk.f32.mxu0 %vm447_vm0, %v6544_v50 }
  0xaf   : > { %4759 = vmatmul.mubr.msk.f32.gmra.mrb[60].mxu1 %vm447_vm0, %v6598_v2 }
  0xb0   : > { %827 = vmatprep.mubr.f32.mxu1 %v9773_v0 }
  0xb1   : > { %5337 = vmatmul.mubr.msk.f32.gmra.mrb[56].mxu0 %vm447_vm0, %v6558_v58 }
  0xb2   : > { %5339 = vmatprep.mubr.msk.f32.mxu0 %vm447_vm0, %v6570_v60 }
  0xb3   : > { %4760 = vmatmul.mubr.msk.f32.gmra.mrb[62].mxu1 %vm447_vm0, %v6608_v3 }
  0xb4   : > { %1109 = vmatprep.mubr.f32.mxu1 %v9773_v0 }
  0xb5   : > { %5340 = vmatmul.mubr.msk.f32.gmra.mrb[58].mxu0 %vm447_vm0, %v6582_v61 }
  0xb6   : > { %5342 = vmatprep.mubr.msk.f32.mxu0 %vm447_vm0, %v6585_v63 }
  0xb7   : > { %4830 = vmatmul.mubr.msk.f32.vlgmr.msra.gmra.mrb[64].mxu1 %vm447_vm0, %v6416_v20 }
  0xb8   : > { %5483 = vmatpush1.bf16.msra.mxu1 %v5482_v7  ;;  %1115 = vmatprep.mubr.f32.mxu1 %v9773_v0  ;;  %v5624_v7 = vpack.c.bf16 %v5022_v6, %v5017_v5 }
  0xb9   : > { %5485 = vmatprep.subr.bf16.mxu1 %v5484_v8  ;;  %v5016_v8 = vld [vmem:[%s6394_s18 + $0x5b0] sm:$0xff]  ;;  %5343 = vmatmul.mubr.msk.f32.gmra.mrb[60].mxu0 %vm447_vm0, %v6595_v1 }
  0xba   : > { %5625 = vmatprep.subr.bf16.mxu0 %v5624_v7  ;;  %v5626_v11 = vpack.c.bf16 %v5021_v10, %v5016_v8  ;;  %5345 = vmatprep.mubr.msk.f32.mxu0 %vm447_vm0, %v6598_v2 }
  0xbb   : > { %4831 = vmatmul.mubr.msk.f32.gmra.mrb[66].mxu1 %vm447_vm0, %v6452_v52 }
  0xbc   : > { %1121 = vmatprep.mubr.f32.mxu1 %v9773_v0  ;;  %5487 = vmatpush1.bf16.msra.mxu1 %v5486_v14  ;;  %v5628_v14 = vpack.c.bf16 %v5032_v13, %v5027_v12  ;;  %v4883_v12 = vld [vmem:[%s6394_s18 + $0x330] sm:$0xff]  ;;  %v4888_v13 = vld [vmem:[%s6394_s18 + $0x358] sm:$0xff] }
  0xbd   : > { %5489 = vmatprep.subr.bf16.mxu1 %v5488_v15  ;;  %5627 = vmatpush1.bf16.msra.mxu0 %v5626_v11  ;;  %v5026_v15 = vld [vmem:[%s6394_s18 + $0x600] sm:$0xff] }
  0xbe   : > { %v5631_v17 = vpack.c.bf16 %v5031_v16, %v5026_v15  ;;  %5346 = vmatmul.mubr.msk.f32.gmra.mrb[62].mxu0 %vm447_vm0, %v6608_v3  ;;  %5630 = vmatprep.subr.msk.bf16.mxu0 %vm6426_vm3, %v5628_v14  ;;  %v4894_v16 = vld [vmem:[%s6394_s18 + $0x388] sm:$0xff] }
  0xbf   : > { %4832 = vmatmul.mubr.msk.f32.gmra.mrb[68].mxu1 %vm447_vm0, %v6464_v62  ;;  %2496 = vmatprep.mubr.f32.mxu0 %v9773_v0 }
  0xc0   : > { %1127 = vmatprep.mubr.f32.mxu1 %v9773_v0  ;;  %5491 = vmatpush1.bf16.msra.mxu1 %v5490_v22  ;;  %v5506_v22 = vpack.c.bf16 %v4797_v21, %v4792_v18  ;;  %v7066_v21 = vld [vmem:[%s6409_s13] sm:$0xff] }
  0xc1   : > { %5493 = vmatprep.subr.bf16.mxu1 %v5492_v23  ;;  %5633 = vmatpush1.bf16.msk.msra.mxu0 %vm6426_vm3, %v5631_v17  ;;  %v4802_v23 = vld [vmem:[%s6394_s18 + $0x250] sm:$0xff] }
  0xc2   : > { %v5510_v25 = vpack.c.bf16 %v4807_v24, %v4802_v23  ;;  %v4899_v17 = vld [vmem:[%s6394_s18 + $0x3b0] sm:$0xff] }
  0xc3   : > { %4833 = vmatmul.mubr.msk.f32.gmra.mrb[70].mxu1 %vm447_vm0, %v6476_v9  ;;  %v5550_v24 = vpack.c.bf16 %v4899_v17, %v4894_v16  ;;  %v4903_v16 = vld [vmem:[%s6394_s18 + $0x3d0] sm:$0xff]  ;;  %v4908_v17 = vld [vmem:[%s6394_s18 + $0x3f8] sm:$0xff] }
  0xc4   : > { %1133 = vmatprep.mubr.f32.mxu1 %v9773_v0  ;;  %5495 = vmatpush1.bf16.msra.mxu1 %v5494_v29  ;;  %v4822_v29 = vld [vmem:[%s6394_s18 + $0x2f0] sm:$0xff] }
  0xc5   : > { %5498 = vmatprep.subr.msk.bf16.mxu1 %vm6426_vm3, %v5496_v30  ;;  %5054 = vmatmul.mubr.msk.f32.vlgmr.msra.gmra.mrb[64].mxu0 %vm447_vm0, %v6416_v20  ;;  %v4827_v30 = vld [vmem:[%s6394_s18 + $0x318] sm:$0xf] }
  0xc6   : > { %2502 = vmatprep.mubr.f32.mxu0 %v9773_v0 }
  0xc7   : > { %4834 = vmatmul.mubr.msk.f32.gmra.mrb[72].mxu1 %vm447_vm0, %v6488_v19 }
  0xc8   : > { %1139 = vmatprep.mubr.f32.mxu1 %v9773_v0  ;;  %5501 = vmatpush1.bf16.msk.msra.mxu1 %vm6426_vm3, %v5499_v40 }
  0xc9   : > { %5503 = vmatprep.subr.bf16.mxu1 %v6807_v44  ;;  %5055 = vmatmul.mubr.msk.f32.gmra.mrb[66].mxu0 %vm447_vm0, %v6452_v52 }
  0xca   : > { %2508 = vmatprep.mubr.f32.mxu0 %v9773_v0 }
  0xcb   : > { %4835 = vmatmul.mubr.msk.f32.gmra.mrb[74].mxu1 %vm447_vm0, %v6502_v28 }
  0xcc   : > { %1145 = vmatprep.mubr.f32.mxu1 %v9773_v0 }
  0xcd   : > { %5056 = vmatmul.mubr.msk.f32.gmra.mrb[68].mxu0 %vm447_vm0, %v6464_v62 }
  0xce   : > { %2514 = vmatprep.mubr.f32.mxu0 %v9773_v0 }
  0xcf   : > { %4836 = vmatmul.mubr.msk.f32.gmra.mrb[76].mxu1 %vm447_vm0, %v6516_v36 }
  0xd0   : > { %1151 = vmatprep.mubr.f32.mxu1 %v9773_v0 }
  0xd1   : > { %5057 = vmatmul.mubr.msk.f32.gmra.mrb[70].mxu0 %vm447_vm0, %v6476_v9 }
  0xd2   : > { %2520 = vmatprep.mubr.f32.mxu0 %v9773_v0 }
  0xd3   : > { %4837 = vmatmul.mubr.msk.f32.gmra.mrb[78].mxu1 %vm447_vm0, %v6530_v43 }
  0xd4   : > { %1157 = vmatprep.mubr.f32.mxu1 %v9773_v0 }
  0xd5   : > { %5058 = vmatmul.mubr.msk.f32.gmra.mrb[72].mxu0 %vm447_vm0, %v6488_v19 }
  0xd6   : > { %2526 = vmatprep.mubr.f32.mxu0 %v9773_v0 }
  0xd7   : > { %4838 = vmatmul.mubr.msk.f32.gmra.mrb[80].mxu1 %vm447_vm0, %v6544_v50 }
  0xd8   : > { %1163 = vmatprep.mubr.f32.mxu1 %v9773_v0 }
  0xd9   : > { %5059 = vmatmul.mubr.msk.f32.gmra.mrb[74].mxu0 %vm447_vm0, %v6502_v28 }
  0xda   : > { %2532 = vmatprep.mubr.f32.mxu0 %v9773_v0 }
  0xdb   : > { %4839 = vmatmul.mubr.msk.f32.gmra.mrb[82].mxu1 %vm447_vm0, %v6558_v58 }
  0xdc   : > { %1169 = vmatprep.mubr.f32.mxu1 %v9773_v0 }
  0xdd   : > { %5060 = vmatmul.mubr.msk.f32.gmra.mrb[76].mxu0 %vm447_vm0, %v6516_v36 }
  0xde   : > { %2538 = vmatprep.mubr.f32.mxu0 %v9773_v0 }
  0xdf   : > { %4840 = vmatmul.mubr.msk.f32.gmra.mrb[84].mxu1 %vm447_vm0, %v6570_v60 }
  0xe0   : > { %1175 = vmatprep.mubr.f32.mxu1 %v9773_v0 }
  0xe1   : > { %5061 = vmatmul.mubr.msk.f32.gmra.mrb[78].mxu0 %vm447_vm0, %v6530_v43 }
  0xe2   : > { %2544 = vmatprep.mubr.f32.mxu0 %v9773_v0 }
  0xe3   : > { %4841 = vmatmul.mubr.msk.f32.gmra.mrb[86].mxu1 %vm447_vm0, %v6582_v61 }
  0xe4   : > { %1181 = vmatprep.mubr.f32.mxu1 %v9773_v0 }
  0xe5   : > { %5062 = vmatmul.mubr.msk.f32.gmra.mrb[80].mxu0 %vm447_vm0, %v6544_v50 }
  0xe6   : > { %2550 = vmatprep.mubr.f32.mxu0 %v9773_v0 }
  0xe7   : > { %4842 = vmatmul.mubr.msk.f32.gmra.mrb[88].mxu1 %vm447_vm0, %v6585_v63 }
  0xe8   : > { %1187 = vmatprep.mubr.f32.mxu1 %v9773_v0 }
  0xe9   : > { %5063 = vmatmul.mubr.msk.f32.gmra.mrb[82].mxu0 %vm447_vm0, %v6558_v58 }
  0xea   : > { %2556 = vmatprep.mubr.f32.mxu0 %v9773_v0 }
  0xeb   : > { %4843 = vmatmul.mubr.msk.f32.gmra.mrb[90].mxu1 %vm447_vm0, %v6595_v1 }
  0xec   : > { %1193 = vmatprep.mubr.f32.mxu1 %v9773_v0 }
  0xed   : > { %5064 = vmatmul.mubr.msk.f32.gmra.mrb[84].mxu0 %vm447_vm0, %v6570_v60 }
  0xee   : > { %2562 = vmatprep.mubr.f32.mxu0 %v9773_v0 }
  0xef   : > { %4844 = vmatmul.mubr.msk.f32.gmra.mrb[92].mxu1 %vm447_vm0, %v6598_v2 }
  0xf0   : > { %1199 = vmatprep.mubr.f32.mxu1 %v9773_v0 }
  0xf1   : > { %5065 = vmatmul.mubr.msk.f32.gmra.mrb[86].mxu0 %vm447_vm0, %v6582_v61 }
  0xf2   : > { %2568 = vmatprep.mubr.f32.mxu0 %v9773_v0 }
  0xf3   : > { %4845 = vmatmul.mubr.msk.f32.gmra.mrb[94].mxu1 %vm447_vm0, %v6608_v3 }
  0xf4   : > { %1270 = vmatprep.mubr.f32.mxu1 %v9773_v0 }
  0xf5   : > { %5066 = vmatmul.mubr.msk.f32.gmra.mrb[88].mxu0 %vm447_vm0, %v6585_v63 }
  0xf6   : > { %2574 = vmatprep.mubr.f32.mxu0 %v9773_v0 }
  0xf7   : > { %4848 = vmatmul.mubr.msk.f32.vlgmr.msra.gmra.mrb[96].mxu1 %vm447_vm0, %v6416_v20  ;;  %v5514_v20 = vpack.c.bf16 %v4817_v27, %v4812_v26  ;;  %v4898_v26 = vld [vmem:[%s6394_s18 + $0x3a8] sm:$0xff] }
  0xf8   : > { %5505 = vmatpush3.bf16.msra.mxu1 %v6807_v44  ;;  %1276 = vmatprep.mubr.f32.mxu1 %v9773_v0 }
  0xf9   : > { %5507 = vmatprep.subr.bf16.mxu1 %v5506_v22  ;;  %5067 = vmatmul.mubr.msk.f32.gmra.mrb[90].mxu0 %vm447_vm0, %v6595_v1 }
  0xfa   : > { %2580 = vmatprep.mubr.f32.mxu0 %v9773_v0 }
  0xfb   : > { %4849 = vmatmul.mubr.msk.f32.gmra.mrb[98].mxu1 %vm447_vm0, %v6452_v52  ;;  %v5518_v52 = vpack.c.bf16 %v4827_v30, %v4822_v29  ;;  %v4904_v29 = vld [vmem:[%s6394_s18 + $0x3d8] sm:$0xff]  ;;  %v4909_v30 = vld [vmem:[%s6394_s18 + $0x400] sm:$0xff] }
  0xfc   : > { %1282 = vmatprep.mubr.f32.mxu1 %v9773_v0  ;;  %5509 = vmatpush3.bf16.msra.mxu1 %v5506_v22  ;;  %v5548_v22 = vpack.c.bf16 %v4888_v13, %v4883_v12  ;;  %v5554_v13 = vpack.c.bf16 %v4909_v30, %v4904_v29  ;;  %v4913_v29 = vld [vmem:[%s6394_s18 + $0x420] sm:$0xff]  ;;  %v4918_v30 = vld [vmem:[%s6394_s18 + $0x448] sm:$0xff] }
  0xfd   : > { %5511 = vmatprep.subr.bf16.mxu1 %v5510_v25  ;;  %5068 = vmatmul.mubr.msk.f32.gmra.mrb[92].mxu0 %vm447_vm0, %v6598_v2 }
  0xfe   : > { %2586 = vmatprep.mubr.f32.mxu0 %v9773_v0 }
  0xff   : > { %4850 = vmatmul.mubr.msk.f32.gmra.mrb[100].mxu1 %vm447_vm0, %v6464_v62  ;;  %v5546_v62 = vpack.c.bf16 %v4889_v33, %v4884_v32  ;;  %v7083_v32 = vld [vmem:[%s6409_s13 + $0x8] sm:$0xff]  ;;  %v7088_v33 = vld [vmem:[%s6409_s13 + $0x10] sm:$0xff] }
 0x100   : > { %1288 = vmatprep.mubr.f32.mxu1 %v9773_v0  ;;  %5513 = vmatpush3.bf16.msra.mxu1 %v5510_v25  ;;  %v4893_v25 = vld [vmem:[%s6394_s18 + $0x380] sm:$0xff] }
 0x101   : > { %5515 = vmatprep.subr.bf16.mxu1 %v5514_v20  ;;  %5069 = vmatmul.mubr.msk.f32.gmra.mrb[94].mxu0 %vm447_vm0, %v6608_v3 }
 0x102   : > { %3154 = vmatprep.mubr.f32.mxu0 %v9773_v0 }
 0x103   : > { %4851 = vmatmul.mubr.msk.f32.gmra.mrb[102].mxu1 %vm447_vm0, %v6476_v9 }
 0x104   : > { %1294 = vmatprep.mubr.f32.mxu1 %v9773_v0  ;;  %5517 = vmatpush3.bf16.msra.mxu1 %v5514_v20 }
 0x105   : > { %5520 = vmatprep.subr.msk.bf16.mxu1 %vm6426_vm3, %v5518_v52 }
 0x107   : > { %4852 = vmatmul.mubr.msk.f32.gmra.mrb[104].mxu1 %vm447_vm0, %v6488_v19 }
 0x108   : > { %1300 = vmatprep.mubr.f32.mxu1 %v9773_v0  ;;  %5523 = vmatpush3.bf16.msk.msra.mxu1 %vm6426_vm3, %v5518_v52 }
 0x109   : > { %5547 = vmatprep.subr.bf16.mxu1 %v5546_v62  ;;  %v5552_v62 = vpack.c.bf16 %v4898_v26, %v4893_v25 }
 0x10a   : > { %v6953_v9 = vpop.f32.mrb[0].mxu1 }
 0x10b   : > { %v6957_v34 = vpop.f32.mrb[1].mxu1  ;;  %4853 = vmatmul.mubr.msk.f32.gmra.mrb[106].mxu1 %vm447_vm0, %v6502_v28 }
 0x10c   : > { %1306 = vmatprep.mubr.f32.mxu1 %v9773_v0 }
 0x10e   : > { %v6963_v35 = vpop.f32.mrb[2].mxu1 }
 0x10f   : > { %v6967_v37 = vpop.f32.mrb[3].mxu1  ;;  %4854 = vmatmul.mubr.msk.f32.gmra.mrb[108].mxu1 %vm447_vm0, %v6516_v36 }
 0x110   : > { %1312 = vmatprep.mubr.f32.mxu1 %v9773_v0 }
 0x112   : > { %v6973_v38 = vpop.f32.mrb[4].mxu1 }
 0x113   : > { %v6977_v39 = vpop.f32.mrb[5].mxu1  ;;  %4855 = vmatmul.mubr.msk.f32.gmra.mrb[110].mxu1 %vm447_vm0, %v6530_v43 }
 0x114   : > { %1318 = vmatprep.mubr.f32.mxu1 %v9773_v0  ;;  %v7007_v47 = vpop.f32.mrb[0].mxu0 }
 0x115   : > { %9886 = vst [vmem:[#allocation5_spill] sm:$0xff] %v7007_v47  ;;  %v7009_v48 = vpop.f32.mrb[1].mxu0  ;;  %v4999_v47 = vld [vmem:[%s6394_s18 + $0x528] sm:$0xff] }
 0x116   : > { %v6983_v40 = vpop.f32.mrb[6].mxu1  ;;  %9887 = vst [vmem:[#allocation6_spill] sm:$0xff] %v7009_v48  ;;  %v4994_v48 = vld [vmem:[%s6394_s18 + $0x500] sm:$0xff] }
 0x117   : > { %v6987_v41 = vpop.f32.mrb[7].mxu1  ;;  %4856 = vmatmul.mubr.msk.f32.gmra.mrb[112].mxu1 %vm447_vm0, %v6544_v50 }
 0x118   : > { %1324 = vmatprep.mubr.f32.mxu1 %v9773_v0  ;;  %v7018_v53 = vpop.f32.mrb[2].mxu0 }
 0x119   : > { %9888 = vst [vmem:[#allocation7_spill] sm:$0xff] %v7018_v53  ;;  %v7020_v54 = vpop.f32.mrb[3].mxu0 }
 0x11a   : > { %v6993_v42 = vpop.f32.mrb[8].mxu1  ;;  %9889 = vst [vmem:[#allocation8_spill] sm:$0xff] %v7020_v54 }
 0x11b   : > { %v6995_v44 = vpop.f32.mrb[9].mxu1  ;;  %4857 = vmatmul.mubr.msk.f32.gmra.mrb[114].mxu1 %vm447_vm0, %v6558_v58 }
 0x11c   : > { %1330 = vmatprep.mubr.f32.mxu1 %v9773_v0  ;;  %v7029_v57 = vpop.f32.mrb[4].mxu0 }
 0x11d   : > { %9890 = vst [vmem:[#allocation9_spill] sm:$0xff] %v7029_v57  ;;  %v7031_v59 = vpop.f32.mrb[5].mxu0 }
 0x11e   : > { %v7000_v45 = vpop.f32.mrb[10].mxu1  ;;  %9891 = vst [vmem:[#allocation10_spill] sm:$0xff] %v7031_v59 }
 0x11f   : > { %v7002_v46 = vpop.f32.mrb[11].mxu1  ;;  %4858 = vmatmul.mubr.msk.f32.gmra.mrb[116].mxu1 %vm447_vm0, %v6570_v60 }
 0x120   : > { %1336 = vmatprep.mubr.f32.mxu1 %v9773_v0  ;;  %v7040_v6 = vpop.f32.mrb[6].mxu0 }
 0x121   : > { %9892 = vst [vmem:[#allocation11_spill] sm:$0xff] %v7040_v6  ;;  %v7042_v7 = vpop.f32.mrb[7].mxu0  ;;  %v4929_v6 = vld [vmem:[%s6394_s18 + $0x4a0] sm:$0xf] }
 0x122   : > { %v7011_v49 = vpop.f32.mrb[12].mxu1  ;;  %9893 = vst [vmem:[#allocation12_spill] sm:$0xff] %v7042_v7  ;;  %v4924_v7 = vld [vmem:[%s6394_s18 + $0x478] sm:$0xff] }
 0x123   : > { %v7013_v51 = vpop.f32.mrb[13].mxu1  ;;  %4859 = vmatmul.mubr.msk.f32.gmra.mrb[118].mxu1 %vm447_vm0, %v6582_v61 }
 0x124   : > { %1342 = vmatprep.mubr.f32.mxu1 %v9773_v0  ;;  %v7051_v11 = vpop.f32.mrb[8].mxu0 }
 0x125   : > { %9894 = vst [vmem:[#allocation13_spill] sm:$0xff] %v7051_v11  ;;  %v7055_v14 = vpop.f32.mrb[9].mxu0  ;;  %v7105_v11 = vld [vmem:[%s6409_s13 + $0x18] sm:$0xff] }
 0x126   : > { %v7022_v55 = vpop.f32.mrb[14].mxu1  ;;  %9895 = vst [vmem:[#allocation14_spill] sm:$0xff] %v7055_v14 }
 0x127   : > { %v7024_v56 = vpop.f32.mrb[15].mxu1  ;;  %4860 = vmatmul.mubr.msk.f32.gmra.mrb[120].mxu1 %vm447_vm0, %v6585_v63 }
 0x128   : > { %1348 = vmatprep.mubr.f32.mxu1 %v9773_v0  ;;  %v7070_v23 = vpop.f32.mrb[10].mxu0 }
 0x129   : > { %9896 = vst [vmem:[#allocation15_spill] sm:$0xff] %v7070_v23  ;;  %v7074_v27 = vpop.f32.mrb[11].mxu0  ;;  %v4919_v23 = vld [vmem:[%s6394_s18 + $0x450] sm:$0xff] }
 0x12a   : > { %v7033_v4 = vpop.f32.mrb[16].mxu1  ;;  %9897 = vst [vmem:[#allocation16_spill] sm:$0xff] %v7074_v27 }
 0x12b   : > { %v7035_v5 = vpop.f32.mrb[17].mxu1  ;;  %4861 = vmatmul.mubr.msk.f32.gmra.mrb[122].mxu1 %vm447_vm0, %v6595_v1 }
 0x12c   : > { %1354 = vmatprep.mubr.f32.mxu1 %v9773_v0  ;;  %v7092_v12 = vpop.f32.mrb[12].mxu0 }
 0x12d   : > { %9900 = vst [vmem:[#allocation19_spill] sm:$0xff] %v7092_v12 }
 0x12e   : > { %v7044_v8 = vpop.f32.mrb[18].mxu1 }
 0x12f   : > { %v7046_v10 = vpop.f32.mrb[19].mxu1  ;;  %4862 = vmatmul.mubr.msk.f32.gmra.mrb[124].mxu1 %vm447_vm0, %v6598_v2 }
 0x130   : > { %1360 = vmatprep.mubr.f32.mxu1 %v9773_v0  ;;  %v7096_v0 = vpop.f32.mrb[13].mxu0 }
 0x131   : > { %9901 = vst [vmem:[#allocation20_spill] sm:$0xff] %v7096_v0  ;;  %v7111_v25 = vpop.f32.mrb[14].mxu0 }
 0x132   : > { %v7057_v15 = vpop.f32.mrb[20].mxu1  ;;  %9904 = vst [vmem:[#allocation23_spill] sm:$0xff] %v7111_v25  ;;  %v7115_v0 = vpop.f32.mrb[15].mxu0  ;;  %v4990_v25 = vld [vmem:[%s6394_s18 + $0x4e0] sm:$0xff] }
 0x133   : > { %v7061_v18 = vpop.f32.mrb[21].mxu1  ;;  %4863 = vmatmul.mubr.msk.f32.gmra.mrb[126].mxu1 %vm447_vm0, %v6608_v3  ;;  %9905 = vst [vmem:[#allocation24_spill] sm:$0xff] %v7115_v0  ;;  %v4985_v0 = vld [vmem:[%s6394_s18 + $0x4b8] sm:$0xff] }
 0x134   : > { %5280 = vmatprep.mubr.msk.f32.mxu1 %vm447_vm0, %v7066_v21 }
 0x136   : > { %v7076_v20 = vpop.f32.mrb[22].mxu1 }
 0x137   : > { %9898 = vst [vmem:[#allocation17_spill] sm:$0xff] %v7076_v20  ;;  %v7080_v52 = vpop.f32.mrb[23].mxu1  ;;  %5281 = vmatmul.mubr.msk.f32.vlgmr.msra.gmra.mrb[128].mxu1 %vm447_vm0, %v7083_v32 }
 0x138   : > { %9899 = vst [vmem:[#allocation18_spill] sm:$0xff] %v7080_v52  ;;  %5549 = vmatpush1.bf16.msra.mxu1 %v5548_v22  ;;  %5283 = vmatprep.mubr.msk.f32.mxu1 %vm447_vm0, %v7088_v33  ;;  %v4914_v22 = vld [vmem:[%s6394_s18 + $0x428] sm:$0xff]  ;;  %v7342_v52 = vld [vmem:[%s6409_s13 + $0x40] sm:$0xff] }
 0x139   : > { %5551 = vmatprep.subr.bf16.mxu1 %v5550_v24  ;;  %v5556_v24 = vpack.c.bf16 %v4908_v17, %v4903_v16  ;;  %v5558_v26 = vpack.c.bf16 %v4919_v23, %v4914_v22  ;;  %v7127_v23 = vpop.f32.mrb[16].mxu0  ;;  %v4928_v16 = vld [vmem:[%s6394_s18 + $0x498] sm:$0xf]  ;;  %9945 = vst [vmem:[#allocation63_spill] sm:$0xff] %v7342_v52 }
 0x13a   : > { %v7098_v27 = vpop.f32.mrb[24].mxu1  ;;  %v7131_v17 = vpop.f32.mrb[17].mxu0 }
 0x13b   : > { %9902 = vst [vmem:[#allocation21_spill] sm:$0xff] %v7098_v27  ;;  %v7102_v14 = vpop.f32.mrb[25].mxu1  ;;  %5284 = vmatmul.mubr.msk.f32.gmra.mrb[130].mxu1 %vm447_vm0, %v7105_v11 }
 0x13c   : > { %9903 = vst [vmem:[#allocation22_spill] sm:$0xff] %v7102_v14  ;;  %5286 = vmatprep.mubr.msk.f32.mxu1 %vm447_vm0, %v6488_v19  ;;  %5553 = vmatpush1.bf16.msra.mxu1 %v5552_v62  ;;  %v5560_v19 = vpack.c.bf16 %v4918_v30, %v4913_v29  ;;  %v5562_v62 = vpack.c.bf16 %v4929_v6, %v4924_v7  ;;  %v3061_v14 = vld [vmem:[%s9768_s4 + $0x18] sm:$0xff] }
 0x13d   : > { %5555 = vmatprep.subr.bf16.mxu1 %v5554_v13  ;;  %v4923_v13 = vld [vmem:[%s6394_s18 + $0x470] sm:$0xff]  ;;  %v5590_v6 = vpack.c.bf16 %v4990_v25, %v4985_v0 }
 0x13e   : > { %v7117_v12 = vpop.f32.mrb[26].mxu1 }
 0x13f   : > { %9906 = vst [vmem:[#allocation25_spill] sm:$0xff] %v7117_v12  ;;  %v7121_v59 = vpop.f32.mrb[27].mxu1  ;;  %5287 = vmatmul.mubr.msk.f32.gmra.mrb[132].mxu1 %vm447_vm0, %v6502_v28  ;;  %v5565_v28 = vpack.c.bf16 %v4928_v16, %v4923_v13  ;;  %v4995_v16 = vld [vmem:[%s6394_s18 + $0x508] sm:$0xff] }
 0x140   : > { %9907 = vst [vmem:[#allocation26_spill] sm:$0xff] %v7121_v59  ;;  %5289 = vmatprep.mubr.msk.f32.mxu1 %vm447_vm0, %v6516_v36  ;;  %5557 = vmatpush1.bf16.msra.mxu1 %v5556_v24  ;;  %v7143_v36 = vpop.f32.mrb[18].mxu0  ;;  %v4988_v59 = vld [vmem:[%s6394_s18 + $0x4d0] sm:$0xff] }
 0x141   : > { %5559 = vmatprep.subr.bf16.mxu1 %v5558_v26  ;;  %v7147_v7 = vpop.f32.mrb[19].mxu0 }
 0x142   : > { %v7133_v22 = vpop.f32.mrb[28].mxu1 }
 0x143   : > { %9908 = vst [vmem:[#allocation27_spill] sm:$0xff] %v7133_v22  ;;  %v7137_v57 = vpop.f32.mrb[29].mxu1  ;;  %5290 = vmatmul.mubr.msk.f32.gmra.mrb[134].mxu1 %vm447_vm0, %v6530_v43  ;;  %v7159_v43 = vpop.f32.mrb[20].mxu0 }
 0x144   : > { %9909 = vst [vmem:[#allocation28_spill] sm:$0xff] %v7137_v57  ;;  %5292 = vmatprep.mubr.msk.f32.mxu1 %vm447_vm0, %v6544_v50  ;;  %5561 = vmatpush1.bf16.msra.mxu1 %v5560_v19  ;;  %v7161_v0 = vpop.f32.mrb[21].mxu0  ;;  %v4984_v19 = vld [vmem:[%s6394_s18 + $0x4b0] sm:$0xff]  ;;  %v5030_v57 = vld [vmem:[%s6394_s18 + $0x620] sm:$0xf] }
 0x145   : > { %5564 = vmatprep.subr.msk.bf16.mxu1 %vm6426_vm3, %v5562_v62 }
 0x146   : > { %v7149_v24 = vpop.f32.mrb[30].mxu1 }
 0x147   : > { %9910 = vst [vmem:[#allocation29_spill] sm:$0xff] %v7149_v24  ;;  %v7151_v26 = vpop.f32.mrb[31].mxu1  ;;  %5293 = vmatmul.mubr.msk.f32.gmra.mrb[136].mxu1 %vm447_vm0, %v6558_v58  ;;  %v7171_v58 = vpop.f32.mrb[22].mxu0 }
 0x148   : > { %9911 = vst [vmem:[#allocation30_spill] sm:$0xff] %v7151_v26  ;;  %5295 = vmatprep.mubr.msk.f32.mxu1 %vm447_vm0, %v6570_v60  ;;  %5567 = vmatpush1.bf16.msk.msra.mxu1 %vm6426_vm3, %v5565_v28  ;;  %v7173_v60 = vpop.f32.mrb[23].mxu0  ;;  %v5000_v28 = vld [vmem:[%s6394_s18 + $0x530] sm:$0xff] }
 0x149   : > { %5591 = vmatprep.subr.bf16.mxu1 %v5590_v6  ;;  %v5594_v53 = vpack.c.bf16 %v5000_v28, %v4995_v16  ;;  %v5004_v16 = vld [vmem:[%s6394_s18 + $0x550] sm:$0xff]  ;;  %v5009_v28 = vld [vmem:[%s6394_s18 + $0x578] sm:$0xff] }
 0x14a   : > { %v7163_v50 = vpop.f32.mrb[32].mxu1  ;;  %v5020_v26 = vld [vmem:[%s6394_s18 + $0x5d0] sm:$0xff] }
 0x14b   : > { %9912 = vst [vmem:[#allocation31_spill] sm:$0xff] %v7163_v50  ;;  %v7165_v25 = vpop.f32.mrb[33].mxu1  ;;  %5296 = vmatmul.mubr.msk.f32.gmra.mrb[138].mxu1 %vm447_vm0, %v6582_v61  ;;  %v7183_v61 = vpop.f32.mrb[24].mxu0 }
 0x14c   : > { %9913 = vst [vmem:[#allocation32_spill] sm:$0xff] %v7165_v25  ;;  %5298 = vmatprep.mubr.msk.f32.mxu1 %vm447_vm0, %v6585_v63  ;;  %v4989_v63 = vld [vmem:[%s6394_s18 + $0x4d8] sm:$0xff]  ;;  %v7187_v62 = vpop.f32.mrb[25].mxu0 }
 0x14d   : > { %v7198_v54 = vpop.f32.mrb[26].mxu0 }
 0x14e   : > { %v7175_v29 = vpop.f32.mrb[34].mxu1 }
 0x14f   : > { %9914 = vst [vmem:[#allocation33_spill] sm:$0xff] %v7175_v29  ;;  %v7177_v30 = vpop.f32.mrb[35].mxu1  ;;  %5299 = vmatmul.mubr.msk.f32.gmra.mrb[140].mxu1 %vm447_vm0, %v6595_v1  ;;  %v9918_v1 = vmov 0.0   ;;  %v5010_v29 = vld [vmem:[%s6394_s18 + $0x580] sm:$0xff] }
 0x150   : > { %9915 = vst [vmem:[#allocation34_spill] sm:$0xff] %v7177_v30  ;;  %5301 = vmatprep.mubr.msk.f32.mxu1 %vm447_vm0, %v6598_v2  ;;  %v5592_v2 = vpack.c.bf16 %v4989_v63, %v4984_v19  ;;  %v7202_v30 = vpop.f32.mrb[27].mxu0 }
 0x151   : > { %v7213_v19 = vpop.f32.mrb[28].mxu0 }
 0x152   : > { %v7189_v13 = vpop.f32.mrb[36].mxu1 }
 0x153   : > { %9916 = vst [vmem:[#allocation35_spill] sm:$0xff] %v7189_v13  ;;  %v7193_v6 = vpop.f32.mrb[37].mxu1  ;;  %5302 = vmatmul.mubr.msk.f32.gmra.mrb[142].mxu1 %vm447_vm0, %v6608_v3  ;;  %v5596_v3 = vpack.c.bf16 %v4999_v47, %v4994_v48  ;;  %v5600_v47 = vpack.c.bf16 %v5009_v28, %v5004_v16  ;;  %v5029_v16 = vld [vmem:[%s6394_s18 + $0x618] sm:$0xf] }
 0x154   : > { %9917 = vst [vmem:[#allocation36_spill] sm:$0xff] %v7193_v6  ;;  %1883 = vmatprep.mubr.f32.mxu1 %v9918_v1  ;;  %v5005_v6 = vld [vmem:[%s6394_s18 + $0x558] sm:$0xff] }
 0x155   : > { %v5598_v63 = vpack.c.bf16 %v5010_v29, %v5005_v6  ;;  %v5014_v29 = vld [vmem:[%s6394_s18 + $0x5a0] sm:$0xff]  ;;  %v5019_v6 = vld [vmem:[%s6394_s18 + $0x5c8] sm:$0xff] }
 0x156   : > { %v7204_v13 = vpop.f32.mrb[38].mxu1 }
 0x157   : > { %9919 = vst [vmem:[#allocation37_spill] sm:$0xff] %v7204_v13  ;;  %v7208_v25 = vpop.f32.mrb[39].mxu1  ;;  %4951 = vmatmul.mubr.msk.f32.vlgmr.msra.gmra.mrb[144].mxu1 %vm447_vm0, %v7066_v21  ;;  %v7217_v13 = vpop.f32.mrb[29].mxu0 }
 0x158   : > { %9920 = vst [vmem:[#allocation38_spill] sm:$0xff] %v7208_v25  ;;  %5593 = vmatpush1.bf16.msra.mxu1 %v5592_v2  ;;  %1889 = vmatprep.mubr.f32.mxu1 %v9918_v1  ;;  %v5015_v25 = vld [vmem:[%s6394_s18 + $0x5a8] sm:$0xff]  ;;  %v7228_v48 = vpop.f32.mrb[30].mxu0 }
 0x159   : > { %5595 = vmatprep.subr.bf16.mxu1 %v5594_v53  ;;  %v5602_v53 = vpack.c.bf16 %v5020_v26, %v5015_v25  ;;  %v5604_v26 = vpack.c.bf16 %v5019_v6, %v5014_v29 }
 0x15a   : > { %v7219_v50 = vpop.f32.mrb[40].mxu1 }
 0x15b   : > { %9921 = vst [vmem:[#allocation39_spill] sm:$0xff] %v7219_v50  ;;  %v7223_v2 = vpop.f32.mrb[41].mxu1  ;;  %4952 = vmatmul.mubr.msk.f32.gmra.mrb[146].mxu1 %vm447_vm0, %v7083_v32  ;;  %v7232_v50 = vpop.f32.mrb[31].mxu0 }
 0x15c   : > { %9922 = vst [vmem:[#allocation40_spill] sm:$0xff] %v7223_v2  ;;  %1895 = vmatprep.mubr.f32.mxu1 %v9918_v1  ;;  %5597 = vmatpush1.bf16.msra.mxu1 %v5596_v3  ;;  %v5025_v2 = vld [vmem:[%s6394_s18 + $0x5f8] sm:$0xff]  ;;  %v7243_v25 = vpop.f32.mrb[32].mxu0 }
 0x15d   : > { %5599 = vmatprep.subr.bf16.mxu1 %v5598_v63  ;;  %v5606_v3 = vpack.c.bf16 %v5030_v57, %v5025_v2  ;;  %v5024_v63 = vld [vmem:[%s6394_s18 + $0x5f0] sm:$0xff]  ;;  %v7247_v28 = vpop.f32.mrb[33].mxu0 }
 0x15e   : > { %v7234_v24 = vpop.f32.mrb[42].mxu1  ;;  %v7258_v57 = vpop.f32.mrb[34].mxu0 }
 0x15f   : > { %9923 = vst [vmem:[#allocation41_spill] sm:$0xff] %v7234_v24  ;;  %v7238_v22 = vpop.f32.mrb[43].mxu1  ;;  %4953 = vmatmul.mubr.msk.f32.gmra.mrb[148].mxu1 %vm447_vm0, %v7088_v33  ;;  %v7262_v2 = vpop.f32.mrb[35].mxu0 }
 0x160   : > { %9924 = vst [vmem:[#allocation42_spill] sm:$0xff] %v7238_v22  ;;  %1901 = vmatprep.mubr.f32.mxu1 %v9918_v1  ;;  %5601 = vmatpush1.bf16.msra.mxu1 %v5600_v47  ;;  %v4993_v22 = vld [vmem:[%s6394_s18 + $0x4f8] sm:$0xff]  ;;  %v5609_v47 = vpack.c.bf16 %v5029_v16, %v5024_v63  ;;  %v7288_v63 = vld [vmem:[%s6409_s13 + $0x28] sm:$0xff] }
 0x161   : > { %5603 = vmatprep.subr.bf16.mxu1 %v5602_v53  ;;  %v7264_v53 = vpack.c.bf16 %v4993_v22, %v4988_v59 }
 0x162   : > { %v7249_v24 = vpop.f32.mrb[44].mxu1 }
 0x163   : > { %9925 = vst [vmem:[#allocation43_spill] sm:$0xff] %v7249_v24  ;;  %v7253_v12 = vpop.f32.mrb[45].mxu1  ;;  %4954 = vmatmul.mubr.msk.f32.gmra.mrb[150].mxu1 %vm447_vm0, %v7105_v11  ;;  %v7302_v24 = vld [vmem:[%s6409_s13 + $0x30] sm:$0xff] }
 0x164   : > { %9926 = vst [vmem:[#allocation44_spill] sm:$0xff] %v7253_v12  ;;  %1907 = vmatprep.mubr.f32.mxu1 %v9918_v1  ;;  %5605 = vmatpush1.bf16.msra.mxu1 %v5604_v26  ;;  %v7271_v12 = vld [vmem:[%s6409_s13 + $0x20] sm:$0xff]  ;;  %v7278_v26 = vpop.f32.mrb[36].mxu0 }
 0x165   : > { %5608 = vmatprep.subr.msk.bf16.mxu1 %vm6426_vm3, %v5606_v3  ;;  %9929 = vst [vmem:[#allocation47_spill] sm:$0xff] %v7278_v26  ;;  %v7280_v3 = vpop.f32.mrb[37].mxu0 }
 0x166   : > { %v7266_v29 = vpop.f32.mrb[46].mxu1  ;;  %9930 = vst [vmem:[#allocation48_spill] sm:$0xff] %v7280_v3  ;;  %v7293_v16 = vpop.f32.mrb[38].mxu0 }
 0x167   : > { %9927 = vst [vmem:[#allocation45_spill] sm:$0xff] %v7266_v29  ;;  %v7268_v6 = vpop.f32.mrb[47].mxu1  ;;  %4955 = vmatmul.mubr.msk.f32.gmra.mrb[152].mxu1 %vm447_vm0, %v7271_v12  ;;  %9933 = vst [vmem:[#allocation51_spill] sm:$0xff] %v7293_v16  ;;  %v7322_v16 = vld [vmem:[%s6409_s13 + $0x38] sm:$0xff] }
 0x168   : > { %9928 = vst [vmem:[#allocation46_spill] sm:$0xff] %v7268_v6  ;;  %1913 = vmatprep.mubr.f32.mxu1 %v9918_v1  ;;  %5611 = vmatpush1.bf16.msk.msra.mxu1 %vm6426_vm3, %v5609_v47  ;;  %v7295_v47 = vpop.f32.mrb[39].mxu0 }
 0x169   : > { %5635 = vmatprep.subr.bf16.mxu1 %v7264_v53  ;;  %9934 = vst [vmem:[#allocation52_spill] sm:$0xff] %v7295_v47 }
 0x16a   : > { %v7283_v59 = vpop.f32.mrb[48].mxu1 }
 0x16b   : > { %9931 = vst [vmem:[#allocation49_spill] sm:$0xff] %v7283_v59  ;;  %v7285_v22 = vpop.f32.mrb[49].mxu1  ;;  %4956 = vmatmul.mubr.msk.f32.gmra.mrb[154].mxu1 %vm447_vm0, %v7288_v63  ;;  %v3059_v59 = vld [vmem:[%s9768_s4 + $0x8] sm:$0xff] }
 0x16c   : > { %9932 = vst [vmem:[#allocation50_spill] sm:$0xff] %v7285_v22  ;;  %1919 = vmatprep.mubr.f32.mxu1 %v9918_v1  ;;  %v7307_v22 = vpop.f32.mrb[40].mxu0 }
 0x16d   : > { %9937 = vst [vmem:[#allocation55_spill] sm:$0xff] %v7307_v22  ;;  %v3058_v22 = vld [vmem:[%s9768_s4] sm:$0xff] }
 0x16e   : > { %v7297_v6 = vpop.f32.mrb[50].mxu1 }
 0x16f   : > { %9935 = vst [vmem:[#allocation53_spill] sm:$0xff] %v7297_v6  ;;  %v7299_v29 = vpop.f32.mrb[51].mxu1  ;;  %4957 = vmatmul.mubr.msk.f32.gmra.mrb[156].mxu1 %vm447_vm0, %v7302_v24  ;;  %v7315_v6 = vpop.f32.mrb[41].mxu0 }
 0x170   : > { %9936 = vst [vmem:[#allocation54_spill] sm:$0xff] %v7299_v29  ;;  %1925 = vmatprep.mubr.f32.mxu1 %v9918_v1  ;;  %9938 = vst [vmem:[#allocation56_spill] sm:$0xff] %v7315_v6  ;;  %v5656_v29 = vpack.c.bf16 %v3061_v14, %v3059_v59  ;;  %v3060_v6 = vld [vmem:[%s9768_s4 + $0x10] sm:$0xff]  ;;  %v7333_v14 = vpop.f32.mrb[42].mxu0 }
 0x171   : > { %9941 = vst [vmem:[#allocation59_spill] sm:$0xff] %v7333_v14  ;;  %v5658_v59 = vpack.c.bf16 %v3060_v6, %v3058_v22  ;;  %v3063_v6 = vld [vmem:[%s9768_s4 + $0x28] sm:$0xff]  ;;  %v3065_v22 = vld [vmem:[%s9768_s4 + $0x38] sm:$0xff] }
 0x172   : > { %v7317_v27 = vpop.f32.mrb[52].mxu1  ;;  %5657 = vmatprep.subr.bf16.mxu0 %v5656_v29  ;;  %v7362_v14 = vld [vmem:[%s6409_s13 + $0x48] sm:$0xff] }
 0x173   : > { %9939 = vst [vmem:[#allocation57_spill] sm:$0xff] %v7317_v27  ;;  %v7319_v47 = vpop.f32.mrb[53].mxu1  ;;  %4958 = vmatmul.mubr.msk.f32.gmra.mrb[158].mxu1 %vm447_vm0, %v7322_v16  ;;  %5659 = vmatpush1.bf16.msra.mxu0 %v5658_v59  ;;  %9950 = vst [vmem:[#allocation68_spill] sm:$0xff] %v7362_v14 }
 0x174   : > { %9940 = vst [vmem:[#allocation58_spill] sm:$0xff] %v7319_v47  ;;  %1931 = vmatprep.mubr.f32.mxu1 %v9918_v1  ;;  %v7335_v47 = vpop.f32.mrb[43].mxu0 }
 0x175   : > { %9942 = vst [vmem:[#allocation60_spill] sm:$0xff] %v7335_v47  ;;  %v7347_v20 = vpop.f32.mrb[44].mxu0 }
 0x176   : > { %v7337_v27 = vpop.f32.mrb[54].mxu1  ;;  %9946 = vst [vmem:[#allocation64_spill] sm:$0xff] %v7347_v20  ;;  %v7355_v59 = vpop.f32.mrb[45].mxu0  ;;  %v3062_v20 = vld [vmem:[%s9768_s4 + $0x20] sm:$0xff] }
 0x177   : > { %9943 = vst [vmem:[#allocation61_spill] sm:$0xff] %v7337_v27  ;;  %v7339_v29 = vpop.f32.mrb[55].mxu1  ;;  %4959 = vmatmul.mubr.msk.f32.gmra.mrb[160].mxu1 %vm447_vm0, %v7342_v52  ;;  %9947 = vst [vmem:[#allocation65_spill] sm:$0xff] %v7355_v59  ;;  %v3064_v59 = vld [vmem:[%s9768_s4 + $0x30] sm:$0xff] }
 0x178   : > { %9944 = vst [vmem:[#allocation62_spill] sm:$0xff] %v7339_v29  ;;  %1937 = vmatprep.mubr.f32.mxu1 %v9918_v1  ;;  %v5660_v29 = vpack.c.bf16 %v3065_v22, %v3063_v6  ;;  %v7373_v6 = vpop.f32.mrb[46].mxu0  ;;  %v5662_v22 = vpack.c.bf16 %v3064_v59, %v3062_v20  ;;  %v3069_v20 = vld [vmem:[%s9768_s4 + $0x58] sm:$0xff]  ;;  %v3072_v52 = vld [vmem:[%s9768_s4 + $0x70] sm:$0xff] }
 0x179   : > { %9951 = vst [vmem:[#allocation69_spill] sm:$0xff] %v7373_v6  ;;  %v3067_v6 = vld [vmem:[%s9768_s4 + $0x48] sm:$0xff] }
 0x17a   : > { %v7357_v27 = vpop.f32.mrb[56].mxu1  ;;  %5661 = vmatprep.subr.bf16.mxu0 %v5660_v29  ;;  %v5664_v59 = vpack.c.bf16 %v3069_v20, %v3067_v6 }
 0x17b   : > { %9948 = vst [vmem:[#allocation66_spill] sm:$0xff] %v7357_v27  ;;  %v7359_v47 = vpop.f32.mrb[57].mxu1  ;;  %4960 = vmatmul.mubr.msk.f32.gmra.mrb[162].mxu1 %vm447_vm0, %v7362_v14  ;;  %5663 = vmatpush1.bf16.msra.mxu0 %v5662_v22  ;;  %v7382_v14 = vld [vmem:[%s6409_s13 + $0x50] sm:$0xff] }
 0x17c   : > { %9949 = vst [vmem:[#allocation67_spill] sm:$0xff] %v7359_v47  ;;  %1943 = vmatprep.mubr.f32.mxu1 %v9918_v1  ;;  %v7375_v47 = vpop.f32.mrb[47].mxu0  ;;  %9955 = vst [vmem:[#allocation73_spill] sm:$0xff] %v7382_v14  ;;  %5665 = vmatprep.subr.bf16.mxu0 %v5664_v59  ;;  %v3071_v59 = vld [vmem:[%s9768_s4 + $0x68] sm:$0xff] }
 0x17d   : > { %9952 = vst [vmem:[#allocation70_spill] sm:$0xff] %v7375_v47  ;;  %v3066_v47 = vld [vmem:[%s9768_s4 + $0x40] sm:$0xff] }
 0x17e   : > { %v7377_v27 = vpop.f32.mrb[58].mxu1 }
 0x17f   : > { %9953 = vst [vmem:[#allocation71_spill] sm:$0xff] %v7377_v27  ;;  %v7379_v29 = vpop.f32.mrb[59].mxu1  ;;  %4961 = vmatmul.mubr.msk.f32.gmra.mrb[164].mxu1 %vm447_vm0, %v7382_v14  ;;  %v7398_v27 = vld [vmem:[%s6409_s13 + $0x58] sm:$0xff]  ;;  %v3068_v14 = vld [vmem:[%s9768_s4 + $0x50] sm:$0xff] }
 0x180   : > { %9954 = vst [vmem:[#allocation72_spill] sm:$0xff] %v7379_v29  ;;  %1949 = vmatprep.mubr.f32.mxu1 %v9918_v1  ;;  %9958 = vst [vmem:[#allocation76_spill] sm:$0xff] %v7398_v27  ;;  %v5666_v6 = vpack.c.bf16 %v3068_v14, %v3066_v47  ;;  %v3073_v47 = vld [vmem:[%s9768_s4 + $0x78] sm:$0xff] }
 0x181   : > { %v5668_v14 = vpack.c.bf16 %v3073_v47, %v3071_v59 }
 0x182   : > { %v7393_v22 = vpop.f32.mrb[60].mxu1  ;;  %5667 = vmatpush1.bf16.msra.mxu0 %v5666_v6 }
 0x183   : > { %9956 = vst [vmem:[#allocation74_spill] sm:$0xff] %v7393_v22  ;;  %v7395_v29 = vpop.f32.mrb[61].mxu1  ;;  %4962 = vmatmul.mubr.msk.f32.gmra.mrb[166].mxu1 %vm447_vm0, %v7398_v27  ;;  %v7414_v22 = vld [vmem:[%s6409_s13 + $0x60] sm:$0xff]  ;;  %v7427_v27 = vld [vmem:[%s6409_s13 + $0x68] sm:$0xff]  ;;  %5669 = vmatprep.subr.bf16.mxu0 %v5668_v14 }
 0x184   : > { %9957 = vst [vmem:[#allocation75_spill] sm:$0xff] %v7395_v29  ;;  %1955 = vmatprep.mubr.f32.mxu1 %v9918_v1  ;;  %9961 = vst [vmem:[#allocation79_spill] sm:$0xff] %v7414_v22 }
 0x185   : > { %9962 = vst [vmem:[#allocation80_spill] sm:$0xff] %v7427_v27 }
 0x186   : > { %v7409_v20 = vpop.f32.mrb[62].mxu1 }
 0x187   : > { %9959 = vst [vmem:[#allocation77_spill] sm:$0xff] %v7409_v20  ;;  %v7411_v29 = vpop.f32.mrb[63].mxu1  ;;  %4963 = vmatmul.mubr.msk.f32.gmra.mrb[168].mxu1 %vm447_vm0, %v7414_v22  ;;  %v3070_v22 = vld [vmem:[%s9768_s4 + $0x60] sm:$0xff] }
 0x188   : > { %9960 = vst [vmem:[#allocation78_spill] sm:$0xff] %v7411_v29  ;;  %1961 = vmatprep.mubr.f32.mxu1 %v9918_v1 }
 0x18a   : > { %v1111_v20 = vpop.f32.mrb[64].mxu1 }
 0x18b   : > { %v1512_v6 = vmax.f32 %v6953_v9, %v1111_v20  ;;  %v1113_v29 = vpop.f32.mrb[65].mxu1  ;;  %4964 = vmatmul.mubr.msk.f32.gmra.mrb[170].mxu1 %vm447_vm0, %v7427_v27  ;;  %v5670_v9 = vpack.c.bf16 %v3072_v52, %v3070_v22  ;;  %v7439_v20 = vpop.f32.mrb[48].mxu0  ;;  %v4998_v22 = vld [vmem:[%s6394_s18 + $0x520] sm:$0xff] }
 0x18c   : > { %v1513_v59 = vmax.f32 %v6957_v34, %v1113_v29  ;;  %1967 = vmatprep.mubr.f32.mxu1 %v9918_v1  ;;  %v7444_v14 = vpop.f32.mrb[49].mxu0  ;;  %v7451_v29 = vld [vmem:[%s6409_s13 + $0x70] sm:$0xff] }
 0x18d   : > { %v7442_v47 = vmax.f32 %v1512_v6, %v7127_v23  ;;  %9964 = vst [vmem:[#allocation82_spill] sm:$0xff] %v7444_v14  ;;  %5671 = vmatpush1.bf16.msra.mxu0 %v5670_v9  ;;  %v7457_v23 = vpop.f32.mrb[50].mxu0  ;;  %v3075_v9 = vld [vmem:[%s9768_s4 + $0x88] sm:$0xff]  ;;  %v5013_v14 = vld [vmem:[%s6394_s18 + $0x598] sm:$0xff] }
 0x18e   : > { %v7447_v27 = vmax.f32 %v1513_v59, %v7131_v17  ;;  %v1117_v3 = vpop.f32.mrb[66].mxu1  ;;  %9966 = vst [vmem:[#allocation84_spill] sm:$0xff] %v7457_v23  ;;  %v7463_v6 = vpop.f32.mrb[51].mxu0  ;;  %v5003_v59 = vld [vmem:[%s6394_s18 + $0x548] sm:$0xff]  ;;  %v5008_v23 = vld [vmem:[%s6394_s18 + $0x570] sm:$0xff] }
 0x18f   : > { %9963 = vst [vmem:[#allocation81_spill] sm:$0xff] %v7442_v47  ;;  %v1517_v26 = vmax.f32 %v6963_v35, %v1117_v3  ;;  %v1119_v34 = vpop.f32.mrb[67].mxu1  ;;  %4965 = vmatmul.mubr.msk.f32.gmra.mrb[172].mxu1 %vm447_vm0, %v7451_v29  ;;  %9968 = vst [vmem:[#allocation86_spill] sm:$0xff] %v7463_v6  ;;  %v5638_v47 = vpack.c.bf16 %v5003_v59, %v4998_v22  ;;  %v5018_v59 = vld [vmem:[%s6394_s18 + $0x5c0] sm:$0xff] }
 0x190   : > { %9965 = vst [vmem:[#allocation83_spill] sm:$0xff] %v7447_v27  ;;  %v1518_v52 = vmax.f32 %v6967_v37, %v1119_v34  ;;  %1973 = vmatprep.mubr.f32.mxu1 %v9918_v1  ;;  %v3077_v37 = vld [vmem:[%s9768_s4 + $0x98] sm:$0xff] }
 0x191   : > { %v7460_v17 = vmax.f32 %v1517_v26, %v7143_v36  ;;  %v7477_v26 = vld [vmem:[%s6409_s13 + $0x78] sm:$0xff] }
 0x192   : > { %v7466_v35 = vmax.f32 %v1518_v52, %v7147_v7  ;;  %v1123_v3 = vpop.f32.mrb[68].mxu1  ;;  %v5672_v7 = vpack.c.bf16 %v3077_v37, %v3075_v9  ;;  %v3074_v52 = vld [vmem:[%s9768_s4 + $0x80] sm:$0xff] }
 0x193   : > { %9967 = vst [vmem:[#allocation85_spill] sm:$0xff] %v7460_v17  ;;  %v1522_v34 = vmax.f32 %v6973_v38, %v1123_v3  ;;  %v1125_v36 = vpop.f32.mrb[69].mxu1  ;;  %4966 = vmatmul.mubr.msk.f32.gmra.mrb[174].mxu1 %vm447_vm0, %v7477_v26  ;;  %v7489_v3 = vpop.f32.mrb[52].mxu0 }
 0x194   : > { %9969 = vst [vmem:[#allocation87_spill] sm:$0xff] %v7466_v35  ;;  %v3076_v35 = vld [vmem:[%s9768_s4 + $0x90] sm:$0xff]  ;;  %v1523_v17 = vmax.f32 %v6977_v39, %v1125_v36  ;;  %2335 = vmatprep.mubr.f32.mxu1 %v9918_v1  ;;  %5673 = vmatprep.subr.bf16.mxu0 %v5672_v7  ;;  %v7494_v9 = vpop.f32.mrb[53].mxu0 }
 0x195   : > { %v5674_v38 = vpack.c.bf16 %v3076_v35, %v3074_v52  ;;  %v7492_v27 = vmax.f32 %v1522_v34, %v7159_v43  ;;  %v7507_v22 = vpop.f32.mrb[54].mxu0 }
 0x196   : > { %v7497_v37 = vmax.f32 %v1523_v17, %v7161_v0  ;;  %v1129_v6 = vpop.f32.mrb[70].mxu1  ;;  %v5642_v17 = vpack.c.bf16 %v5013_v14, %v5008_v23  ;;  %v7513_v34 = vpop.f32.mrb[55].mxu0  ;;  %v3080_v23 = vld [vmem:[%s9768_s4 + $0xb0] sm:$0xff] }
 0x197   : > { %9970 = vst [vmem:[#allocation88_spill] sm:$0xff] %v7492_v27  ;;  %5675 = vmatpush1.bf16.msra.mxu0 %v5674_v38  ;;  %v1527_v39 = vmax.f32 %v6983_v40, %v1129_v6  ;;  %v1131_v35 = vpop.f32.mrb[71].mxu1  ;;  %5036 = vmatmul.mubr.msk.f32.vlgmr.msra.gmra.mrb[176].mxu1 %vm447_vm0, %v7066_v21  ;;  %v5023_v6 = vld [vmem:[%s6394_s18 + $0x5e8] sm:$0xff]  ;;  %v7536_v52 = vpop.f32.mrb[56].mxu0  ;;  %v10043_v27 = vld [vmem:[#allocation36_spill] sm:$0xff] }
 0x198   : > { %9971 = vst [vmem:[#allocation89_spill] sm:$0xff] %v7497_v37  ;;  %v1528_v43 = vmax.f32 %v6987_v41, %v1131_v35  ;;  %2341 = vmatprep.mubr.f32.mxu1 %v9918_v1  ;;  %5637 = vmatpush3.bf16.msra.mxu1 %v7264_v53  ;;  %v3079_v41 = vld [vmem:[%s9768_s4 + $0xa8] sm:$0xff]  ;;  %v3081_v53 = vld [vmem:[%s9768_s4 + $0xb8] sm:$0xff]  ;;  %v5646_v38 = vpack.c.bf16 %v5023_v6, %v5018_v59  ;;  %v2952_v37 = vld [vmem:[%s9767_s3 + $0x130] sm:$0xff] }
 0x199   : > { %v7510_v0 = vmax.f32 %v1527_v39, %v7171_v58  ;;  %5639 = vmatprep.subr.bf16.mxu1 %v5638_v47  ;;  %v5676_v14 = vpack.c.bf16 %v3081_v53, %v3079_v41  ;;  %v7541_v39 = vpop.f32.mrb[57].mxu0 }
 0x19a   : > { %v7516_v40 = vmax.f32 %v1528_v43, %v7173_v60  ;;  %v1135_v21 = vpop.f32.mrb[72].mxu1  ;;  %v3078_v60 = vld [vmem:[%s9768_s4 + $0xa0] sm:$0xff]  ;;  %v7553_v59 = vpop.f32.mrb[58].mxu0 }
 0x19b   : > { %9972 = vst [vmem:[#allocation90_spill] sm:$0xff] %v7510_v0  ;;  %v1532_v58 = vmax.f32 %v6993_v42, %v1135_v21  ;;  %v1137_v36 = vpop.f32.mrb[73].mxu1  ;;  %5037 = vmatmul.mubr.msk.f32.gmra.mrb[178].mxu1 %vm447_vm0, %v7083_v32  ;;  %v5678_v42 = vpack.c.bf16 %v3080_v23, %v3078_v60  ;;  %5677 = vmatprep.subr.bf16.mxu0 %v5676_v14  ;;  %v5028_v21 = vld [vmem:[%s6394_s18 + $0x610] sm:$0xff]  ;;  %v7558_v53 = vpop.f32.mrb[59].mxu0 }
 0x19c   : > { %9973 = vst [vmem:[#allocation91_spill] sm:$0xff] %v7516_v40  ;;  %v1533_v7 = vmax.f32 %v6995_v44, %v1137_v36  ;;  %2347 = vmatprep.mubr.f32.mxu1 %v9918_v1  ;;  %5641 = vmatpush3.bf16.msra.mxu1 %v5638_v47  ;;  %v5033_v44 = vld [vmem:[%s6394_s18 + $0x638] sm:$0xf]  ;;  %v3084_v14 = vld [vmem:[%s9768_s4 + $0xd0] sm:$0xff]  ;;  %v7580_v23 = vpop.f32.mrb[60].mxu0  ;;  %s4722_s18 = sshll.u32 %s6252_s9, 2 }
 0x19d   : > { %v7539_v32 = vmax.f32 %v1532_v58, %v7183_v61  ;;  %5643 = vmatprep.subr.bf16.mxu1 %v5642_v17  ;;  %5679 = vmatpush1.bf16.msra.mxu0 %v5678_v42  ;;  %v5650_v6 = vpack.c.bf16 %v5033_v44, %v5028_v21  ;;  %s7603_s24 = sadd.s32 %s6248_s30, %s4722_s18 }
 0x19e   : > { %v7544_v35 = vmax.f32 %v1533_v7, %v7187_v62  ;;  %v1141_v43 = vpop.f32.mrb[74].mxu1  ;;  %v7587_v7 = vpop.f32.mrb[61].mxu0  ;;  %s4723_s26 = sshll.u32 %s7603_s24, 4  ;;  %s5111_s30 = sshll.u32 %s7603_s24, 11 }
 0x19f   : > { %9974 = vst [vmem:[#allocation92_spill] sm:$0xff] %v7539_v32  ;;  %v1537_v47 = vmax.f32 %v7000_v45, %v1141_v43  ;;  %v1143_v41 = vpop.f32.mrb[75].mxu1  ;;  %5038 = vmatmul.mubr.msk.f32.gmra.mrb[180].mxu1 %vm447_vm0, %v7088_v33  ;;  %v3085_v33 = vld [vmem:[%s9768_s4 + $0xd8] sm:$0xff]  ;;  %v7600_v21 = vpop.f32.mrb[62].mxu0  ;;  %p371_p0 = scmp.lt.s32.totalorder %s4723_s26, 127  ;;  %s9701_s16 = scalar_lea.hbm %s9772_s8, %s5111_s30 }
 0x1a0   : > { %9975 = vst [vmem:[#allocation93_spill] sm:$0xff] %v7544_v35  ;;  %v1538_v61 = vmax.f32 %v7002_v46, %v1143_v41  ;;  %2353 = vmatprep.mubr.f32.mxu1 %v9918_v1  ;;  %5645 = vmatpush3.bf16.msra.mxu1 %v5642_v17  ;;  %v3083_v46 = vld [vmem:[%s9768_s4 + $0xc8] sm:$0xff] }
 0x1a1   : > { %v7556_v62 = vmax.f32 %v1537_v47, %v7198_v54  ;;  %5647 = vmatprep.subr.bf16.mxu1 %v5646_v38  ;;  %v5680_v36 = vpack.c.bf16 %v3085_v33, %v3083_v46  ;;  %v3089_v47 = vld [vmem:[%s9768_s4 + $0xf8] sm:$0xff]  ;;  %s10356_s26 = smov (!%p371_p0, %s4723_s26), 127  ;;  %v2951_v35 = vld [vmem:[%s9767_s3 + $0x128] sm:$0xff] }
 0x1a2   : > { %v7561_v45 = vmax.f32 %v1538_v61, %v7202_v30  ;;  %v1147_v58 = vpop.f32.mrb[76].mxu1  ;;  %v3082_v30 = vld [vmem:[%s9768_s4 + $0xc0] sm:$0xff]  ;;  %v5684_v61 = vpack.c.bf16 %v3089_v47, %v3087_v31  ;;  %s4724_s9 = sshll.u32 %s10356_s26, 3 }
 0x1a3   : > { %9976 = vst [vmem:[#allocation94_spill] sm:$0xff] %v7556_v62  ;;  %v1542_v17 = vmax.f32 %v7011_v49, %v1147_v58  ;;  %v1149_v54 = vpop.f32.mrb[77].mxu1  ;;  %5039 = vmatmul.mubr.msk.f32.gmra.mrb[182].mxu1 %vm447_vm0, %v7105_v11  ;;  %v5682_v49 = vpack.c.bf16 %v3084_v14, %v3082_v30  ;;  %5681 = vmatprep.subr.bf16.mxu0 %v5680_v36  ;;  %s7653_s18 = scalar_lea.vmem %s9766_s2, %s4724_s9  ;;  %v10039_v62 = vld [vmem:[#allocation34_spill] sm:$0xff] }
 0x1a4   : > { %9977 = vst [vmem:[#allocation95_spill] sm:$0xff] %v7561_v45  ;;  %v1543_v60 = vmax.f32 %v7013_v51, %v1149_v54  ;;  %2359 = vmatprep.mubr.f32.mxu1 %v9918_v1  ;;  %5649 = vmatpush3.bf16.msra.mxu1 %v5646_v38  ;;  %v2948_v45 = vld [vmem:[%s9767_s3 + $0x110] sm:$0xff] }
 0x1a5   : > { %v7583_v11 = vmax.f32 %v1542_v17, %v7213_v19  ;;  %5652 = vmatprep.subr.msk.bf16.mxu1 %vm6426_vm3, %v5650_v6  ;;  %5683 = vmatpush1.bf16.msra.mxu0 %v5682_v49  ;;  %v2916_v49 = vld [vmem:[%s9767_s3 + $0x10] sm:$0xff] }
 0x1a6   : > { %v7590_v42 = vmax.f32 %v1543_v60, %v7217_v13  ;;  %v1153_v51 = vpop.f32.mrb[78].mxu1  ;;  %5685 = vmatprep.subr.bf16.mxu0 %v5684_v61  ;;  %v2914_v60 = vld [vmem:[%s9767_s3] sm:$0xff] }
 0x1a7   : > { %9978 = vst [vmem:[#allocation96_spill] sm:$0xff] %v7583_v11  ;;  %v1547_v38 = vmax.f32 %v7022_v55, %v1153_v51  ;;  %v1155_v43 = vpop.f32.mrb[79].mxu1  ;;  %5040 = vmatmul.mubr.msk.f32.gmra.mrb[184].mxu1 %vm447_vm0, %v7271_v12  ;;  %v7608_v55 = vpop.f32.mrb[63].mxu0  ;;  %v2898_v51 = vld [vmem:[%s7653_s18] sm:$0xff] }
 0x1a8   : > { %9979 = vst [vmem:[#allocation97_spill] sm:$0xff] %v7590_v42  ;;  %v1548_v19 = vmax.f32 %v7024_v56, %v1155_v43  ;;  %2365 = vmatprep.mubr.f32.mxu1 %v9918_v1  ;;  %5655 = vmatpush3.bf16.msk.msra.mxu1 %vm6426_vm3, %v5650_v6  ;;  %v3088_v6 = vld [vmem:[%s9768_s4 + $0xf0] sm:$0xff]  ;;  %v7634_v33 = vpop.f32.mrb[64].mxu0  ;;  %v2918_v61 = vld [vmem:[%s9767_s3 + $0x20] sm:$0xff] }
 0x1a9   : > { %v7606_v13 = vmax.f32 %v1547_v38, %v7228_v48  ;;  %v7639_v36 = vpop.f32.mrb[65].mxu0  ;;  %v5690_v38 = vpack.c.bf16 %v2916_v49, %v2914_v60  ;;  %v2925_v60 = vld [vmem:[%s9767_s3 + $0x58] sm:$0xff]  ;;  %v9990_v49 = vld [vmem:[#allocation17_spill] sm:$0xff] }
 0x1aa   : > { %v7612_v44 = vmax.f32 %v1548_v19, %v7232_v50  ;;  %v1159_v56 = vpop.f32.mrb[80].mxu1  ;;  %v3086_v50 = vld [vmem:[%s9768_s4 + $0xe0] sm:$0xff]  ;;  %v7667_v19 = vpop.f32.mrb[66].mxu0 }
 0x1ab   : > { %9980 = vst [vmem:[#allocation98_spill] sm:$0xff] %v7606_v13  ;;  %v1552_v41 = vmax.f32 %v7033_v4, %v1159_v56  ;;  %v1161_v48 = vpop.f32.mrb[81].mxu1  ;;  %5041 = vmatmul.mubr.msk.f32.gmra.mrb[186].mxu1 %vm447_vm0, %v7288_v63  ;;  %v5686_v46 = vpack.c.bf16 %v3088_v6, %v3086_v50  ;;  %v7672_v47 = vpop.f32.mrb[67].mxu0  ;;  %v2920_v50 = vld [vmem:[%s9767_s3 + $0x30] sm:$0xff] }
 0x1ac   : > { %9981 = vst [vmem:[#allocation99_spill] sm:$0xff] %v7612_v44  ;;  %v1553_v58 = vmax.f32 %v7035_v5, %v1161_v48  ;;  %2371 = vmatprep.mubr.f32.mxu1 %v9918_v1  ;;  %v2915_v5 = vld [vmem:[%s9767_s3 + $0x8] sm:$0xff] }
 0x1ad   : > { %v7632_v4 = vmax.f32 %v1552_v41, %v7243_v25  ;;  %5687 = vmatpush1.bf16.msra.mxu0 %v5686_v46  ;;  %v2917_v25 = vld [vmem:[%s9767_s3 + $0x18] sm:$0xff]  ;;  %v5694_v46 = vpack.c.bf16 %v2920_v50, %v2918_v61  ;;  %v9993_v50 = vld [vmem:[#allocation51_spill] sm:$0xff] }
 0x1ae   : > { %v7637_v17 = vmax.f32 %v1553_v58, %v7247_v28  ;;  %v1165_v54 = vpop.f32.mrb[82].mxu1  ;;  %v5688_v28 = vpack.c.bf16 %v2917_v25, %v2915_v5  ;;  %v2899_v58 = vld [vmem:[%s7653_s18 + $0x8] sm:$0xff]  ;;  %v7696_v5 = vpop.f32.mrb[68].mxu0  ;;  %v9988_v25 = vld [vmem:[#allocation48_spill] sm:$0xff] }
 0x1af   : > { %9982 = vst [vmem:[#allocation100_spill] sm:$0xff] %v7632_v4  ;;  %v1557_v30 = vmax.f32 %v7044_v8, %v1165_v54  ;;  %v1167_v14 = vpop.f32.mrb[83].mxu1  ;;  %5042 = vmatmul.mubr.msk.f32.gmra.mrb[188].mxu1 %vm447_vm0, %v7302_v24 }
 0x1b0   : > { %9983 = vst [vmem:[#allocation101_spill] sm:$0xff] %v7637_v17  ;;  %v1558_v8 = vmax.f32 %v7046_v10, %v1167_v14  ;;  %2377 = vmatprep.mubr.f32.mxu1 %v9918_v1  ;;  %3155 = vmatmul.mubr.f32.vlgmr.msra.gmra.mrb[96].mxu0 %v2898_v51  ;;  %v2919_v10 = vld [vmem:[%s9767_s3 + $0x28] sm:$0xff] }
 0x1b1   : > { %v7665_v43 = vmax.f32 %v1557_v30, %v7258_v57  ;;  %5689 = vmatprep.subr.bf16.mxu0 %v5688_v28  ;;  %3160 = vmatprep.mubr.f32.mxu0 %v9918_v1  ;;  %v2921_v57 = vld [vmem:[%s9767_s3 + $0x38] sm:$0xff]  ;;  %v7701_v28 = vpop.f32.mrb[69].mxu0 }
 0x1b2   : > { %v7670_v56 = vmax.f32 %v1558_v8, %v7262_v2  ;;  %v1171_v31 = vpop.f32.mrb[84].mxu1  ;;  %5691 = vmatpush1.bf16.msra.mxu0 %v5690_v38  ;;  %v5692_v2 = vpack.c.bf16 %v2921_v57, %v2919_v10  ;;  %v9991_v38 = vld [vmem:[#allocation63_spill] sm:$0xff]  ;;  %v2922_v10 = vld [vmem:[%s9767_s3 + $0x40] sm:$0xff] }
 0x1b3   : > { %9984 = vst [vmem:[#allocation102_spill] sm:$0xff] %v7665_v43  ;;  %v1562_v41 = vmax.f32 %v7057_v15, %v1171_v31  ;;  %v1173_v48 = vpop.f32.mrb[85].mxu1  ;;  %5043 = vmatmul.mubr.msk.f32.gmra.mrb[190].mxu1 %vm447_vm0, %v7322_v16  ;;  %v9986_v15 = vld [vmem:[#allocation47_spill] sm:$0xff] }
 0x1b4   : > { %9985 = vst [vmem:[#allocation103_spill] sm:$0xff] %v7670_v56  ;;  %v1563_v6 = vmax.f32 %v7061_v18, %v1173_v48  ;;  %2383 = vmatprep.mubr.f32.mxu1 %v9918_v1  ;;  %3161 = vmatmul.mubr.f32.gmra.mrb[98].mxu0 %v2899_v58  ;;  %v2923_v18 = vld [vmem:[%s9767_s3 + $0x48] sm:$0xff]  ;;  %v2924_v57 = vld [vmem:[%s9767_s3 + $0x50] sm:$0xff]  ;;  %v7725_v58 = vpop.f32.mrb[70].mxu0 }
 0x1b5   : > { %v7694_v54 = vmax.f32 %v1562_v41, %v9986_v15  ;;  %5693 = vmatprep.subr.bf16.mxu0 %v5692_v2  ;;  %3166 = vmatprep.mubr.f32.mxu0 %v9918_v1  ;;  %v5696_v31 = vpack.c.bf16 %v2925_v60, %v2923_v18  ;;  %v9992_v41 = vld [vmem:[#allocation18_spill] sm:$0xff]  ;;  %v2900_v2 = vld [vmem:[%s7653_s18 + $0x10] sm:$0xff]  ;;  %v5698_v61 = vpack.c.bf16 %v2924_v57, %v2922_v10  ;;  %v2929_v60 = vld [vmem:[%s9767_s3 + $0x78] sm:$0xff] }
 0x1b6   : > { %v7699_v30 = vmax.f32 %v1563_v6, %v9988_v25  ;;  %v1177_v14 = vpop.f32.mrb[86].mxu1  ;;  %5695 = vmatpush1.bf16.msra.mxu0 %v5694_v46  ;;  %v9995_v46 = vld [vmem:[#allocation52_spill] sm:$0xff]  ;;  %v2927_v18 = vld [vmem:[%s9767_s3 + $0x68] sm:$0xff]  ;;  %v2926_v57 = vld [vmem:[%s9767_s3 + $0x60] sm:$0xff] }
 0x1b7   : > { %9987 = vst [vmem:[#allocation47_spill] sm:$0xff] %v7694_v54  ;;  %v1567_v8 = vmax.f32 %v9990_v49, %v1177_v14  ;;  %v1179_v51 = vpop.f32.mrb[87].mxu1  ;;  %5044 = vmatmul.mubr.msk.f32.gmra.mrb[192].mxu1 %vm447_vm0, %v9991_v38  ;;  %5697 = vmatprep.subr.bf16.mxu0 %v5696_v31  ;;  %v7730_v14 = vpop.f32.mrb[71].mxu0  ;;  %v9997_v49 = vld [vmem:[#allocation21_spill] sm:$0xff]  ;;  %v9998_v31 = vld [vmem:[#allocation68_spill] sm:$0xff]  ;;  %v5700_v10 = vpack.c.bf16 %v2929_v60, %v2927_v18 }
 0x1b8   : > { %9989 = vst [vmem:[#allocation48_spill] sm:$0xff] %v7699_v30  ;;  %v1568_v48 = vmax.f32 %v9992_v41, %v1179_v51  ;;  %2389 = vmatprep.mubr.f32.mxu1 %v9918_v1  ;;  %3167 = vmatmul.mubr.f32.gmra.mrb[100].mxu0 %v2900_v2  ;;  %v2928_v41 = vld [vmem:[%s9767_s3 + $0x70] sm:$0xff]  ;;  %v10003_v18 = vld [vmem:[#allocation56_spill] sm:$0xff] }
 0x1b9   : > { %v7723_v6 = vmax.f32 %v1567_v8, %v9993_v50  ;;  %3172 = vmatprep.mubr.f32.mxu0 %v9918_v1  ;;  %v5702_v50 = vpack.c.bf16 %v2928_v41, %v2926_v57  ;;  %v10006_v57 = vld [vmem:[#allocation25_spill] sm:$0xff] }
 0x1ba   : > { %v7728_v15 = vmax.f32 %v1568_v48, %v9995_v46  ;;  %v1183_v25 = vpop.f32.mrb[88].mxu1  ;;  %5699 = vmatpush1.bf16.msra.mxu0 %v5698_v61  ;;  %v9999_v48 = vld [vmem:[#allocation22_spill] sm:$0xff]  ;;  %v2901_v61 = vld [vmem:[%s7653_s18 + $0x18] sm:$0xff]  ;;  %v10000_v46 = vld [vmem:[#allocation55_spill] sm:$0xff] }
 0x1bb   : > { %9994 = vst [vmem:[#allocation17_spill] sm:$0xff] %v7723_v6  ;;  %v1572_v8 = vmax.f32 %v9997_v49, %v1183_v25  ;;  %v1185_v51 = vpop.f32.mrb[89].mxu1  ;;  %5045 = vmatmul.mubr.msk.f32.gmra.mrb[194].mxu1 %vm447_vm0, %v9998_v31  ;;  %v7754_v49 = vpop.f32.mrb[72].mxu0  ;;  %5701 = vmatprep.subr.bf16.mxu0 %v5700_v10 }
 0x1bc   : > { %9996 = vst [vmem:[#allocation63_spill] sm:$0xff] %v7728_v15  ;;  %v1573_v2 = vmax.f32 %v9999_v48, %v1185_v51  ;;  %2395 = vmatprep.mubr.f32.mxu1 %v9918_v1  ;;  %10002 = vst [vmem:[#allocation51_spill] sm:$0xff] %v7754_v49  ;;  %3173 = vmatmul.mubr.f32.gmra.mrb[102].mxu0 %v2901_v61  ;;  %v7759_v6 = vpop.f32.mrb[73].mxu0  ;;  %v2931_v51 = vld [vmem:[%s9767_s3 + $0x88] sm:$0xff]  ;;  %v10007_v48 = vld [vmem:[#allocation73_spill] sm:$0xff] }
 0x1bd   : > { %v7752_v25 = vmax.f32 %v1572_v8, %v10000_v46  ;;  %10005 = vst [vmem:[#allocation21_spill] sm:$0xff] %v7759_v6  ;;  %3178 = vmatprep.mubr.f32.mxu0 %v9918_v1  ;;  %v2933_v8 = vld [vmem:[%s9767_s3 + $0x98] sm:$0xff]  ;;  %v2930_v61 = vld [vmem:[%s9767_s3 + $0x80] sm:$0xff]  ;;  %v10008_v46 = vld [vmem:[#allocation26_spill] sm:$0xff]  ;;  %v7783_v30 = vpop.f32.mrb[74].mxu0 }
 0x1be   : > { %v7757_v60 = vmax.f32 %v1573_v2, %v10003_v18  ;;  %v1189_v15 = vpop.f32.mrb[90].mxu1  ;;  %5703 = vmatpush1.bf16.msra.mxu0 %v5702_v50  ;;  %v5704_v2 = vpack.c.bf16 %v2933_v8, %v2931_v51  ;;  %v2932_v50 = vld [vmem:[%s9767_s3 + $0x90] sm:$0xff]  ;;  %10011 = vst [vmem:[#allocation22_spill] sm:$0xff] %v7783_v30  ;;  %v10012_v51 = vld [vmem:[#allocation60_spill] sm:$0xff]  ;;  %v7788_v56 = vpop.f32.mrb[75].mxu0 }
 0x1bf   : > { %10001 = vst [vmem:[#allocation18_spill] sm:$0xff] %v7752_v25  ;;  %v1577_v10 = vmax.f32 %v10006_v57, %v1189_v15  ;;  %v1191_v41 = vpop.f32.mrb[91].mxu1  ;;  %5046 = vmatmul.mubr.msk.f32.gmra.mrb[196].mxu1 %vm447_vm0, %v10007_v48  ;;  %v5706_v25 = vpack.c.bf16 %v2932_v50, %v2930_v61  ;;  %v10009_v15 = vld [vmem:[#allocation59_spill] sm:$0xff]  ;;  %10014 = vst [vmem:[#allocation56_spill] sm:$0xff] %v7788_v56  ;;  %v10016_v50 = vld [vmem:[#allocation76_spill] sm:$0xff]  ;;  %v7812_v43 = vpop.f32.mrb[76].mxu0 }
 0x1c0   : > { %10004 = vst [vmem:[#allocation52_spill] sm:$0xff] %v7757_v60  ;;  %v1578_v18 = vmax.f32 %v10008_v46, %v1191_v41  ;;  %2401 = vmatprep.mubr.f32.mxu1 %v9918_v1  ;;  %v2902_v60 = vld [vmem:[%s7653_s18 + $0x20] sm:$0xff]  ;;  %5705 = vmatprep.subr.bf16.mxu0 %v5704_v2  ;;  %v2935_v41 = vld [vmem:[%s9767_s3 + $0xa8] sm:$0xff]  ;;  %10020 = vst [vmem:[#allocation73_spill] sm:$0xff] %v7812_v43  ;;  %v7817_v4 = vpop.f32.mrb[77].mxu0 }
 0x1c1   : > { %v7781_v57 = vmax.f32 %v1577_v10, %v10009_v15  ;;  %3179 = vmatmul.mubr.f32.gmra.mrb[104].mxu0 %v2902_v60  ;;  %v2937_v10 = vld [vmem:[%s9767_s3 + $0xb8] sm:$0xff]  ;;  %v10015_v60 = vld [vmem:[#allocation27_spill] sm:$0xff]  ;;  %10023 = vst [vmem:[#allocation59_spill] sm:$0xff] %v7817_v4  ;;  %v7841_v44 = vpop.f32.mrb[78].mxu0 }
 0x1c2   : > { %v7786_v8 = vmax.f32 %v1578_v18, %v10012_v51  ;;  %v1195_v54 = vpop.f32.mrb[92].mxu1  ;;  %5707 = vmatpush1.bf16.msra.mxu0 %v5706_v25  ;;  %3184 = vmatprep.mubr.f32.mxu0 %v9918_v1  ;;  %v5708_v46 = vpack.c.bf16 %v2937_v10, %v2935_v41  ;;  %v2934_v25 = vld [vmem:[%s9767_s3 + $0xa0] sm:$0xff]  ;;  %v2936_v18 = vld [vmem:[%s9767_s3 + $0xb0] sm:$0xff]  ;;  %v10017_v15 = vld [vmem:[#allocation28_spill] sm:$0xff]  ;;  %10029 = vst [vmem:[#allocation27_spill] sm:$0xff] %v7841_v44  ;;  %v7848_v42 = vpop.f32.mrb[79].mxu0 }
 0x1c3   : > { %10010 = vst [vmem:[#allocation68_spill] sm:$0xff] %v7781_v57  ;;  %v1582_v2 = vmax.f32 %v10015_v60, %v1195_v54  ;;  %v1197_v61 = vpop.f32.mrb[93].mxu1  ;;  %5047 = vmatmul.mubr.msk.f32.gmra.mrb[198].mxu1 %vm447_vm0, %v10016_v50  ;;  %v5710_v57 = vpack.c.bf16 %v2936_v18, %v2934_v25  ;;  %v10018_v54 = vld [vmem:[#allocation64_spill] sm:$0xff]  ;;  %v10021_v41 = vld [vmem:[#allocation65_spill] sm:$0xff]  ;;  %v10025_v18 = vld [vmem:[#allocation79_spill] sm:$0xff] }
 0x1c4   : > { %10013 = vst [vmem:[#allocation55_spill] sm:$0xff] %v7786_v8  ;;  %v1583_v51 = vmax.f32 %v10017_v15, %v1197_v61  ;;  %2407 = vmatprep.mubr.f32.mxu1 %v9918_v1  ;;  %v2903_v8 = vld [vmem:[%s7653_s18 + $0x28] sm:$0xff]  ;;  %5709 = vmatprep.subr.bf16.mxu0 %v5708_v46  ;;  %10032 = vst [vmem:[#allocation28_spill] sm:$0xff] %v7848_v42  ;;  %v6150_v4 = vld [vmem:[%s6409_s13 + $0x10] sm:$0xff] }
 0x1c5   : > { %v7810_v60 = vmax.f32 %v1582_v2, %v10018_v54  ;;  %3185 = vmatmul.mubr.f32.gmra.mrb[106].mxu0 %v2903_v8  ;;  %v2939_v61 = vld [vmem:[%s9767_s3 + $0xc8] sm:$0xff]  ;;  %v2941_v2 = vld [vmem:[%s9767_s3 + $0xd8] sm:$0xff]  ;;  %v10024_v8 = vld [vmem:[#allocation29_spill] sm:$0xff] }
 0x1c6   : > { %v7815_v10 = vmax.f32 %v1583_v51, %v10021_v41  ;;  %v1201_v17 = vpop.f32.mrb[94].mxu1  ;;  %5711 = vmatpush1.bf16.msra.mxu0 %v5710_v57  ;;  %3190 = vmatprep.mubr.f32.mxu0 %v9918_v1  ;;  %v5712_v15 = vpack.c.bf16 %v2941_v2, %v2939_v61  ;;  %v2938_v57 = vld [vmem:[%s9767_s3 + $0xc0] sm:$0xff]  ;;  %v2940_v51 = vld [vmem:[%s9767_s3 + $0xd0] sm:$0xff]  ;;  %v10026_v54 = vld [vmem:[#allocation30_spill] sm:$0xff] }
 0x1c7   : > { %10019 = vst [vmem:[#allocation25_spill] sm:$0xff] %v7810_v60  ;;  %v1587_v46 = vmax.f32 %v10024_v8, %v1201_v17  ;;  %v1203_v25 = vpop.f32.mrb[95].mxu1  ;;  %5048 = vmatmul.mubr.msk.f32.gmra.mrb[200].mxu1 %vm447_vm0, %v10025_v18  ;;  %v5714_v60 = vpack.c.bf16 %v2940_v51, %v2938_v57  ;;  %v10027_v17 = vld [vmem:[#allocation69_spill] sm:$0xff]  ;;  %v10030_v61 = vld [vmem:[#allocation70_spill] sm:$0xff]  ;;  %v10034_v51 = vld [vmem:[#allocation80_spill] sm:$0xff] }
 0x1c8   : > { %10022 = vst [vmem:[#allocation26_spill] sm:$0xff] %v7815_v10  ;;  %v1588_v41 = vmax.f32 %v10026_v54, %v1203_v25  ;;  %2413 = vmatprep.mubr.f32.mxu1 %v9918_v1  ;;  %v2904_v10 = vld [vmem:[%s7653_s18 + $0x30] sm:$0xff]  ;;  %5713 = vmatprep.subr.bf16.mxu0 %v5712_v15  ;;  %v2905_v15 = vld [vmem:[%s7653_s18 + $0x38] sm:$0xff]  ;;  %v10047_v42 = vld [vmem:[#allocation38_spill] sm:$0xff] }
 0x1c9   : > { %v7839_v8 = vmax.f32 %v1587_v46, %v10027_v17  ;;  %3191 = vmatmul.mubr.f32.gmra.mrb[108].mxu0 %v2904_v10  ;;  %v2943_v46 = vld [vmem:[%s9767_s3 + $0xe8] sm:$0xff]  ;;  %v2945_v10 = vld [vmem:[%s9767_s3 + $0xf8] sm:$0xff]  ;;  %v10033_v25 = vld [vmem:[#allocation31_spill] sm:$0xff] }
 0x1ca   : > { %v7844_v2 = vmax.f32 %v1588_v41, %v10030_v61  ;;  %v7846_v13 = vpop.f32.mrb[96].mxu1  ;;  %5715 = vmatpush1.bf16.msra.mxu0 %v5714_v60  ;;  %3196 = vmatprep.mubr.f32.mxu0 %v9918_v1  ;;  %v5716_v54 = vpack.c.bf16 %v2945_v10, %v2943_v46  ;;  %v2942_v60 = vld [vmem:[%s9767_s3 + $0xe0] sm:$0xff]  ;;  %v2944_v41 = vld [vmem:[%s9767_s3 + $0xf0] sm:$0xff]  ;;  %v10035_v17 = vld [vmem:[#allocation32_spill] sm:$0xff] }
 0x1cb   : > { %10028 = vst [vmem:[#allocation60_spill] sm:$0xff] %v7839_v8  ;;  %v7859_v57 = vpop.f32.mrb[97].mxu1  ;;  %5049 = vmatmul.mubr.msk.f32.gmra.mrb[202].mxu1 %vm447_vm0, %v10034_v51  ;;  %v7873_v8 = vpop.f32.mrb[80].mxu0  ;;  %v2947_v61 = vld [vmem:[%s9767_s3 + $0x108] sm:$0xff]  ;;  %v2964_v30 = vld [vmem:[%s9767_s3 + $0x190] sm:$0xff] }
 0x1cc   : > { %10031 = vst [vmem:[#allocation76_spill] sm:$0xff] %v7844_v2  ;;  %2419 = vmatprep.mubr.f32.mxu1 %v9918_v1  ;;  %v5718_v2 = vpack.c.bf16 %v2944_v41, %v2942_v60  ;;  %10036 = vst [vmem:[#allocation64_spill] sm:$0xff] %v7873_v8  ;;  %5717 = vmatprep.subr.bf16.mxu0 %v5716_v54  ;;  %v7877_v10 = vpop.f32.mrb[81].mxu0  ;;  %v2949_v60 = vld [vmem:[%s9767_s3 + $0x118] sm:$0xff]  ;;  %v10038_v41 = vld [vmem:[#allocation33_spill] sm:$0xff] }
 0x1cd   : > { %3197 = vmatmul.mubr.f32.gmra.mrb[110].mxu0 %v2905_v15  ;;  %10037 = vst [vmem:[#allocation65_spill] sm:$0xff] %v7877_v10  ;;  %v5720_v54 = vpack.c.bf16 %v2949_v60, %v2947_v61  ;;  %v2906_v15 = vld [vmem:[%s7653_s18 + $0x40] sm:$0xff]  ;;  %v7902_v40 = vpop.f32.mrb[82].mxu0 }
 0x1ce   : > { %v7875_v46 = vpop.f32.mrb[98].mxu1  ;;  %5719 = vmatpush1.bf16.msra.mxu0 %v5718_v2  ;;  %3202 = vmatprep.mubr.f32.mxu0 %v9918_v1  ;;  %v2946_v2 = vld [vmem:[%s9767_s3 + $0x100] sm:$0xff]  ;;  %10040 = vst [vmem:[#allocation29_spill] sm:$0xff] %v7902_v40  ;;  %v7906_v60 = vpop.f32.mrb[83].mxu0 }
 0x1cf   : > { %v7888_v11 = vpop.f32.mrb[99].mxu1  ;;  %5050 = vmatmul.mubr.msk.f32.gmra.mrb[204].mxu1 %vm447_vm0, %v7451_v29  ;;  %v5722_v32 = vpack.c.bf16 %v2948_v45, %v2946_v2  ;;  %5721 = vmatprep.subr.bf16.mxu0 %v5720_v54  ;;  %10041 = vst [vmem:[#allocation79_spill] sm:$0xff] %v7906_v60  ;;  %v2953_v45 = vld [vmem:[%s9767_s3 + $0x138] sm:$0xff]  ;;  %v10042_v2 = vld [vmem:[#allocation35_spill] sm:$0xff]  ;;  %v6148_v40 = vld [vmem:[%s6409_s13] sm:$0xff]  ;;  %v7932_v8 = vpop.f32.mrb[84].mxu0 }
 0x1d0   : > { %2425 = vmatprep.mubr.f32.mxu1 %v9918_v1  ;;  %v5724_v0 = vpack.c.bf16 %v2953_v45, %v2951_v35  ;;  %10044 = vst [vmem:[#allocation30_spill] sm:$0xff] %v7932_v8  ;;  %v7936_v45 = vpop.f32.mrb[85].mxu0  ;;  %v2955_v60 = vld [vmem:[%s9767_s3 + $0x148] sm:$0xff]  ;;  %v2956_v8 = vld [vmem:[%s9767_s3 + $0x150] sm:$0xff] }
 0x1d1   : > { %3203 = vmatmul.mubr.f32.gmra.mrb[112].mxu0 %v2906_v15  ;;  %v2907_v15 = vld [vmem:[%s7653_s18 + $0x48] sm:$0xff]  ;;  %10045 = vst [vmem:[#allocation69_spill] sm:$0xff] %v7936_v45  ;;  %v7962_v56 = vpop.f32.mrb[86].mxu0 }
 0x1d2   : > { %v7904_v61 = vpop.f32.mrb[100].mxu1  ;;  %5723 = vmatpush1.bf16.msra.mxu0 %v5722_v32  ;;  %3208 = vmatprep.mubr.f32.mxu0 %v9918_v1  ;;  %v2950_v32 = vld [vmem:[%s9767_s3 + $0x120] sm:$0xff]  ;;  %10048 = vst [vmem:[#allocation70_spill] sm:$0xff] %v7962_v56  ;;  %v10051_v56 = vld [vmem:[#allocation40_spill] sm:$0xff] }
 0x1d3   : > { %v7917_v54 = vpop.f32.mrb[101].mxu1  ;;  %5051 = vmatmul.mubr.msk.f32.gmra.mrb[206].mxu1 %vm447_vm0, %v7477_v26  ;;  %v5726_v10 = vpack.c.bf16 %v2952_v37, %v2950_v32  ;;  %5725 = vmatprep.subr.bf16.mxu0 %v5724_v0  ;;  %v2957_v37 = vld [vmem:[%s9767_s3 + $0x158] sm:$0xff]  ;;  %v6149_v32 = vld [vmem:[%s6409_s13 + $0x8] sm:$0xff] }
 0x1d4   : > { %5368 = vmatprep.mubr.msk.f32.mxu1 %vm447_vm0, %v6148_v40  ;;  %v10046_v40 = vld [vmem:[#allocation37_spill] sm:$0xff]  ;;  %v5728_v45 = vpack.c.bf16 %v2957_v37, %v2955_v60  ;;  %v7966_v37 = vpop.f32.mrb[87].mxu0 }
 0x1d5   : > { %3209 = vmatmul.mubr.f32.gmra.mrb[114].mxu0 %v2907_v15  ;;  %v2908_v15 = vld [vmem:[%s7653_s18 + $0x50] sm:$0xff]  ;;  %10049 = vst [vmem:[#allocation31_spill] sm:$0xff] %v7966_v37  ;;  %v7992_v49 = vpop.f32.mrb[88].mxu0 }
 0x1d6   : > { %v7934_v35 = vpop.f32.mrb[102].mxu1  ;;  %5727 = vmatpush1.bf16.msra.mxu0 %v5726_v10  ;;  %3214 = vmatprep.mubr.f32.mxu0 %v9918_v1  ;;  %v2954_v10 = vld [vmem:[%s9767_s3 + $0x140] sm:$0xff]  ;;  %v2960_v37 = vld [vmem:[%s9767_s3 + $0x170] sm:$0xff]  ;;  %10052 = vst [vmem:[#allocation80_spill] sm:$0xff] %v7992_v49 }
 0x1d7   : > { %v7947_v0 = vpop.f32.mrb[103].mxu1  ;;  %5369 = vmatmul.mubr.msk.f32.vlgmr.msra.gmra.mrb[208].mxu1 %vm447_vm0, %v6149_v32  ;;  %v5730_v43 = vpack.c.bf16 %v2956_v8, %v2954_v10  ;;  %5729 = vmatprep.subr.bf16.mxu0 %v5728_v45  ;;  %v2959_v32 = vld [vmem:[%s9767_s3 + $0x168] sm:$0xff]  ;;  %v10050_v8 = vld [vmem:[#allocation39_spill] sm:$0xff]  ;;  %v6151_v10 = vld [vmem:[%s6409_s13 + $0x18] sm:$0xff]  ;;  %s6174_s13 = sshll.u32 %s6268_s21, 4  ;;  %s6175_s13 = int_to_ptr.vmem [resolvable:$false] %s6174_s13 }
 0x1d8   : > { %5371 = vmatprep.mubr.msk.f32.mxu1 %vm447_vm0, %v6150_v4  ;;  %v2961_v4 = vld [vmem:[%s9767_s3 + $0x178] sm:$0xff]  ;;  %v2968_v49 = vld [vmem:[%s9767_s3 + $0x1b0] sm:$0xff]  ;;  %s6176_s30 = scalar_lea.vmem %s6175_s13, 4096 }
 0x1d9   : > { %3215 = vmatmul.mubr.f32.gmra.mrb[116].mxu0 %v2908_v15  ;;  %v5732_v44 = vpack.c.bf16 %v2961_v4, %v2959_v32  ;;  %v2909_v15 = vld [vmem:[%s7653_s18 + $0x58] sm:$0xff]  ;;  %v7996_v4 = vpop.f32.mrb[89].mxu0 }
 0x1da   : > { %v7964_v60 = vpop.f32.mrb[104].mxu1  ;;  %5731 = vmatpush1.bf16.msra.mxu0 %v5730_v43  ;;  %3220 = vmatprep.mubr.f32.mxu0 %v9918_v1  ;;  %v2958_v43 = vld [vmem:[%s9767_s3 + $0x160] sm:$0xff]  ;;  %10054 = vst [vmem:[#allocation33_spill] sm:$0xff] %v7996_v4  ;;  %v10056_v4 = vld [vmem:[#allocation42_spill] sm:$0xff] }
 0x1db   : > { %v7977_v45 = vpop.f32.mrb[105].mxu1  ;;  %5372 = vmatmul.mubr.msk.f32.gmra.mrb[210].mxu1 %vm447_vm0, %v6151_v10  ;;  %v5734_v6 = vpack.c.bf16 %v2960_v37, %v2958_v43  ;;  %5733 = vmatprep.subr.bf16.mxu0 %v5732_v44  ;;  %v2963_v10 = vld [vmem:[%s9767_s3 + $0x188] sm:$0xff]  ;;  %v8022_v37 = vpop.f32.mrb[90].mxu0 }
 0x1dc   : > { %5374 = vmatprep.mubr.msk.f32.mxu1 %vm447_vm0, %v7271_v12  ;;  %v2965_v12 = vld [vmem:[%s9767_s3 + $0x198] sm:$0xff]  ;;  %10057 = vst [vmem:[#allocation34_spill] sm:$0xff] %v8022_v37  ;;  %v2972_v37 = vld [vmem:[%s9767_s3 + $0x1d0] sm:$0xff] }
 0x1dd   : > { %3221 = vmatmul.mubr.f32.gmra.mrb[118].mxu0 %v2909_v15  ;;  %v5736_v44 = vpack.c.bf16 %v2965_v12, %v2963_v10  ;;  %v2910_v15 = vld [vmem:[%s7653_s18 + $0x60] sm:$0xff]  ;;  %v8026_v10 = vpop.f32.mrb[91].mxu0  ;;  %v2967_v12 = vld [vmem:[%s9767_s3 + $0x1a8] sm:$0xff] }
 0x1de   : > { %v7994_v32 = vpop.f32.mrb[106].mxu1  ;;  %5735 = vmatpush1.bf16.msra.mxu0 %v5734_v6  ;;  %3226 = vmatprep.mubr.f32.mxu0 %v9918_v1  ;;  %v2962_v6 = vld [vmem:[%s9767_s3 + $0x180] sm:$0xff]  ;;  %10059 = vst [vmem:[#allocation36_spill] sm:$0xff] %v8026_v10  ;;  %v10061_v10 = vld [vmem:[#allocation44_spill] sm:$0xff] }
 0x1df   : > { %10053 = vst [vmem:[#allocation32_spill] sm:$0xff] %v7994_v32  ;;  %v8007_v43 = vpop.f32.mrb[107].mxu1  ;;  %5375 = vmatmul.mubr.msk.f32.gmra.mrb[212].mxu1 %vm447_vm0, %v7288_v63  ;;  %v5738_v32 = vpack.c.bf16 %v2964_v30, %v2962_v6  ;;  %5737 = vmatprep.subr.bf16.mxu0 %v5736_v44  ;;  %v8052_v30 = vpop.f32.mrb[92].mxu0 }
 0x1e0   : > { %5377 = vmatprep.mubr.msk.f32.mxu1 %vm447_vm0, %v7302_v24  ;;  %v2969_v24 = vld [vmem:[%s9767_s3 + $0x1b8] sm:$0xff]  ;;  %10062 = vst [vmem:[#allocation37_spill] sm:$0xff] %v8052_v30  ;;  %v2976_v30 = vld [vmem:[%s9767_s3 + $0x1f0] sm:$0xff] }
 0x1e1   : > { %3227 = vmatmul.mubr.f32.gmra.mrb[120].mxu0 %v2910_v15  ;;  %v5740_v44 = vpack.c.bf16 %v2969_v24, %v2967_v12  ;;  %v2911_v15 = vld [vmem:[%s7653_s18 + $0x68] sm:$0xff]  ;;  %v8056_v12 = vpop.f32.mrb[93].mxu0 }
 0x1e2   : > { %v8024_v63 = vpop.f32.mrb[108].mxu1  ;;  %5739 = vmatpush1.bf16.msra.mxu0 %v5738_v32  ;;  %3232 = vmatprep.mubr.f32.mxu0 %v9918_v1  ;;  %v2966_v32 = vld [vmem:[%s9767_s3 + $0x1a0] sm:$0xff]  ;;  %10064 = vst [vmem:[#allocation39_spill] sm:$0xff] %v8056_v12  ;;  %v2971_v24 = vld [vmem:[%s9767_s3 + $0x1c8] sm:$0xff]  ;;  %v10108_v12 = vld [vmem:[#allocation84_spill] sm:$0xff] }
 0x1e3   : > { %10058 = vst [vmem:[#allocation35_spill] sm:$0xff] %v8024_v63  ;;  %v8037_v6 = vpop.f32.mrb[109].mxu1  ;;  %5378 = vmatmul.mubr.msk.f32.gmra.mrb[214].mxu1 %vm447_vm0, %v7322_v16  ;;  %v5742_v63 = vpack.c.bf16 %v2968_v49, %v2966_v32  ;;  %5741 = vmatprep.subr.bf16.mxu0 %v5740_v44  ;;  %v8082_v49 = vpop.f32.mrb[94].mxu0 }
 0x1e4   : > { %5380 = vmatprep.mubr.msk.f32.mxu1 %vm447_vm0, %v9991_v38  ;;  %v2973_v38 = vld [vmem:[%s9767_s3 + $0x1d8] sm:$0xff]  ;;  %10068 = vst [vmem:[#allocation42_spill] sm:$0xff] %v8082_v49 }
 0x1e5   : > { %3233 = vmatmul.mubr.f32.gmra.mrb[122].mxu0 %v2911_v15  ;;  %v5744_v44 = vpack.c.bf16 %v2973_v38, %v2971_v24  ;;  %v2912_v15 = vld [vmem:[%s7653_s18 + $0x70] sm:$0xff]  ;;  %v8086_v24 = vpop.f32.mrb[95].mxu0  ;;  %v2975_v38 = vld [vmem:[%s9767_s3 + $0x1e8] sm:$0xff] }
 0x1e6   : > { %v8054_v16 = vpop.f32.mrb[110].mxu1  ;;  %5743 = vmatpush1.bf16.msra.mxu0 %v5742_v63  ;;  %3238 = vmatprep.mubr.f32.mxu0 %v9918_v1  ;;  %v2970_v63 = vld [vmem:[%s9767_s3 + $0x1c0] sm:$0xff]  ;;  %10070 = vst [vmem:[#allocation104_spill] sm:$0xff] %v8086_v24 }
 0x1e7   : > { %10063 = vst [vmem:[#allocation38_spill] sm:$0xff] %v8054_v16  ;;  %v8067_v32 = vpop.f32.mrb[111].mxu1  ;;  %5381 = vmatmul.mubr.msk.f32.gmra.mrb[216].mxu1 %vm447_vm0, %v9998_v31  ;;  %v5746_v16 = vpack.c.bf16 %v2972_v37, %v2970_v63  ;;  %5745 = vmatprep.subr.bf16.mxu0 %v5744_v44  ;;  %v10106_v37 = vld [vmem:[#allocation7_spill] sm:$0xff] }
 0x1e8   : > { %10066 = vst [vmem:[#allocation40_spill] sm:$0xff] %v8067_v32  ;;  %5383 = vmatprep.mubr.msk.f32.mxu1 %vm447_vm0, %v10007_v48  ;;  %v2977_v48 = vld [vmem:[%s9767_s3 + $0x1f8] sm:$0xff] }
 0x1e9   : > { %3239 = vmatmul.mubr.f32.gmra.mrb[124].mxu0 %v2912_v15  ;;  %v5748_v44 = vpack.c.bf16 %v2977_v48, %v2975_v38  ;;  %v2913_v15 = vld [vmem:[%s7653_s18 + $0x78] sm:$0xff]  ;;  %v2979_v38 = vld [vmem:[%s9767_s3 + $0x208] sm:$0xff] }
 0x1ea   : > { %v8084_v31 = vpop.f32.mrb[112].mxu1  ;;  %5747 = vmatpush1.bf16.msra.mxu0 %v5746_v16  ;;  %3244 = vmatprep.mubr.f32.mxu0 %v9918_v1  ;;  %v2974_v16 = vld [vmem:[%s9767_s3 + $0x1e0] sm:$0xff]  ;;  %v2981_v48 = vld [vmem:[%s9767_s3 + $0x218] sm:$0xff] }
 0x1eb   : > { %10069 = vst [vmem:[#allocation44_spill] sm:$0xff] %v8084_v31  ;;  %v8097_v63 = vpop.f32.mrb[113].mxu1  ;;  %5384 = vmatmul.mubr.msk.f32.gmra.mrb[218].mxu1 %vm447_vm0, %v10016_v50  ;;  %v5750_v49 = vpack.c.bf16 %v2976_v30, %v2974_v16  ;;  %5749 = vmatprep.subr.bf16.mxu0 %v5748_v44 }
 0x1ec   : > { %10072 = vst [vmem:[#allocation105_spill] sm:$0xff] %v8097_v63  ;;  %5386 = vmatprep.mubr.msk.f32.mxu1 %vm447_vm0, %v10025_v18  ;;  %v5752_v18 = vpack.c.bf16 %v2981_v48, %v2979_v38  ;;  %v10105_v38 = vld [vmem:[#allocation82_spill] sm:$0xff] }
 0x1ed   : > { %3245 = vmatmul.mubr.f32.gmra.mrb[126].mxu0 %v2913_v15 }
 0x1ee   : > { %v8112_v50 = vpop.f32.mrb[114].mxu1  ;;  %5751 = vmatpush1.bf16.msra.mxu0 %v5750_v49  ;;  %v10102_v49 = vld [vmem:[#allocation5_spill] sm:$0xff] }
 0x1ef   : > { %10074 = vst [vmem:[#allocation106_spill] sm:$0xff] %v8112_v50  ;;  %v8122_v1 = vpop.f32.mrb[115].mxu1  ;;  %5387 = vmatmul.mubr.msk.f32.gmra.mrb[220].mxu1 %vm447_vm0, %v10034_v51  ;;  %5753 = vmatprep.subr.bf16.mxu0 %v5752_v18  ;;  %v10101_v51 = vld [vmem:[#allocation78_spill] sm:$0xff] }
 0x1f0   : > { %10076 = vst [vmem:[#allocation107_spill] sm:$0xff] %v8122_v1  ;;  %5389 = vmatprep.mubr.msk.f32.mxu1 %vm447_vm0, %v7451_v29 }
 0x1f2   : > { %v8130_v15 = vpop.f32.mrb[116].mxu1 }
 0x1f3   : > { %10078 = vst [vmem:[#allocation108_spill] sm:$0xff] %v8130_v15  ;;  %v8134_v31 = vpop.f32.mrb[117].mxu1  ;;  %5390 = vmatmul.mubr.msk.f32.gmra.mrb[222].mxu1 %vm447_vm0, %v7477_v26  ;;  %v10103_v15 = vld [vmem:[#allocation6_spill] sm:$0xff]  ;;  %v10107_v26 = vld [vmem:[#allocation8_spill] sm:$0xff] }
 0x1f4   : > { %10080 = vst [vmem:[#allocation109_spill] sm:$0xff] %v8134_v31 }
 0x1f6   : > { %v8140_v48 = vpop.f32.mrb[118].mxu1 }
 0x1f7   : > { %10082 = vst [vmem:[#allocation110_spill] sm:$0xff] %v8140_v48  ;;  %v8144_v29 = vpop.f32.mrb[119].mxu1 }
 0x1f8   : > { %10084 = vst [vmem:[#allocation111_spill] sm:$0xff] %v8144_v29 }
 0x1fa   : > { %v8148_v30 = vpop.f32.mrb[120].mxu1 }
 0x1fb   : > { %10086 = vst [vmem:[#allocation112_spill] sm:$0xff] %v8148_v30  ;;  %v8152_v44 = vpop.f32.mrb[121].mxu1 }
 0x1fc   : > { %10088 = vst [vmem:[#allocation113_spill] sm:$0xff] %v8152_v44 }
 0x1fe   : > { %v8156_v31 = vpop.f32.mrb[122].mxu1 }
 0x1ff   : > { %10090 = vst [vmem:[#allocation114_spill] sm:$0xff] %v8156_v31  ;;  %v8160_v48 = vpop.f32.mrb[123].mxu1 }
 0x200   : > { %10092 = vst [vmem:[#allocation115_spill] sm:$0xff] %v8160_v48 }
 0x202   : > { %v8164_v29 = vpop.f32.mrb[124].mxu1 }
 0x203   : > { %10094 = vst [vmem:[#allocation116_spill] sm:$0xff] %v8164_v29  ;;  %v8168_v30 = vpop.f32.mrb[125].mxu1 }
 0x204   : > { %10096 = vst [vmem:[#allocation117_spill] sm:$0xff] %v8168_v30 }
 0x206   : > { %v8172_v44 = vpop.f32.mrb[126].mxu1 }
 0x207   : > { %10098 = vst [vmem:[#allocation118_spill] sm:$0xff] %v8172_v44  ;;  %v8176_v31 = vpop.f32.mrb[127].mxu1 }
 0x208   : > { %10100 = vst [vmem:[#allocation119_spill] sm:$0xff] %v8176_v31  ;;  %v10109_v31 = vld [vmem:[#allocation86_spill] sm:$0xff] }
 0x20a   : > { %v5282_v48 = vpop.f32.mrb[128].mxu1 }
 0x20b   : > { %v1521_v50 = vmax.f32 %v10102_v49, %v5282_v48  ;;  %v1433_v24 = vpop.f32.mrb[129].mxu1 }
 0x20c   : > { %v1516_v29 = vmax.f32 %v10103_v15, %v1433_v24  ;;  %v10110_v24 = vld [vmem:[#allocation9_spill] sm:$0xff] }
 0x20d   : > { %v8183_v18 = vmax.f32 %v1521_v50, %v7439_v20  ;;  %v10111_v50 = vld [vmem:[#allocation10_spill] sm:$0xff] }
 0x20e   : > { %v8186_v30 = vmax.f32 %v1516_v29, %v10105_v38  ;;  %v5285_v16 = vpop.f32.mrb[130].mxu1 }
 0x20f   : > { %10104 = vst [vmem:[#allocation78_spill] sm:$0xff] %v8183_v18  ;;  %v1531_v63 = vmax.f32 %v10106_v37, %v5285_v16  ;;  %v1443_v44 = vpop.f32.mrb[131].mxu1 }
 0x210   : > { %v1526_v32 = vmax.f32 %v10107_v26, %v1443_v44  ;;  %v10112_v44 = vld [vmem:[#allocation11_spill] sm:$0xff] }
 0x211   : > { %v8191_v1 = vmax.f32 %v1531_v63, %v10108_v12  ;;  %v10113_v63 = vld [vmem:[#allocation12_spill] sm:$0xff] }
 0x212   : > { %v8194_v49 = vmax.f32 %v1526_v32, %v10109_v31  ;;  %v5288_v48 = vpop.f32.mrb[132].mxu1 }
 0x213   : > { %v1541_v15 = vmax.f32 %v10110_v24, %v5288_v48  ;;  %v1453_v20 = vpop.f32.mrb[133].mxu1  ;;  %v10114_v24 = vld [vmem:[#allocation13_spill] sm:$0xff] }
 0x214   : > { %v1536_v18 = vmax.f32 %v10111_v50, %v1453_v20 }
 0x215   : > { %v8199_v38 = vmax.f32 %v1541_v15, %v7489_v3  ;;  %v10115_v15 = vld [vmem:[#allocation14_spill] sm:$0xff] }
 0x216   : > { %v8202_v37 = vmax.f32 %v1536_v18, %v7494_v9  ;;  %v5291_v16 = vpop.f32.mrb[134].mxu1 }
 0x217   : > { %v1551_v29 = vmax.f32 %v10112_v44, %v5291_v16  ;;  %v1463_v12 = vpop.f32.mrb[135].mxu1  ;;  %v10116_v44 = vld [vmem:[#allocation15_spill] sm:$0xff] }
 0x218   : > { %v1546_v26 = vmax.f32 %v10113_v63, %v1463_v12 }
 0x219   : > { %v8207_v32 = vmax.f32 %v1551_v29, %v7507_v22  ;;  %v10117_v29 = vld [vmem:[#allocation16_spill] sm:$0xff] }
 0x21a   : > { %v8210_v31 = vmax.f32 %v1546_v26, %v7513_v34  ;;  %v5294_v48 = vpop.f32.mrb[136].mxu1 }
 0x21b   : > { %v1561_v20 = vmax.f32 %v10114_v24, %v5294_v48  ;;  %v1473_v3 = vpop.f32.mrb[137].mxu1  ;;  %v10118_v24 = vld [vmem:[#allocation19_spill] sm:$0xff] }
 0x21c   : > { %v1556_v50 = vmax.f32 %v10115_v15, %v1473_v3 }
 0x21d   : > { %v8215_v9 = vmax.f32 %v1561_v20, %v7536_v52  ;;  %v10119_v20 = vld [vmem:[#allocation20_spill] sm:$0xff] }
 0x21e   : > { %v8218_v18 = vmax.f32 %v1556_v50, %v7541_v39  ;;  %v5297_v16 = vpop.f32.mrb[138].mxu1 }
 0x21f   : > { %v1571_v12 = vmax.f32 %v10116_v44, %v5297_v16  ;;  %v1483_v22 = vpop.f32.mrb[139].mxu1  ;;  %v10120_v44 = vld [vmem:[#allocation23_spill] sm:$0xff] }
 0x220   : > { %v1566_v63 = vmax.f32 %v10117_v29, %v1483_v22 }
 0x221   : > { %v8223_v34 = vmax.f32 %v1571_v12, %v7553_v59  ;;  %v10121_v12 = vld [vmem:[#allocation24_spill] sm:$0xff] }
 0x222   : > { %v8226_v26 = vmax.f32 %v1566_v63, %v7558_v53  ;;  %v5300_v48 = vpop.f32.mrb[140].mxu1 }
 0x223   : > { %v1581_v3 = vmax.f32 %v10118_v24, %v5300_v48  ;;  %v1493_v52 = vpop.f32.mrb[141].mxu1 }
 0x224   : > { %v1576_v15 = vmax.f32 %v10119_v20, %v1493_v52 }
 0x225   : > { %v8231_v39 = vmax.f32 %v1581_v3, %v7580_v23  ;;  %v10123_v23 = vmax.f32 %v10033_v25, %v7846_v13  ;;  %v10124_v3 = vmax.f32 %v10035_v17, %v7859_v57  ;;  %v10126_v25 = vmax.f32 %v10039_v62, %v7888_v11  ;;  %v10157_v57 = vld [vmem:[#allocation44_spill] sm:$0xff] }
 0x226   : > { %v8234_v50 = vmax.f32 %v1576_v15, %v7587_v7  ;;  %v5303_v16 = vpop.f32.mrb[142].mxu1  ;;  %v10125_v15 = vmax.f32 %v10038_v41, %v7875_v46  ;;  %v10128_v41 = vmax.f32 %v10043_v27, %v7917_v54 }
 0x227   : > { %v1591_v22 = vmax.f32 %v10120_v44, %v5303_v16  ;;  %v1503_v59 = vpop.f32.mrb[143].mxu1 }
 0x228   : > { %v1586_v29 = vmax.f32 %v10121_v12, %v1503_v59  ;;  %v10127_v59 = vmax.f32 %v10042_v2, %v7904_v61  ;;  %v10130_v2 = vmax.f32 %v10047_v42, %v7947_v0  ;;  %v10133_v42 = vld [vmem:[#allocation51_spill] sm:$0xff] }
 0x229   : > { %v8239_v53 = vmax.f32 %v1591_v22, %v7600_v21  ;;  %v10142_v0 = vld [vmem:[#allocation35_spill] sm:$0xff] }
 0x22a   : > { %v8242_v63 = vmax.f32 %v1586_v29, %v7608_v55  ;;  %v1885_v48 = vpop.f32.mrb[144].mxu1 }
 0x22b   : > { %v8247_v24 = vmax.f32 %v10123_v23, %v1885_v48  ;;  %v1887_v7 = vpop.f32.mrb[145].mxu1  ;;  %v10129_v23 = vmax.f32 %v10046_v40, %v7934_v35  ;;  %v10132_v40 = vmax.f32 %v10051_v56, %v7977_v45  ;;  %v10139_v56 = vld [vmem:[#allocation22_spill] sm:$0xff]  ;;  %v10147_v45 = vld [vmem:[#allocation45_spill] sm:$0xff] }
 0x22c   : > { %10122 = vst [vmem:[#allocation5_spill] sm:$0xff] %v8242_v63  ;;  %v8252_v52 = vmax.f32 %v10124_v3, %v1887_v7 }
 0x22e   : > { %v1891_v55 = vpop.f32.mrb[146].mxu1 }
 0x22f   : > { %v8261_v16 = vmax.f32 %v10125_v15, %v1891_v55  ;;  %v1893_v13 = vpop.f32.mrb[147].mxu1  ;;  %v10131_v15 = vmax.f32 %v10050_v8, %v7964_v60  ;;  %v10138_v8 = vmax.f32 %v10056_v4, %v8007_v43  ;;  %v10145_v4 = vld [vmem:[#allocation73_spill] sm:$0xff] }
 0x230   : > { %v8266_v44 = vmax.f32 %v10126_v25, %v1893_v13 }
 0x232   : > { %v1897_v22 = vpop.f32.mrb[148].mxu1 }
 0x233   : > { %v8275_v12 = vmax.f32 %v10127_v59, %v1897_v22  ;;  %v1899_v46 = vpop.f32.mrb[149].mxu1  ;;  %v10134_v22 = vld [vmem:[#allocation21_spill] sm:$0xff] }
 0x234   : > { %v8280_v29 = vmax.f32 %v10128_v41, %v1899_v46  ;;  %v10135_v41 = vld [vmem:[#allocation41_spill] sm:$0xff] }
 0x236   : > { %v1903_v48 = vpop.f32.mrb[150].mxu1 }
 0x237   : > { %v8289_v7 = vmax.f32 %v10129_v23, %v1903_v48  ;;  %v1905_v61 = vpop.f32.mrb[151].mxu1  ;;  %v10136_v48 = vld [vmem:[#allocation32_spill] sm:$0xff] }
 0x238   : > { %v8294_v3 = vmax.f32 %v10130_v2, %v1905_v61  ;;  %v10137_v23 = vmax.f32 %v10135_v41, %v10136_v48  ;;  %v10144_v41 = vmax.f32 %v10061_v10, %v8037_v6  ;;  %v10167_v10 = vld [vmem:[#allocation106_spill] sm:$0xff] }
 0x23a   : > { %v1909_v55 = vpop.f32.mrb[152].mxu1 }
 0x23b   : > { %v8303_v13 = vmax.f32 %v10131_v15, %v1909_v55  ;;  %v1911_v35 = vpop.f32.mrb[153].mxu1  ;;  %v10140_v55 = vld [vmem:[#allocation56_spill] sm:$0xff]  ;;  %v10148_v15 = vld [vmem:[#allocation38_spill] sm:$0xff] }
 0x23c   : > { %v8308_v25 = vmax.f32 %v10132_v40, %v1911_v35  ;;  %v10141_v40 = vld [vmem:[#allocation43_spill] sm:$0xff]  ;;  %v10149_v54 = vmax.f32 %v10147_v45, %v10148_v15  ;;  %v10160_v45 = vld [vmem:[#allocation50_spill] sm:$0xff]  ;;  %v10161_v15 = vld [vmem:[#allocation105_spill] sm:$0xff] }
 0x23d   : > { %v10143_v59 = vmax.f32 %v10141_v40, %v10142_v0 }
 0x23e   : > { %v1915_v46 = vpop.f32.mrb[154].mxu1 }
 0x23f   : > { %v8317_v61 = vmax.f32 %v10137_v23, %v1915_v46  ;;  %v1917_v60 = vpop.f32.mrb[155].mxu1  ;;  %v10146_v23 = vld [vmem:[#allocation59_spill] sm:$0xff] }
 0x240   : > { %v8322_v2 = vmax.f32 %v10138_v8, %v1917_v60  ;;  %v10156_v60 = vld [vmem:[#allocation49_spill] sm:$0xff] }
 0x241   : > { %v10158_v17 = vmax.f32 %v10156_v60, %v10157_v57 }
 0x242   : > { %v1921_v35 = vpop.f32.mrb[156].mxu1 }
 0x243   : > { %v8331_v27 = vmax.f32 %v10143_v59, %v1921_v35  ;;  %v1923_v46 = vpop.f32.mrb[157].mxu1  ;;  %v10151_v59 = vld [vmem:[#allocation46_spill] sm:$0xff]  ;;  %v10152_v35 = vld [vmem:[#allocation40_spill] sm:$0xff] }
 0x244   : > { %v8336_v48 = vmax.f32 %v10144_v41, %v1923_v46  ;;  %v10153_v40 = vmax.f32 %v10151_v59, %v10152_v35  ;;  %v10166_v41 = vld [vmem:[#allocation53_spill] sm:$0xff] }
 0x246   : > { %v1927_v8 = vpop.f32.mrb[158].mxu1 }
 0x247   : > { %v8345_v62 = vmax.f32 %v10149_v54, %v1927_v8  ;;  %v1929_v0 = vpop.f32.mrb[159].mxu1  ;;  %v10162_v8 = vmax.f32 %v10160_v45, %v10161_v15 }
 0x248   : > { %v8350_v11 = vmax.f32 %v10153_v40, %v1929_v0  ;;  %v10176_v40 = vld [vmem:[#allocation57_spill] sm:$0xff]  ;;  %v10177_v0 = vld [vmem:[#allocation108_spill] sm:$0xff] }
 0x249   : > { %10150 = vst [vmem:[#allocation6_spill] sm:$0xff] %v8345_v62  ;;  %v10168_v62 = vmax.f32 %v10166_v41, %v10167_v10  ;;  %v10180_v10 = vld [vmem:[#allocation58_spill] sm:$0xff] }
 0x24a   : > { %v1933_v43 = vpop.f32.mrb[160].mxu1 }
 0x24b   : > { %v8359_v20 = vmax.f32 %v10158_v17, %v1933_v43  ;;  %v1935_v54 = vpop.f32.mrb[161].mxu1  ;;  %v10170_v17 = vld [vmem:[#allocation54_spill] sm:$0xff]  ;;  %v10171_v43 = vld [vmem:[#allocation107_spill] sm:$0xff] }
 0x24c   : > { %v8364_v21 = vmax.f32 %v10162_v8, %v1935_v54  ;;  %v10172_v60 = vmax.f32 %v10170_v17, %v10171_v43  ;;  %v10186_v8 = vld [vmem:[#allocation61_spill] sm:$0xff]  ;;  %v10187_v54 = vld [vmem:[#allocation110_spill] sm:$0xff] }
 0x24d   : > { %10159 = vst [vmem:[#allocation82_spill] sm:$0xff] %v8359_v20  ;;  %v10178_v20 = vmax.f32 %v10176_v40, %v10177_v0  ;;  %v10190_v0 = vld [vmem:[#allocation62_spill] sm:$0xff] }
 0x24e   : > { %10163 = vst [vmem:[#allocation7_spill] sm:$0xff] %v8364_v21  ;;  %v1939_v6 = vpop.f32.mrb[162].mxu1 }
 0x24f   : > { %v8373_v63 = vmax.f32 %v10168_v62, %v1939_v6  ;;  %v1941_v57 = vpop.f32.mrb[163].mxu1  ;;  %v10181_v6 = vld [vmem:[#allocation109_spill] sm:$0xff] }
 0x250   : > { %v8378_v46 = vmax.f32 %v10172_v60, %v1941_v57  ;;  %v10182_v41 = vmax.f32 %v10180_v10, %v10181_v6  ;;  %v10196_v60 = vld [vmem:[#allocation66_spill] sm:$0xff]  ;;  %v10197_v57 = vld [vmem:[#allocation112_spill] sm:$0xff] }
 0x251   : > { %10169 = vst [vmem:[#allocation8_spill] sm:$0xff] %v8373_v63  ;;  %v10188_v63 = vmax.f32 %v10186_v8, %v10187_v54  ;;  %v10200_v54 = vld [vmem:[#allocation67_spill] sm:$0xff] }
 0x252   : > { %10173 = vst [vmem:[#allocation84_spill] sm:$0xff] %v8378_v46  ;;  %v1945_v59 = vpop.f32.mrb[164].mxu1 }
 0x253   : > { %v8387_v35 = vmax.f32 %v10178_v20, %v1945_v59  ;;  %v1947_v62 = vpop.f32.mrb[165].mxu1  ;;  %v10191_v59 = vld [vmem:[#allocation111_spill] sm:$0xff] }
 0x254   : > { %v8392_v21 = vmax.f32 %v10182_v41, %v1947_v62  ;;  %v10192_v40 = vmax.f32 %v10190_v0, %v10191_v59  ;;  %v10206_v41 = vld [vmem:[#allocation71_spill] sm:$0xff]  ;;  %v10207_v62 = vld [vmem:[#allocation114_spill] sm:$0xff] }
 0x255   : > { %10179 = vst [vmem:[#allocation86_spill] sm:$0xff] %v8387_v35  ;;  %v10198_v35 = vmax.f32 %v10196_v60, %v10197_v57  ;;  %v10210_v57 = vld [vmem:[#allocation72_spill] sm:$0xff] }
 0x256   : > { %10183 = vst [vmem:[#allocation9_spill] sm:$0xff] %v8392_v21  ;;  %v1951_v45 = vpop.f32.mrb[166].mxu1 }
 0x257   : > { %v8401_v15 = vmax.f32 %v10188_v63, %v1951_v45  ;;  %v1953_v20 = vpop.f32.mrb[167].mxu1  ;;  %v10201_v45 = vld [vmem:[#allocation113_spill] sm:$0xff] }
 0x258   : > { %v8406_v46 = vmax.f32 %v10192_v40, %v1953_v20  ;;  %v10202_v8 = vmax.f32 %v10200_v54, %v10201_v45  ;;  %v10215_v40 = vld [vmem:[#allocation74_spill] sm:$0xff]  ;;  %v10216_v20 = vld [vmem:[#allocation116_spill] sm:$0xff] }
 0x259   : > { %10189 = vst [vmem:[#allocation10_spill] sm:$0xff] %v8401_v15  ;;  %v10208_v15 = vmax.f32 %v10206_v41, %v10207_v62  ;;  %v10219_v62 = vld [vmem:[#allocation75_spill] sm:$0xff] }
 0x25a   : > { %10193 = vst [vmem:[#allocation11_spill] sm:$0xff] %v8406_v46  ;;  %v1957_v17 = vpop.f32.mrb[168].mxu1 }
 0x25b   : > { %v8415_v43 = vmax.f32 %v10198_v35, %v1957_v17  ;;  %v1959_v63 = vpop.f32.mrb[169].mxu1  ;;  %v10211_v17 = vld [vmem:[#allocation115_spill] sm:$0xff] }
 0x25c   : > { %v8420_v21 = vmax.f32 %v10202_v8, %v1959_v63  ;;  %v10212_v60 = vmax.f32 %v10210_v57, %v10211_v17  ;;  %v10225_v8 = vld [vmem:[#allocation77_spill] sm:$0xff]  ;;  %v10226_v63 = vld [vmem:[#allocation118_spill] sm:$0xff] }
 0x25d   : > { %10199 = vst [vmem:[#allocation12_spill] sm:$0xff] %v8415_v43  ;;  %v10217_v43 = vmax.f32 %v10215_v40, %v10216_v20  ;;  %v10229_v20 = vld [vmem:[#allocation119_spill] sm:$0xff] }
 0x25e   : > { %10203 = vst [vmem:[#allocation13_spill] sm:$0xff] %v8420_v21  ;;  %v1963_v10 = vpop.f32.mrb[170].mxu1 }
 0x25f   : > { %v8429_v6 = vmax.f32 %v10208_v15, %v1963_v10  ;;  %v1965_v35 = vpop.f32.mrb[171].mxu1  ;;  %v10220_v10 = vld [vmem:[#allocation117_spill] sm:$0xff] }
 0x260   : > { %v8434_v46 = vmax.f32 %v10212_v60, %v1965_v35  ;;  %v10221_v41 = vmax.f32 %v10219_v62, %v10220_v10  ;;  %v10234_v60 = vld [vmem:[#allocation81_spill] sm:$0xff]  ;;  %v10237_v10 = vld [vmem:[#allocation87_spill] sm:$0xff] }
 0x261   : > { %10209 = vst [vmem:[#allocation14_spill] sm:$0xff] %v8429_v6  ;;  %v10227_v6 = vmax.f32 %v10225_v8, %v10226_v63  ;;  %v10235_v63 = vld [vmem:[#allocation83_spill] sm:$0xff]  ;;  %v2983_v8 = vld [vmem:[%s9767_s3 + $0x228] sm:$0xff]  ;;  %v10236_v62 = vld [vmem:[#allocation85_spill] sm:$0xff] }
 0x262   : > { %v1969_v0 = vpop.f32.mrb[172].mxu1 }
 0x263   : > { %v8443_v59 = vmax.f32 %v10217_v43, %v1969_v0  ;;  %v1971_v15 = vpop.f32.mrb[173].mxu1  ;;  %v10230_v0 = vmax.f32 %v10101_v51, %v10229_v20  ;;  %v2980_v51 = vld [vmem:[%s9767_s3 + $0x210] sm:$0xff] }
 0x264   : > { %v8448_v21 = vmax.f32 %v10221_v41, %v1971_v15 }
 0x265   : > { %10218 = vst [vmem:[#allocation15_spill] sm:$0xff] %v8443_v59 }
 0x266   : > { %10222 = vst [vmem:[#allocation16_spill] sm:$0xff] %v8448_v21  ;;  %v1975_v54 = vpop.f32.mrb[174].mxu1  ;;  %v10239_v21 = vld [vmem:[#allocation89_spill] sm:$0xff] }
 0x267   : > { %v8457_v45 = vmax.f32 %v10227_v6, %v1975_v54  ;;  %v1977_v43 = vpop.f32.mrb[175].mxu1  ;;  %v2978_v6 = vld [vmem:[%s9767_s3 + $0x200] sm:$0xff] }
 0x268   : > { %v8462_v40 = vmax.f32 %v10230_v0, %v1977_v43  ;;  %v2985_v43 = vld [vmem:[%s9767_s3 + $0x238] sm:$0xff]  ;;  %v5754_v20 = vpack.c.bf16 %v2980_v51, %v2978_v6  ;;  %v2987_v6 = vld [vmem:[%s9767_s3 + $0x248] sm:$0xff] }
 0x269   : > { %10228 = vst [vmem:[#allocation19_spill] sm:$0xff] %v8457_v45  ;;  %v5756_v45 = vpack.c.bf16 %v2985_v43, %v2983_v8  ;;  %v10238_v43 = vld [vmem:[#allocation88_spill] sm:$0xff] }
 0x26a   : > { %10231 = vst [vmem:[#allocation20_spill] sm:$0xff] %v8462_v40  ;;  %v2337_v57 = vpop.f32.mrb[176].mxu1 }
 0x26b   : > { %v2738_v35 = vmax.f32 %v10234_v60, %v2337_v57  ;;  %v2339_v59 = vpop.f32.mrb[177].mxu1 }
 0x26c   : > { %v2739_v54 = vmax.f32 %v10235_v63, %v2339_v59  ;;  %v2982_v59 = vld [vmem:[%s9767_s3 + $0x220] sm:$0xff]  ;;  %v2984_v63 = vld [vmem:[%s9767_s3 + $0x230] sm:$0xff] }
 0x26d   : > { %v2818_v0 = vmax.f32 %v2738_v35, 0.0  ;;  %v2989_v35 = vld [vmem:[%s9767_s3 + $0x258] sm:$0xff] }
 0x26e   : > { %v2819_v57 = vmax.f32 %v2739_v54, 0.0  ;;  %v2343_v60 = vpop.f32.mrb[178].mxu1  ;;  %v5758_v54 = vpack.c.bf16 %v2984_v63, %v2982_v59 }
 0x26f   : > { %v2743_v41 = vmax.f32 %v10236_v62, %v2343_v60  ;;  %v2345_v15 = vpop.f32.mrb[179].mxu1 }
 0x270   : > { %v2744_v40 = vmax.f32 %v10237_v10, %v2345_v15  ;;  %3364 = vmatprep.mubr.f32.mxu0 %v2819_v57  ;;  %v5760_v15 = vpack.c.bf16 %v2989_v35, %v2987_v6  ;;  %v2986_v10 = vld [vmem:[%s9767_s3 + $0x240] sm:$0xff]  ;;  %v2988_v57 = vld [vmem:[%s9767_s3 + $0x250] sm:$0xff]  ;;  %v10240_v6 = vld [vmem:[#allocation90_spill] sm:$0xff] }
 0x271   : > { %3365 = vmatmul.mubr.f32.vlgmr.msra.gmra.mrb[96].mxu0 %v2818_v0  ;;  %v2823_v8 = vmax.f32 %v2743_v41, 0.0  ;;  %v5762_v59 = vpack.c.bf16 %v2988_v57, %v2986_v10 }
 0x272   : > { %v2824_v62 = vmax.f32 %v2744_v40, 0.0  ;;  %v2349_v51 = vpop.f32.mrb[180].mxu1  ;;  %5755 = vmatpush1.bf16.msra.mxu0 %v5754_v20  ;;  %v2991_v40 = vld [vmem:[%s9767_s3 + $0x268] sm:$0xff] }
 0x273   : > { %v2748_v60 = vmax.f32 %v10238_v43, %v2349_v51  ;;  %v2351_v17 = vpop.f32.mrb[181].mxu1  ;;  %5757 = vmatprep.subr.bf16.mxu0 %v5756_v45  ;;  %v2993_v45 = vld [vmem:[%s9767_s3 + $0x278] sm:$0xff]  ;;  %v10241_v43 = vld [vmem:[#allocation91_spill] sm:$0xff] }
 0x274   : > { %v2749_v0 = vmax.f32 %v10239_v21, %v2351_v17  ;;  %3370 = vmatprep.mubr.f32.mxu0 %v2824_v62  ;;  %v5764_v21 = vpack.c.bf16 %v2993_v45, %v2991_v40  ;;  %v2990_v17 = vld [vmem:[%s9767_s3 + $0x260] sm:$0xff]  ;;  %v2992_v62 = vld [vmem:[%s9767_s3 + $0x270] sm:$0xff]  ;;  %v10242_v40 = vld [vmem:[#allocation92_spill] sm:$0xff] }
 0x275   : > { %3371 = vmatmul.mubr.f32.gmra.mrb[98].mxu0 %v2823_v8  ;;  %v2828_v63 = vmax.f32 %v2748_v60, 0.0  ;;  %v2997_v60 = vld [vmem:[%s9767_s3 + $0x298] sm:$0xff]  ;;  %v5766_v57 = vpack.c.bf16 %v2992_v62, %v2990_v17 }
 0x276   : > { %v2829_v41 = vmax.f32 %v2749_v0, 0.0  ;;  %v2355_v20 = vpop.f32.mrb[182].mxu1  ;;  %5759 = vmatpush1.bf16.msra.mxu0 %v5758_v54  ;;  %v2995_v54 = vld [vmem:[%s9767_s3 + $0x288] sm:$0xff] }
 0x277   : > { %v2753_v35 = vmax.f32 %v10240_v6, %v2355_v20  ;;  %v2357_v51 = vpop.f32.mrb[183].mxu1  ;;  %5761 = vmatprep.subr.bf16.mxu0 %v5760_v15  ;;  %v5768_v6 = vpack.c.bf16 %v2997_v60, %v2995_v54  ;;  %v10244_v54 = vld [vmem:[#allocation94_spill] sm:$0xff] }
 0x278   : > { %v2754_v8 = vmax.f32 %v10241_v43, %v2357_v51  ;;  %3376 = vmatprep.mubr.f32.mxu0 %v2829_v41  ;;  %v2994_v41 = vld [vmem:[%s9767_s3 + $0x280] sm:$0xff]  ;;  %v2996_v51 = vld [vmem:[%s9767_s3 + $0x290] sm:$0xff] }
 0x279   : > { %3377 = vmatmul.mubr.f32.gmra.mrb[100].mxu0 %v2828_v63  ;;  %v2833_v0 = vmax.f32 %v2753_v35, 0.0  ;;  %v10243_v43 = vld [vmem:[#allocation93_spill] sm:$0xff]  ;;  %v3001_v35 = vld [vmem:[%s9767_s3 + $0x2b8] sm:$0xff]  ;;  %v5770_v62 = vpack.c.bf16 %v2996_v51, %v2994_v41 }
 0x27a   : > { %v2834_v15 = vmax.f32 %v2754_v8, 0.0  ;;  %v2361_v10 = vpop.f32.mrb[184].mxu1  ;;  %5763 = vmatpush1.bf16.msra.mxu0 %v5762_v59  ;;  %v2999_v59 = vld [vmem:[%s9767_s3 + $0x2a8] sm:$0xff] }
 0x27b   : > { %v2758_v45 = vmax.f32 %v10242_v40, %v2361_v10  ;;  %v2363_v20 = vpop.f32.mrb[185].mxu1  ;;  %5765 = vmatprep.subr.bf16.mxu0 %v5764_v21  ;;  %v5772_v40 = vpack.c.bf16 %v3001_v35, %v2999_v59  ;;  %v10246_v59 = vld [vmem:[#allocation96_spill] sm:$0xff] }
 0x27c   : > { %v2759_v63 = vmax.f32 %v10243_v43, %v2363_v20  ;;  %3382 = vmatprep.mubr.f32.mxu0 %v2834_v15  ;;  %v2998_v15 = vld [vmem:[%s9767_s3 + $0x2a0] sm:$0xff]  ;;  %v3000_v20 = vld [vmem:[%s9767_s3 + $0x2b0] sm:$0xff] }
 0x27d   : > { %3383 = vmatmul.mubr.f32.gmra.mrb[102].mxu0 %v2833_v0  ;;  %v2838_v8 = vmax.f32 %v2758_v45, 0.0  ;;  %v10245_v43 = vld [vmem:[#allocation95_spill] sm:$0xff]  ;;  %v3005_v45 = vld [vmem:[%s9767_s3 + $0x2d8] sm:$0xff]  ;;  %v5774_v51 = vpack.c.bf16 %v3000_v20, %v2998_v15 }
 0x27e   : > { %v2839_v21 = vmax.f32 %v2759_v63, 0.0  ;;  %v2367_v17 = vpop.f32.mrb[186].mxu1  ;;  %5767 = vmatpush1.bf16.msra.mxu0 %v5766_v57  ;;  %v3003_v57 = vld [vmem:[%s9767_s3 + $0x2c8] sm:$0xff] }
 0x27f   : > { %v2763_v60 = vmax.f32 %v10244_v54, %v2367_v17  ;;  %v2369_v10 = vpop.f32.mrb[187].mxu1  ;;  %5769 = vmatprep.subr.bf16.mxu0 %v5768_v6  ;;  %v5776_v54 = vpack.c.bf16 %v3005_v45, %v3003_v57  ;;  %v10248_v57 = vld [vmem:[#allocation98_spill] sm:$0xff] }
 0x280   : > { %v2764_v0 = vmax.f32 %v10245_v43, %v2369_v10  ;;  %3388 = vmatprep.mubr.f32.mxu0 %v2839_v21  ;;  %v3002_v21 = vld [vmem:[%s9767_s3 + $0x2c0] sm:$0xff]  ;;  %v3004_v10 = vld [vmem:[%s9767_s3 + $0x2d0] sm:$0xff] }
 0x281   : > { %3389 = vmatmul.mubr.f32.gmra.mrb[104].mxu0 %v2838_v8  ;;  %v2843_v63 = vmax.f32 %v2763_v60, 0.0  ;;  %v10247_v43 = vld [vmem:[#allocation97_spill] sm:$0xff]  ;;  %v3009_v60 = vld [vmem:[%s9767_s3 + $0x2f8] sm:$0xff]  ;;  %v5778_v20 = vpack.c.bf16 %v3004_v10, %v3002_v21 }
 0x282   : > { %v2844_v6 = vmax.f32 %v2764_v0, 0.0  ;;  %v2373_v41 = vpop.f32.mrb[188].mxu1  ;;  %5771 = vmatpush1.bf16.msra.mxu0 %v5770_v62  ;;  %v3007_v62 = vld [vmem:[%s9767_s3 + $0x2e8] sm:$0xff] }
 0x283   : > { %v2768_v35 = vmax.f32 %v10246_v59, %v2373_v41  ;;  %v2375_v17 = vpop.f32.mrb[189].mxu1  ;;  %5773 = vmatprep.subr.bf16.mxu0 %v5772_v40  ;;  %v5780_v59 = vpack.c.bf16 %v3009_v60, %v3007_v62  ;;  %v10250_v62 = vld [vmem:[#allocation100_spill] sm:$0xff] }
 0x284   : > { %v2769_v8 = vmax.f32 %v10247_v43, %v2375_v17  ;;  %3394 = vmatprep.mubr.f32.mxu0 %v2844_v6  ;;  %v3006_v6 = vld [vmem:[%s9767_s3 + $0x2e0] sm:$0xff]  ;;  %v3008_v17 = vld [vmem:[%s9767_s3 + $0x2f0] sm:$0xff] }
 0x285   : > { %3395 = vmatmul.mubr.f32.gmra.mrb[106].mxu0 %v2843_v63  ;;  %v2848_v0 = vmax.f32 %v2768_v35, 0.0  ;;  %v10249_v43 = vld [vmem:[#allocation99_spill] sm:$0xff]  ;;  %v3013_v35 = vld [vmem:[%s9767_s3 + $0x318] sm:$0xff]  ;;  %v5782_v10 = vpack.c.bf16 %v3008_v17, %v3006_v6 }
 0x286   : > { %v2849_v40 = vmax.f32 %v2769_v8, 0.0  ;;  %v2379_v15 = vpop.f32.mrb[190].mxu1  ;;  %5775 = vmatpush1.bf16.msra.mxu0 %v5774_v51  ;;  %v3011_v51 = vld [vmem:[%s9767_s3 + $0x308] sm:$0xff] }
 0x287   : > { %v2773_v45 = vmax.f32 %v10248_v57, %v2379_v15  ;;  %v2381_v41 = vpop.f32.mrb[191].mxu1  ;;  %5777 = vmatprep.subr.bf16.mxu0 %v5776_v54  ;;  %v5784_v57 = vpack.c.bf16 %v3013_v35, %v3011_v51  ;;  %v10252_v51 = vld [vmem:[#allocation102_spill] sm:$0xff] }
 0x288   : > { %v2774_v63 = vmax.f32 %v10249_v43, %v2381_v41  ;;  %3400 = vmatprep.mubr.f32.mxu0 %v2849_v40  ;;  %v3010_v40 = vld [vmem:[%s9767_s3 + $0x300] sm:$0xff]  ;;  %v3012_v41 = vld [vmem:[%s9767_s3 + $0x310] sm:$0xff] }
 0x289   : > { %3401 = vmatmul.mubr.f32.gmra.mrb[108].mxu0 %v2848_v0  ;;  %v2853_v8 = vmax.f32 %v2773_v45, 0.0  ;;  %v10251_v43 = vld [vmem:[#allocation101_spill] sm:$0xff]  ;;  %v3017_v45 = vld [vmem:[%s9767_s3 + $0x338] sm:$0xff]  ;;  %v5786_v17 = vpack.c.bf16 %v3012_v41, %v3010_v40 }
 0x28a   : > { %v2854_v54 = vmax.f32 %v2774_v63, 0.0  ;;  %v2385_v21 = vpop.f32.mrb[192].mxu1  ;;  %5779 = vmatpush1.bf16.msra.mxu0 %v5778_v20  ;;  %v3015_v20 = vld [vmem:[%s9767_s3 + $0x328] sm:$0xff] }
 0x28b   : > { %v2778_v60 = vmax.f32 %v10250_v62, %v2385_v21  ;;  %v2387_v15 = vpop.f32.mrb[193].mxu1  ;;  %5781 = vmatprep.subr.bf16.mxu0 %v5780_v59  ;;  %v5788_v62 = vpack.c.bf16 %v3017_v45, %v3015_v20  ;;  %v10254_v20 = vld [vmem:[#allocation47_spill] sm:$0xff] }
 0x28c   : > { %v2779_v0 = vmax.f32 %v10251_v43, %v2387_v15  ;;  %3406 = vmatprep.mubr.f32.mxu0 %v2854_v54  ;;  %v3014_v54 = vld [vmem:[%s9767_s3 + $0x320] sm:$0xff]  ;;  %v3016_v15 = vld [vmem:[%s9767_s3 + $0x330] sm:$0xff] }
 0x28d   : > { %3407 = vmatmul.mubr.f32.gmra.mrb[110].mxu0 %v2853_v8  ;;  %v2858_v63 = vmax.f32 %v2778_v60, 0.0  ;;  %v10253_v43 = vld [vmem:[#allocation103_spill] sm:$0xff]  ;;  %v3021_v60 = vld [vmem:[%s9767_s3 + $0x358] sm:$0xff]  ;;  %v5790_v41 = vpack.c.bf16 %v3016_v15, %v3014_v54 }
 0x28e   : > { %v2859_v59 = vmax.f32 %v2779_v0, 0.0  ;;  %v2391_v6 = vpop.f32.mrb[194].mxu1  ;;  %5783 = vmatpush1.bf16.msra.mxu0 %v5782_v10  ;;  %v3019_v10 = vld [vmem:[%s9767_s3 + $0x348] sm:$0xff] }
 0x28f   : > { %v2783_v35 = vmax.f32 %v10252_v51, %v2391_v6  ;;  %v2393_v21 = vpop.f32.mrb[195].mxu1  ;;  %5785 = vmatprep.subr.bf16.mxu0 %v5784_v57  ;;  %v5792_v51 = vpack.c.bf16 %v3021_v60, %v3019_v10  ;;  %v10256_v10 = vld [vmem:[#allocation17_spill] sm:$0xff] }
 0x290   : > { %v2784_v8 = vmax.f32 %v10253_v43, %v2393_v21  ;;  %3412 = vmatprep.mubr.f32.mxu0 %v2859_v59  ;;  %v3018_v59 = vld [vmem:[%s9767_s3 + $0x340] sm:$0xff]  ;;  %v3020_v21 = vld [vmem:[%s9767_s3 + $0x350] sm:$0xff]  ;;  %v10255_v43 = vld [vmem:[#allocation48_spill] sm:$0xff] }
 0x291   : > { %3413 = vmatmul.mubr.f32.gmra.mrb[112].mxu0 %v2858_v63  ;;  %v2863_v0 = vmax.f32 %v2783_v35, 0.0  ;;  %v3025_v35 = vld [vmem:[%s9767_s3 + $0x378] sm:$0xff]  ;;  %v5794_v15 = vpack.c.bf16 %v3020_v21, %v3018_v59 }
 0x292   : > { %v2864_v57 = vmax.f32 %v2784_v8, 0.0  ;;  %v2397_v40 = vpop.f32.mrb[196].mxu1  ;;  %5787 = vmatpush1.bf16.msra.mxu0 %v5786_v17  ;;  %v3023_v17 = vld [vmem:[%s9767_s3 + $0x368] sm:$0xff] }
 0x293   : > { %v2788_v45 = vmax.f32 %v10254_v20, %v2397_v40  ;;  %v2399_v6 = vpop.f32.mrb[197].mxu1  ;;  %5789 = vmatprep.subr.bf16.mxu0 %v5788_v62  ;;  %v5796_v20 = vpack.c.bf16 %v3025_v35, %v3023_v17  ;;  %v10258_v17 = vld [vmem:[#allocation18_spill] sm:$0xff] }
 0x294   : > { %v2789_v63 = vmax.f32 %v10255_v43, %v2399_v6  ;;  %3418 = vmatprep.mubr.f32.mxu0 %v2864_v57  ;;  %v3022_v57 = vld [vmem:[%s9767_s3 + $0x360] sm:$0xff]  ;;  %v3024_v6 = vld [vmem:[%s9767_s3 + $0x370] sm:$0xff] }
 0x295   : > { %3419 = vmatmul.mubr.f32.gmra.mrb[114].mxu0 %v2863_v0  ;;  %v2868_v8 = vmax.f32 %v2788_v45, 0.0  ;;  %v10257_v43 = vld [vmem:[#allocation63_spill] sm:$0xff]  ;;  %v3029_v45 = vld [vmem:[%s9767_s3 + $0x398] sm:$0xff]  ;;  %v5798_v21 = vpack.c.bf16 %v3024_v6, %v3022_v57 }
 0x296   : > { %v2869_v62 = vmax.f32 %v2789_v63, 0.0  ;;  %v2403_v54 = vpop.f32.mrb[198].mxu1  ;;  %5791 = vmatpush1.bf16.msra.mxu0 %v5790_v41  ;;  %v3027_v41 = vld [vmem:[%s9767_s3 + $0x388] sm:$0xff] }
 0x297   : > { %v2793_v60 = vmax.f32 %v10256_v10, %v2403_v54  ;;  %v2405_v40 = vpop.f32.mrb[199].mxu1  ;;  %5793 = vmatprep.subr.bf16.mxu0 %v5792_v51  ;;  %v5800_v10 = vpack.c.bf16 %v3029_v45, %v3027_v41  ;;  %v10260_v41 = vld [vmem:[#allocation68_spill] sm:$0xff] }
 0x298   : > { %v2794_v0 = vmax.f32 %v10257_v43, %v2405_v40  ;;  %3424 = vmatprep.mubr.f32.mxu0 %v2869_v62  ;;  %v3026_v62 = vld [vmem:[%s9767_s3 + $0x380] sm:$0xff]  ;;  %v3028_v40 = vld [vmem:[%s9767_s3 + $0x390] sm:$0xff]  ;;  %v10259_v43 = vld [vmem:[#allocation52_spill] sm:$0xff] }
 0x299   : > { %3425 = vmatmul.mubr.f32.gmra.mrb[116].mxu0 %v2868_v8  ;;  %v2873_v63 = vmax.f32 %v2793_v60, 0.0  ;;  %v3033_v60 = vld [vmem:[%s9767_s3 + $0x3b8] sm:$0xff]  ;;  %v5802_v6 = vpack.c.bf16 %v3028_v40, %v3026_v62 }
 0x29a   : > { %v2874_v51 = vmax.f32 %v2794_v0, 0.0  ;;  %v2409_v59 = vpop.f32.mrb[200].mxu1  ;;  %5795 = vmatpush1.bf16.msra.mxu0 %v5794_v15  ;;  %v3031_v15 = vld [vmem:[%s9767_s3 + $0x3a8] sm:$0xff] }
 0x29b   : > { %v2798_v35 = vmax.f32 %v10258_v17, %v2409_v59  ;;  %v2411_v54 = vpop.f32.mrb[201].mxu1  ;;  %5797 = vmatprep.subr.bf16.mxu0 %v5796_v20  ;;  %v5804_v17 = vpack.c.bf16 %v3033_v60, %v3031_v15  ;;  %v10262_v15 = vld [vmem:[#allocation25_spill] sm:$0xff] }
 0x29c   : > { %v2799_v8 = vmax.f32 %v10259_v43, %v2411_v54  ;;  %3430 = vmatprep.mubr.f32.mxu0 %v2874_v51  ;;  %v3030_v51 = vld [vmem:[%s9767_s3 + $0x3a0] sm:$0xff]  ;;  %v3032_v54 = vld [vmem:[%s9767_s3 + $0x3b0] sm:$0xff] }
 0x29d   : > { %3431 = vmatmul.mubr.f32.gmra.mrb[118].mxu0 %v2873_v63  ;;  %v2878_v0 = vmax.f32 %v2798_v35, 0.0  ;;  %v10261_v43 = vld [vmem:[#allocation55_spill] sm:$0xff]  ;;  %v3037_v35 = vld [vmem:[%s9767_s3 + $0x3d8] sm:$0xff]  ;;  %v5806_v40 = vpack.c.bf16 %v3032_v54, %v3030_v51 }
 0x29e   : > { %v2879_v20 = vmax.f32 %v2799_v8, 0.0  ;;  %v2415_v57 = vpop.f32.mrb[202].mxu1  ;;  %5799 = vmatpush1.bf16.msra.mxu0 %v5798_v21  ;;  %v3035_v21 = vld [vmem:[%s9767_s3 + $0x3c8] sm:$0xff] }
 0x29f   : > { %v2803_v45 = vmax.f32 %v10260_v41, %v2415_v57  ;;  %v2417_v59 = vpop.f32.mrb[203].mxu1  ;;  %5801 = vmatprep.subr.bf16.mxu0 %v5800_v10  ;;  %v5808_v41 = vpack.c.bf16 %v3037_v35, %v3035_v21  ;;  %v10264_v21 = vld [vmem:[#allocation60_spill] sm:$0xff] }
 0x2a0   : > { %v2804_v63 = vmax.f32 %v10261_v43, %v2417_v59  ;;  %3436 = vmatprep.mubr.f32.mxu0 %v2879_v20  ;;  %v3034_v20 = vld [vmem:[%s9767_s3 + $0x3c0] sm:$0xff]  ;;  %v3036_v59 = vld [vmem:[%s9767_s3 + $0x3d0] sm:$0xff]  ;;  %v10263_v43 = vld [vmem:[#allocation26_spill] sm:$0xff] }
 0x2a1   : > { %3437 = vmatmul.mubr.f32.gmra.mrb[120].mxu0 %v2878_v0  ;;  %v2883_v8 = vmax.f32 %v2803_v45, 0.0  ;;  %v3041_v45 = vld [vmem:[%s9767_s3 + $0x3f8] sm:$0xff]  ;;  %v5810_v54 = vpack.c.bf16 %v3036_v59, %v3034_v20 }
 0x2a2   : > { %v2884_v10 = vmax.f32 %v2804_v63, 0.0  ;;  %v2421_v62 = vpop.f32.mrb[204].mxu1  ;;  %5803 = vmatpush1.bf16.msra.mxu0 %v5802_v6  ;;  %v3039_v6 = vld [vmem:[%s9767_s3 + $0x3e8] sm:$0xff] }
 0x2a3   : > { %v2808_v60 = vmax.f32 %v10262_v15, %v2421_v62  ;;  %v2423_v57 = vpop.f32.mrb[205].mxu1  ;;  %5805 = vmatprep.subr.bf16.mxu0 %v5804_v17  ;;  %v5812_v15 = vpack.c.bf16 %v3041_v45, %v3039_v6  ;;  %v10266_v6 = vld [vmem:[#allocation78_spill] sm:$0xff] }
 0x2a4   : > { %v2809_v0 = vmax.f32 %v10263_v43, %v2423_v57  ;;  %3442 = vmatprep.mubr.f32.mxu0 %v2884_v10  ;;  %v3038_v10 = vld [vmem:[%s9767_s3 + $0x3e0] sm:$0xff]  ;;  %v3040_v57 = vld [vmem:[%s9767_s3 + $0x3f0] sm:$0xff]  ;;  %v10265_v43 = vld [vmem:[#allocation76_spill] sm:$0xff] }
 0x2a5   : > { %3443 = vmatmul.mubr.f32.gmra.mrb[122].mxu0 %v2883_v8  ;;  %v2888_v63 = vmax.f32 %v2808_v60, 0.0  ;;  %v3045_v60 = vld [vmem:[%s9767_s3 + $0x418] sm:$0xff]  ;;  %v5814_v59 = vpack.c.bf16 %v3040_v57, %v3038_v10  ;;  %v8716_v57 = vld [vmem:[%s7653_s18] sm:$0xff] }
 0x2a6   : > { %v2889_v17 = vmax.f32 %v2809_v0, 0.0  ;;  %v2427_v51 = vpop.f32.mrb[206].mxu1  ;;  %5807 = vmatpush1.bf16.msra.mxu0 %v5806_v40  ;;  %v3043_v40 = vld [vmem:[%s9767_s3 + $0x408] sm:$0xff]  ;;  %v3049_v10 = vld [vmem:[%s9767_s3 + $0x438] sm:$0xff] }
 0x2a7   : > { %v2813_v35 = vmax.f32 %v10264_v21, %v2427_v51  ;;  %v2429_v62 = vpop.f32.mrb[207].mxu1  ;;  %5809 = vmatprep.subr.bf16.mxu0 %v5808_v41  ;;  %v5816_v51 = vpack.c.bf16 %v3045_v60, %v3043_v40  ;;  %v3042_v21 = vld [vmem:[%s9767_s3 + $0x400] sm:$0xff] }
 0x2a8   : > { %v2814_v8 = vmax.f32 %v10265_v43, %v2429_v62  ;;  %3448 = vmatprep.mubr.f32.mxu0 %v2889_v17 }
 0x2a9   : > { %3449 = vmatmul.mubr.f32.gmra.mrb[124].mxu0 %v2888_v63  ;;  %v2893_v0 = vmax.f32 %v2813_v35, 0.0  ;;  %v3044_v63 = vld [vmem:[%s9767_s3 + $0x410] sm:$0xff] }
 0x2aa   : > { %v2894_v41 = vmax.f32 %v2814_v8, 0.0  ;;  %v8692_v20 = vpop.f32.mrb[208].mxu1  ;;  %5811 = vmatpush1.bf16.msra.mxu0 %v5810_v54  ;;  %v10267_v54 = vmax.f32 %v8252_v52, %v7639_v36  ;;  %v3859_v36 = vmul.f32 %v8716_v57, %v8716_v57  ;;  %v5818_v43 = vpack.c.bf16 %v3044_v63, %v3042_v21  ;;  %v6153_v21 = vld [vmem:[%s7653_s18 + $0x10] sm:$0xff] }
 0x2ab   : > { %v2747_v45 = vmax.f32 %v10266_v6, %v8692_v20  ;;  %v8696_v17 = vpop.f32.mrb[209].mxu1  ;;  %5813 = vmatprep.subr.bf16.mxu0 %v5812_v15  ;;  %v3047_v15 = vld [vmem:[%s9767_s3 + $0x428] sm:$0xff]  ;;  %v10268_v8 = vmax.f32 %v8247_v24, %v7634_v33  ;;  %v3861_v63 = vmul.f32 %v6153_v21, %v6153_v21  ;;  %v10269_v33 = vmax.f32 %v8266_v44, %v7672_v47 }
 0x2ac   : > { %v2821_v62 = vmax.f32 %v10267_v54, 0.0  ;;  %v2742_v35 = vmax.f32 %v8186_v30, %v8696_v17  ;;  %3454 = vmatprep.mubr.f32.mxu0 %v2894_v41  ;;  %v3046_v54 = vld [vmem:[%s9767_s3 + $0x420] sm:$0xff]  ;;  %3875 = vadd.xlane.f32.xlu0 %v3859_v36  ;;  %v10270_v47 = vmax.f32 %v8261_v16, %v7667_v19  ;;  %v10271_v19 = vmax.f32 %v8280_v29, %v7701_v28 }
 0x2ad   : > { %3455 = vmatmul.mubr.f32.gmra.mrb[126].mxu0 %v2893_v0  ;;  %v2820_v40 = vmax.f32 %v10268_v8, 0.0  ;;  %v5820_v0 = vpack.c.bf16 %v3049_v10, %v3047_v15  ;;  %v2826_v24 = vmax.f32 %v10269_v33, 0.0  ;;  %v3053_v15 = vld [vmem:[%s9767_s3 + $0x458] sm:$0xff]  ;;  %v10272_v28 = vmax.f32 %v8275_v12, %v7696_v5 }
 0x2ae   : > { %v8720_v52 = vpop.f32.mrb[210].mxu1  ;;  %5815 = vmatpush1.bf16.msra.mxu0 %v5814_v59  ;;  %3525 = vmatprep.mubr.f32.mxu0 %v2821_v62  ;;  %v3048_v59 = vld [vmem:[%s9767_s3 + $0x430] sm:$0xff]  ;;  %v2825_v44 = vmax.f32 %v10270_v47, 0.0  ;;  %v2831_v16 = vmax.f32 %v10271_v19, 0.0  ;;  %v10274_v19 = vmax.f32 %v8289_v7, %v7725_v58  ;;  %v10276_v58 = vmax.f32 %v8303_v13, %v10133_v42 }
 0x2af   : > { %v2757_v60 = vmax.f32 %v8191_v1, %v8720_v52  ;;  %v8727_v41 = vpop.f32.mrb[211].mxu1  ;;  %5817 = vmatprep.subr.bf16.mxu0 %v5816_v51  ;;  %v3051_v51 = vld [vmem:[%s9767_s3 + $0x448] sm:$0xff]  ;;  %v5822_v36 = vpack.c.bf16 %v3048_v59, %v3046_v54  ;;  %v3057_v59 = vld [vmem:[%s9767_s3 + $0x478] sm:$0xff]  ;;  %v2830_v29 = vmax.f32 %v10272_v28, 0.0  ;;  %v10278_v13 = vmax.f32 %v8317_v61, %v10139_v56 }
 0x2b0   : > { %v2752_v62 = vmax.f32 %v8194_v49, %v8727_v41  ;;  %v5824_v33 = vpack.c.bf16 %v3053_v15, %v3051_v51  ;;  %3879 = vadd.xlane.f32.xlu0 %v3861_v63  ;;  %v2840_v7 = vmax.f32 %v10276_v58, 0.0  ;;  %v10280_v61 = vmax.f32 %v8331_v27, %v10145_v4  ;;  %v10283_v58 = vld [vmem:[#allocation5_spill] sm:$0xff]  ;;  %v10287_v27 = vld [vmem:[#allocation7_spill] sm:$0xff] }
 0x2b1   : > { %3526 = vmatmul.mubr.f32.vlgmr.msra.gmra.mrb[96].mxu0 %v2820_v40  ;;  %v3050_v40 = vld [vmem:[%s9767_s3 + $0x440] sm:$0xff]  ;;  %v2845_v42 = vmax.f32 %v10278_v13, 0.0  ;;  %v2837_v30 = vmax.f32 %v2757_v60, 0.0 }
 0x2b2   : > { %v8747_v10 = vpop.f32.mrb[212].mxu1  ;;  %3531 = vmatprep.mubr.f32.mxu0 %v2826_v24  ;;  %5819 = vmatpush1.bf16.msra.mxu0 %v5818_v43  ;;  %v3052_v43 = vld [vmem:[%s9767_s3 + $0x450] sm:$0xff]  ;;  %v2850_v56 = vmax.f32 %v10280_v61, 0.0  ;;  %v10288_v4 = vld [vmem:[#allocation65_spill] sm:$0xff]  ;;  %v10290_v61 = vld [vmem:[#allocation82_spill] sm:$0xff] }
 0x2b3   : > { %v2767_v8 = vmax.f32 %v8199_v38, %v8747_v10  ;;  %v8754_v21 = vpop.f32.mrb[213].mxu1  ;;  %5821 = vmatprep.subr.bf16.mxu0 %v5820_v0  ;;  %v3055_v0 = vld [vmem:[%s9767_s3 + $0x468] sm:$0xff]  ;;  %v5826_v63 = vpack.c.bf16 %v3052_v43, %v3050_v40  ;;  %v10273_v40 = vmax.f32 %v8294_v3, %v7730_v14  ;;  %v10275_v14 = vmax.f32 %v8308_v25, %v10134_v22  ;;  %v8986_v41 = vld [vmem:[%s7653_s18 + $0x20] sm:$0xff]  ;;  %v8991_v10 = vld [vmem:[%s7653_s18 + $0x18] sm:$0xff] }
 0x2b4   : > { %v2762_v54 = vmax.f32 %v8202_v37, %v8754_v21  ;;  %v5828_v47 = vpack.c.bf16 %v3057_v59, %v3055_v0  ;;  %v10277_v25 = vmax.f32 %v8322_v2, %v10140_v55  ;;  %v10279_v2 = vmax.f32 %v8336_v48, %v10146_v23 }
 0x2b5   : > { %3532 = vmatmul.mubr.f32.gmra.mrb[98].mxu0 %v2825_v44  ;;  %v3054_v44 = vld [vmem:[%s9767_s3 + $0x460] sm:$0xff]  ;;  %v2836_v5 = vmax.f32 %v10273_v40, 0.0  ;;  %v2841_v3 = vmax.f32 %v10275_v14, 0.0  ;;  %v2847_v49 = vmax.f32 %v2767_v8, 0.0  ;;  %v8996_v8 = vld [vmem:[%s7653_s18 + $0x30] sm:$0xff] }
 0x2b6   : > { %v8773_v24 = vpop.f32.mrb[214].mxu1  ;;  %3537 = vmatprep.mubr.f32.mxu0 %v2831_v16  ;;  %5823 = vmatpush1.bf16.msra.mxu0 %v5822_v36  ;;  %v3056_v36 = vld [vmem:[%s9767_s3 + $0x470] sm:$0xff]  ;;  %v2835_v16 = vmax.f32 %v10274_v19, 0.0  ;;  %v2846_v22 = vmax.f32 %v10277_v25, 0.0  ;;  %v2851_v55 = vmax.f32 %v10279_v2, 0.0  ;;  %v10284_v25 = vld [vmem:[#allocation6_spill] sm:$0xff]  ;;  %v10289_v2 = vmax.f32 %v10287_v27, %v10288_v4 }
 0x2b7   : > { %v2777_v51 = vmax.f32 %v8207_v32, %v8773_v24  ;;  %v8780_v15 = vpop.f32.mrb[215].mxu1  ;;  %5825 = vmatprep.subr.bf16.mxu0 %v5824_v33  ;;  %v5830_v33 = vpack.c.bf16 %v3056_v36, %v3054_v44  ;;  %v2842_v20 = vmax.f32 %v2762_v54, 0.0  ;;  %v3865_v21 = vmul.f32 %v8996_v8, %v8996_v8  ;;  %v9001_v54 = vld [vmem:[%s7653_s18 + $0x28] sm:$0xff] }
 0x2b8   : > { %v2772_v12 = vmax.f32 %v8210_v31, %v8780_v15  ;;  %v3864_v24 = vmul.f32 %v9001_v54, %v9001_v54 }
 0x2b9   : > { %3538 = vmatmul.mubr.f32.gmra.mrb[100].mxu0 %v2830_v29  ;;  %v10300_v29 = vld [vmem:[#allocation69_spill] sm:$0xff]  ;;  %v2857_v37 = vmax.f32 %v2777_v51, 0.0  ;;  %v6159_v51 = vld [vmem:[%s7653_s18 + $0x38] sm:$0xff] }
 0x2ba   : > { %v8793_v43 = vpop.f32.mrb[216].mxu1  ;;  %3543 = vmatprep.mubr.f32.mxu0 %v2836_v5  ;;  %5827 = vmatpush1.bf16.msra.mxu0 %v5826_v63  ;;  %v2852_v1 = vmax.f32 %v2772_v12, 0.0  ;;  %v3866_v15 = vmul.f32 %v6159_v51, %v6159_v51  ;;  %v3785_v12 = vlaneseq }
 0x2bb   : > { %v2787_v0 = vmax.f32 %v8215_v9, %v8793_v43  ;;  %v8800_v59 = vpop.f32.mrb[217].mxu1  ;;  %5829 = vmatprep.subr.bf16.mxu0 %v5828_v47 }
 0x2bc   : > { %v2782_v28 = vmax.f32 %v8218_v18, %v8800_v59  ;;  %v3786_v43 = vshrl.u32 %v3785_v12, 7  ;;  %v3783_v59 = vld [vmem:[%s9769_s5] sm:$0x3] }
 0x2bd   : > { %3544 = vmatmul.mubr.f32.gmra.mrb[102].mxu0 %v2835_v16  ;;  %v10291_v16 = vld [vmem:[#allocation64_spill] sm:$0xff]  ;;  %v2867_v31 = vmax.f32 %v2787_v0, 0.0 }
 0x2be   : > { %v8807_v63 = vpop.f32.mrb[218].mxu1  ;;  %3549 = vmatprep.mubr.f32.mxu0 %v2841_v3  ;;  %5831 = vmatpush1.bf16.msra.mxu0 %v5830_v33  ;;  %v10281_v3 = vld [vmem:[#allocation28_spill] sm:$0xff]  ;;  %v10292_v40 = vmax.f32 %v10290_v61, %v10291_v16  ;;  %v10306_v61 = vld [vmem:[#allocation31_spill] sm:$0xff]  ;;  %v2862_v38 = vmax.f32 %v2782_v28, 0.0  ;;  %v3787_v0 = vsub.s32 0, %v3786_v43  ;;  %v3791_v28 = vsub.s32 1, %v3786_v43 }
 0x2bf   : > { %v8814_v47 = vpop.f32.mrb[219].mxu1  ;;  %v10282_v48 = vmax.f32 %v8350_v11, %v10281_v3  ;;  %v10293_v3 = vld [vmem:[#allocation84_spill] sm:$0xff]  ;;  %v10335_v18 = vmax.f32 %v8223_v34, %v8807_v63 }
 0x2c0   : > { %v2792_v44 = vmax.f32 %v8226_v26, %v8814_v47  ;;  %v2860_v11 = vmax.f32 %v10292_v40, 0.0  ;;  %v9009_v63 = vrot.slane %v3783_v59, %v3787_v0  ;;  %v9011_v47 = vrot.slane %v3783_v59, %v3791_v28 }
 0x2c1   : > { %3550 = vmatmul.mubr.f32.gmra.mrb[104].mxu0 %v2840_v7  ;;  %v2856_v23 = vmax.f32 %v10282_v48, 0.0  ;;  %v10294_v48 = vld [vmem:[#allocation79_spill] sm:$0xff]  ;;  %v2877_v6 = vmax.f32 %v10335_v18, 0.0 }
 0x2c2   : > { %v8821_v36 = vpop.f32.mrb[220].mxu1  ;;  %3555 = vmatprep.mubr.f32.mxu0 %v2846_v22  ;;  %v10285_v22 = vld [vmem:[#allocation27_spill] sm:$0xff]  ;;  %v10295_v33 = vmax.f32 %v10293_v3, %v10294_v48  ;;  %v2872_v32 = vmax.f32 %v2792_v44, 0.0 }
 0x2c3   : > { %v8828_v5 = vpop.f32.mrb[221].mxu1  ;;  %v10286_v13 = vmax.f32 %v10284_v25, %v10285_v22  ;;  %v10337_v26 = vmax.f32 %v8231_v39, %v8821_v36  ;;  %v8981_v39 = vld [vmem:[%s7653_s18 + $0x8] sm:$0xff] }
 0x2c4   : > { %v2866_v7 = vmax.f32 %v10295_v33, 0.0  ;;  %v10336_v9 = vmax.f32 %v8234_v50, %v8828_v5  ;;  %v3860_v60 = vmul.f32 %v8981_v39, %v8981_v39 }
 0x2c5   : > { %3556 = vmatmul.mubr.f32.gmra.mrb[106].mxu0 %v2845_v42  ;;  %v2855_v42 = vmax.f32 %v10286_v13, 0.0  ;;  %v10299_v13 = vld [vmem:[#allocation9_spill] sm:$0xff]  ;;  %v2887_v17 = vmax.f32 %v10337_v26, 0.0 }
 0x2c6   : > { %v8835_v19 = vpop.f32.mrb[222].mxu1  ;;  %3561 = vmatprep.mubr.f32.mxu0 %v2851_v55  ;;  %v2861_v55 = vmax.f32 %v10289_v2, 0.0  ;;  %v10301_v27 = vmax.f32 %v10299_v13, %v10300_v29  ;;  %v10303_v2 = vld [vmem:[#allocation30_spill] sm:$0xff]  ;;  %3877 = vadd.xlane.f32.xlu1 %v3860_v60 }
 0x2c7   : > { %v8842_v14 = vpop.f32.mrb[223].mxu1  ;;  %v10339_v50 = vmax.f32 %v8239_v53, %v8835_v19  ;;  %v3862_v53 = vmul.f32 %v8991_v10, %v8991_v10 }
 0x2c8   : > { %v2871_v4 = vmax.f32 %v10301_v27, 0.0  ;;  %v10315_v27 = vld [vmem:[#allocation80_spill] sm:$0xff]  ;;  %v10338_v34 = vmax.f32 %v10283_v58, %v8842_v14 }
 0x2c9   : > { %3562 = vmatmul.mubr.f32.gmra.mrb[108].mxu0 %v2850_v56  ;;  %v10296_v56 = vld [vmem:[#allocation8_spill] sm:$0xff]  ;;  %v2897_v52 = vmax.f32 %v10339_v50, 0.0 }
 0x2ca   : > { %3567 = vmatprep.mubr.f32.mxu0 %v2856_v23  ;;  %v10297_v23 = vld [vmem:[#allocation29_spill] sm:$0xff]  ;;  %3881 = vadd.xlane.f32.xlu1 %v3862_v53 }
 0x2cb   : > { %v10298_v25 = vmax.f32 %v10296_v56, %v10297_v23  ;;  %v10311_v23 = vld [vmem:[#allocation13_spill] sm:$0xff] }
 0x2cd   : > { %3568 = vmatmul.mubr.f32.gmra.mrb[110].mxu0 %v2855_v42  ;;  %v2865_v22 = vmax.f32 %v10298_v25, 0.0  ;;  %v10302_v42 = vld [vmem:[#allocation86_spill] sm:$0xff]  ;;  %v10312_v25 = vld [vmem:[#allocation33_spill] sm:$0xff] }
 0x2ce   : > { %3573 = vmatprep.mubr.f32.mxu0 %v2861_v55  ;;  %v10304_v16 = vmax.f32 %v10302_v42, %v10303_v2  ;;  %v10305_v55 = vld [vmem:[#allocation11_spill] sm:$0xff]  ;;  %v10313_v29 = vmax.f32 %v10311_v23, %v10312_v25  ;;  %v10317_v2 = vld [vmem:[#allocation36_spill] sm:$0xff]  ;;  %v10326_v25 = vld [vmem:[#allocation37_spill] sm:$0xff]  ;;  %3885 = vadd.xlane.f32.xlu1 %v3864_v24 }
 0x2cf   : > { %v10307_v3 = vmax.f32 %v10305_v55, %v10306_v61  ;;  %v10320_v61 = vld [vmem:[#allocation34_spill] sm:$0xff] }
 0x2d0   : > { %v2870_v40 = vmax.f32 %v10304_v16, 0.0  ;;  %v2881_v13 = vmax.f32 %v10313_v29, 0.0  ;;  %v10318_v16 = vmax.f32 %v8434_v46, %v10317_v2  ;;  %v10332_v2 = vld [vmem:[#allocation42_spill] sm:$0xff] }
 0x2d1   : > { %3574 = vmatmul.mubr.f32.gmra.mrb[112].mxu0 %v2860_v11  ;;  %v2876_v33 = vmax.f32 %v10307_v3, 0.0  ;;  %v10309_v11 = vld [vmem:[#allocation70_spill] sm:$0xff] }
 0x2d2   : > { %3579 = vmatprep.mubr.f32.mxu0 %v2866_v7  ;;  %v10308_v7 = vld [vmem:[#allocation10_spill] sm:$0xff]  ;;  %v2886_v55 = vmax.f32 %v10318_v16, 0.0  ;;  %3889 = vadd.xlane.f32.xlu1 %v3866_v15 }
 0x2d3   : > { %v10310_v48 = vmax.f32 %v10308_v7, %v10309_v11  ;;  %v10322_v7 = vld [vmem:[#allocation16_spill] sm:$0xff]  ;;  %v10323_v11 = vld [vmem:[#allocation39_spill] sm:$0xff] }
 0x2d5   : > { %3580 = vmatmul.mubr.f32.gmra.mrb[114].mxu0 %v2865_v22  ;;  %v2875_v56 = vmax.f32 %v10310_v48, 0.0  ;;  %v10314_v22 = vld [vmem:[#allocation12_spill] sm:$0xff]  ;;  %v10324_v48 = vmax.f32 %v10322_v7, %v10323_v11 }
 0x2d6   : > { %3585 = vmatprep.mubr.f32.mxu0 %v2871_v4  ;;  %v10316_v4 = vmax.f32 %v10314_v22, %v10315_v27  ;;  %v10328_v22 = vld [vmem:[#allocation20_spill] sm:$0xff] }
 0x2d7   : > { %v2891_v23 = vmax.f32 %v10324_v48, 0.0  ;;  %v10329_v27 = vld [vmem:[#allocation104_spill] sm:$0xff] }
 0x2d8   : > { %v2880_v42 = vmax.f32 %v10316_v4, 0.0  ;;  %v10330_v46 = vmax.f32 %v10328_v22, %v10329_v27 }
 0x2d9   : > { %3586 = vmatmul.mubr.f32.gmra.mrb[116].mxu0 %v2870_v40  ;;  %v10319_v40 = vld [vmem:[#allocation14_spill] sm:$0xff] }
 0x2da   : > { %3591 = vmatprep.mubr.f32.mxu0 %v2876_v33  ;;  %v10321_v3 = vmax.f32 %v10319_v40, %v10320_v61  ;;  %v2896_v4 = vmax.f32 %v10330_v46, 0.0  ;;  %v10334_v40 = vmov 0.0   ;;  %v2822_v61 = vmax.f32 %v2742_v35, 0.0 }
 0x2db   : > { %v2892_v35 = vmax.f32 %v10338_v34, 0.0 }
 0x2dc   : > { %v2885_v33 = vmax.f32 %v10321_v3, 0.0  ;;  %v2827_v3 = vmax.f32 %v2747_v45, 0.0  ;;  %v2882_v45 = vmax.f32 %v10336_v9, 0.0 }
 0x2dd   : > { %3592 = vmatmul.mubr.f32.gmra.mrb[118].mxu0 %v2875_v56  ;;  %v10325_v56 = vld [vmem:[#allocation15_spill] sm:$0xff] }
 0x2de   : > { %3597 = vmatprep.mubr.f32.mxu0 %v2881_v13  ;;  %v10327_v29 = vmax.f32 %v10325_v56, %v10326_v25 }
 0x2e0   : > { %v2890_v13 = vmax.f32 %v10327_v29, 0.0 }
 0x2e1   : > { %3598 = vmatmul.mubr.f32.gmra.mrb[120].mxu0 %v2880_v42  ;;  %v10331_v42 = vld [vmem:[#allocation19_spill] sm:$0xff] }
 0x2e2   : > { %3603 = vmatprep.mubr.f32.mxu0 %v2886_v55  ;;  %v10333_v16 = vmax.f32 %v10331_v42, %v10332_v2 }
 0x2e4   : > { %v2895_v55 = vmax.f32 %v10333_v16, 0.0 }
 0x2e5   : > { %3604 = vmatmul.mubr.f32.gmra.mrb[122].mxu0 %v2885_v33  ;;  %v2832_v33 = vmax.f32 %v2752_v62, 0.0  ;;  %v3863_v62 = vmul.f32 %v8986_v41, %v8986_v41 }
 0x2e6   : > { %3609 = vmatprep.mubr.f32.mxu0 %v2891_v23 }
 0x2e7   : > { %3883 = vadd.xlane.f32.xlu0 %v3863_v62 }
 0x2e9   : > { %3610 = vmatmul.mubr.f32.gmra.mrb[124].mxu0 %v2890_v13 }
 0x2ea   : > { %3615 = vmatprep.mubr.f32.mxu0 %v2896_v4 }
 0x2eb   : > { %3887 = vadd.xlane.f32.xlu0 %v3865_v21 }
 0x2ed   : > { %3616 = vmatmul.mubr.f32.gmra.mrb[126].mxu0 %v2895_v55 }
 0x2ee   : > { %3686 = vmatprep.mubr.f32.mxu0 %v10334_v40 }
 0x2f1   : > { %5087 = vmatmul.mubr.msk.f32.vlgmr.msra.gmra.mrb[96].mxu0 %vm3251_vm4, %v2822_v61 }
 0x2f2   : > { %3692 = vmatprep.mubr.f32.mxu0 %v10334_v40 }
 0x2f5   : > { %5088 = vmatmul.mubr.msk.f32.gmra.mrb[98].mxu0 %vm3251_vm4, %v2827_v3 }
 0x2f6   : > { %3698 = vmatprep.mubr.f32.mxu0 %v10334_v40 }
 0x2f9   : > { %5089 = vmatmul.mubr.msk.f32.gmra.mrb[100].mxu0 %vm3251_vm4, %v2832_v33 }
 0x2fa   : > { %3704 = vmatprep.mubr.f32.mxu0 %v10334_v40 }
 0x2fd   : > { %5090 = vmatmul.mubr.msk.f32.gmra.mrb[102].mxu0 %vm3251_vm4, %v2837_v30 }
 0x2fe   : > { %3710 = vmatprep.mubr.f32.mxu0 %v10334_v40 }
 0x301   : > { %5091 = vmatmul.mubr.msk.f32.gmra.mrb[104].mxu0 %vm3251_vm4, %v2842_v20 }
 0x302   : > { %3716 = vmatprep.mubr.f32.mxu0 %v10334_v40 }
 0x305   : > { %5092 = vmatmul.mubr.msk.f32.gmra.mrb[106].mxu0 %vm3251_vm4, %v2847_v49 }
 0x306   : > { %3722 = vmatprep.mubr.f32.mxu0 %v10334_v40 }
 0x309   : > { %5093 = vmatmul.mubr.msk.f32.gmra.mrb[108].mxu0 %vm3251_vm4, %v2852_v1 }
 0x30a   : > { %3728 = vmatprep.mubr.f32.mxu0 %v10334_v40 }
 0x30d   : > { %5094 = vmatmul.mubr.msk.f32.gmra.mrb[110].mxu0 %vm3251_vm4, %v2857_v37 }
 0x30e   : > { %3734 = vmatprep.mubr.f32.mxu0 %v10334_v40 }
 0x311   : > { %5095 = vmatmul.mubr.msk.f32.gmra.mrb[112].mxu0 %vm3251_vm4, %v2862_v38 }
 0x312   : > { %3740 = vmatprep.mubr.f32.mxu0 %v10334_v40 }
 0x315   : > { %5096 = vmatmul.mubr.msk.f32.gmra.mrb[114].mxu0 %vm3251_vm4, %v2867_v31 }
 0x316   : > { %3746 = vmatprep.mubr.f32.mxu0 %v10334_v40 }
 0x319   : > { %5097 = vmatmul.mubr.msk.f32.gmra.mrb[116].mxu0 %vm3251_vm4, %v2872_v32 }
 0x31a   : > { %3752 = vmatprep.mubr.f32.mxu0 %v10334_v40 }
 0x31d   : > { %5098 = vmatmul.mubr.msk.f32.gmra.mrb[118].mxu0 %vm3251_vm4, %v2877_v6 }
 0x31e   : > { %3758 = vmatprep.mubr.f32.mxu0 %v10334_v40 }
 0x321   : > { %5099 = vmatmul.mubr.msk.f32.gmra.mrb[120].mxu0 %vm3251_vm4, %v2882_v45 }
 0x322   : > { %3764 = vmatprep.mubr.f32.mxu0 %v10334_v40 }
 0x325   : > { %5100 = vmatmul.mubr.msk.f32.gmra.mrb[122].mxu0 %vm3251_vm4, %v2887_v17 }
 0x326   : > { %3770 = vmatprep.mubr.f32.mxu0 %v10334_v40 }
 0x329   : > { %5101 = vmatmul.mubr.msk.f32.gmra.mrb[124].mxu0 %vm3251_vm4, %v2892_v35 }
 0x32a   : > { %3776 = vmatprep.mubr.f32.mxu0 %v10334_v40 }
 0x32d   : > { %5102 = vmatmul.mubr.msk.f32.gmra.mrb[126].mxu0 %vm3251_vm4, %v2897_v52 }
 0x3c4   : > { %v3688_v44 = vpop.f32.mrb[96].mxu0 }
 0x3c5   : > { %v3795_v36 = vadd.f32 %v9009_v63, %v3688_v44  ;;  %v3690_v5 = vpop.f32.mrb[97].mxu0 }
 0x3c6   : > { %v3796_v19 = vadd.f32 %v9011_v47, %v3690_v5 }
 0x3c7   : > { %v3827_v14 = vmax.f32 %v3795_v36, 0.0 }
 0x3c8   : > { %v3694_v58 = vpop.f32.mrb[98].mxu0 }
 0x3c9   : > { %v9015_v7 = vmul.f32 %v3827_v14, %v3796_v19  ;;  %v3797_v11 = vadd.f32 %v9009_v63, %v3694_v58  ;;  %v3696_v48 = vpop.f32.mrb[99].mxu0 }
 0x3ca   : > { %v3798_v23 = vadd.f32 %v9011_v47, %v3696_v48 }
 0x3cb   : > { %v3828_v56 = vmax.f32 %v3797_v11, 0.0  ;;  %v4019_v25 = vmul.f32 %v9015_v7, %v9015_v7 }
 0x3cc   : > { %v3700_v29 = vpop.f32.mrb[100].mxu0 }
 0x3cd   : > { %v9021_v13 = vmul.f32 %v3828_v56, %v3798_v23  ;;  %v3799_v22 = vadd.f32 %v9009_v63, %v3700_v29  ;;  %4035 = vadd.xlane.f32.xlu0 %v4019_v25  ;;  %v3702_v27 = vpop.f32.mrb[101].mxu0 }
 0x3ce   : > { %v3800_v46 = vadd.f32 %v9011_v47, %v3702_v27 }
 0x3cf   : > { %v3829_v4 = vmax.f32 %v3799_v22, 0.0  ;;  %v4020_v42 = vmul.f32 %v9021_v13, %v9021_v13 }
 0x3d0   : > { %v3706_v2 = vpop.f32.mrb[102].mxu0 }
 0x3d1   : > { %v9027_v16 = vmul.f32 %v3829_v4, %v3800_v46  ;;  %v3801_v55 = vadd.f32 %v9009_v63, %v3706_v2  ;;  %4037 = vadd.xlane.f32.xlu0 %v4020_v42  ;;  %v3708_v40 = vpop.f32.mrb[103].mxu0 }
 0x3d2   : > { %v3802_v61 = vadd.f32 %v9011_v47, %v3708_v40 }
 0x3d3   : > { %v3830_v3 = vmax.f32 %v3801_v55, 0.0  ;;  %v4021_v33 = vmul.f32 %v9027_v16, %v9027_v16 }
 0x3d4   : > { %v3712_v30 = vpop.f32.mrb[104].mxu0 }
 0x3d5   : > { %v9033_v20 = vmul.f32 %v3830_v3, %v3802_v61  ;;  %v3803_v49 = vadd.f32 %v9009_v63, %v3712_v30  ;;  %4039 = vadd.xlane.f32.xlu1 %v4021_v33  ;;  %v3714_v1 = vpop.f32.mrb[105].mxu0 }
 0x3d6   : > { %v3804_v37 = vadd.f32 %v9011_v47, %v3714_v1 }
 0x3d7   : > { %v3831_v38 = vmax.f32 %v3803_v49, 0.0  ;;  %v4022_v31 = vmul.f32 %v9033_v20, %v9033_v20 }
 0x3d8   : > { %v3718_v32 = vpop.f32.mrb[106].mxu0 }
 0x3d9   : > { %v9039_v18 = vmul.f32 %v3831_v38, %v3804_v37  ;;  %v3805_v6 = vadd.f32 %v9009_v63, %v3718_v32  ;;  %4041 = vadd.xlane.f32.xlu1 %v4022_v31  ;;  %v3720_v9 = vpop.f32.mrb[107].mxu0 }
 0x3da   : > { %v3806_v45 = vadd.f32 %v9011_v47, %v3720_v9 }
 0x3db   : > { %v3832_v26 = vmax.f32 %v3805_v6, 0.0  ;;  %v4023_v17 = vmul.f32 %v9039_v18, %v9039_v18 }
 0x3dc   : > { %v3724_v34 = vpop.f32.mrb[108].mxu0 }
 0x3dd   : > { %v9045_v35 = vmul.f32 %v3832_v26, %v3806_v45  ;;  %v3807_v50 = vadd.f32 %v9009_v63, %v3724_v34  ;;  %4043 = vadd.xlane.f32.xlu0 %v4023_v17  ;;  %v3726_v52 = vpop.f32.mrb[109].mxu0 }
 0x3de   : > { %v3808_v60 = vadd.f32 %v9011_v47, %v3726_v52 }
 0x3df   : > { %v3833_v62 = vmax.f32 %v3807_v50, 0.0  ;;  %v4024_v53 = vmul.f32 %v9045_v35, %v9045_v35 }
 0x3e0   : > { %v3730_v21 = vpop.f32.mrb[110].mxu0 }
 0x3e1   : > { %v9051_v24 = vmul.f32 %v3833_v62, %v3808_v60  ;;  %v3809_v51 = vadd.f32 %v9009_v63, %v3730_v21  ;;  %4045 = vadd.xlane.f32.xlu1 %v4024_v53  ;;  %v3732_v15 = vpop.f32.mrb[111].mxu0 }
 0x3e2   : > { %v3810_v12 = vadd.f32 %v9011_v47, %v3732_v15 }
 0x3e3   : > { %v3834_v43 = vmax.f32 %v3809_v51, 0.0  ;;  %v4025_v0 = vmul.f32 %v9051_v24, %v9051_v24 }
 0x3e4   : > { %v3736_v59 = vpop.f32.mrb[112].mxu0 }
 0x3e5   : > { %v9057_v28 = vmul.f32 %v3834_v43, %v3810_v12  ;;  %v3811_v44 = vadd.f32 %v9009_v63, %v3736_v59  ;;  %4047 = vadd.xlane.f32.xlu0 %v4025_v0  ;;  %v3738_v36 = vpop.f32.mrb[113].mxu0 }
 0x3e6   : > { %v3812_v5 = vadd.f32 %v9011_v47, %v3738_v36 }
 0x3e7   : > { %v3835_v19 = vmax.f32 %v3811_v44, 0.0  ;;  %v4026_v14 = vmul.f32 %v9057_v28, %v9057_v28 }
 0x3e8   : > { %v3742_v58 = vpop.f32.mrb[114].mxu0 }
 0x3e9   : > { %v9063_v11 = vmul.f32 %v3835_v19, %v3812_v5  ;;  %v3813_v48 = vadd.f32 %v9009_v63, %v3742_v58  ;;  %4049 = vadd.xlane.f32.xlu1 %v4026_v14  ;;  %v3744_v23 = vpop.f32.mrb[115].mxu0 }
 0x3ea   : > { %v3814_v56 = vadd.f32 %v9011_v47, %v3744_v23  ;;  %v9108_v23 = vld [vmem:[%s7653_s18 + $0x40] sm:$0xff] }
 0x3eb   : > { %v3836_v25 = vmax.f32 %v3813_v48, 0.0  ;;  %v4027_v29 = vmul.f32 %v9063_v11, %v9063_v11 }
 0x3ec   : > { %v3748_v22 = vpop.f32.mrb[116].mxu0 }
 0x3ed   : > { %v9069_v27 = vmul.f32 %v3836_v25, %v3814_v56  ;;  %v3815_v46 = vadd.f32 %v9009_v63, %v3748_v22  ;;  %4051 = vadd.xlane.f32.xlu0 %v4027_v29  ;;  %v3750_v4 = vpop.f32.mrb[117].mxu0  ;;  %v3867_v56 = vmul.f32 %v9108_v23, %v9108_v23  ;;  %v9120_v29 = vld [vmem:[%s7653_s18 + $0x48] sm:$0xff] }
 0x3ee   : > { %v3816_v42 = vadd.f32 %v9011_v47, %v3750_v4  ;;  %v3868_v22 = vmul.f32 %v9120_v29, %v9120_v29 }
 0x3ef   : > { %v3837_v2 = vmax.f32 %v3815_v46, 0.0  ;;  %v4028_v55 = vmul.f32 %v9069_v27, %v9069_v27  ;;  %v9125_v46 = vld [vmem:[%s7653_s18 + $0x60] sm:$0xff] }
 0x3f0   : > { %v3754_v40 = vpop.f32.mrb[118].mxu0  ;;  %v3871_v4 = vmul.f32 %v9125_v46, %v9125_v46 }
 0x3f1   : > { %v9075_v61 = vmul.f32 %v3837_v2, %v3816_v42  ;;  %v3817_v3 = vadd.f32 %v9009_v63, %v3754_v40  ;;  %4053 = vadd.xlane.f32.xlu1 %v4028_v55  ;;  %v3756_v33 = vpop.f32.mrb[119].mxu0  ;;  %v9130_v42 = vld [vmem:[%s7653_s18 + $0x58] sm:$0xff]  ;;  %v9135_v55 = vld [vmem:[%s7653_s18 + $0x70] sm:$0xff] }
 0x3f2   : > { %v3818_v30 = vadd.f32 %v9011_v47, %v3756_v33  ;;  %v3870_v2 = vmul.f32 %v9130_v42, %v9130_v42  ;;  %v3873_v40 = vmul.f32 %v9135_v55, %v9135_v55 }
 0x3f3   : > { %v3838_v49 = vmax.f32 %v3817_v3, 0.0  ;;  %v4029_v1 = vmul.f32 %v9075_v61, %v9075_v61  ;;  %v9140_v3 = vld [vmem:[%s7653_s18 + $0x68] sm:$0xff] }
 0x3f4   : > { %v3760_v37 = vpop.f32.mrb[120].mxu0  ;;  %v3872_v33 = vmul.f32 %v9140_v3, %v9140_v3 }
 0x3f5   : > { %v9081_v38 = vmul.f32 %v3838_v49, %v3818_v30  ;;  %v3819_v31 = vadd.f32 %v9009_v63, %v3760_v37  ;;  %4055 = vadd.xlane.f32.xlu0 %v4029_v1  ;;  %v3762_v32 = vpop.f32.mrb[121].mxu0  ;;  %v9145_v30 = vld [vmem:[%s7653_s18 + $0x78] sm:$0xff]  ;;  %v9149_v1 = vpop.xlane.xlu0 %3875 }
 0x3f6   : > { %v3820_v6 = vadd.f32 %v9011_v47, %v3762_v32  ;;  %v3874_v49 = vmul.f32 %v9145_v30, %v9145_v30  ;;  %6004 = vrsqrt.f32 %v9149_v1  ;;  %vm3909_vm5 = vcmp.eq.f32.partialorder %v9149_v1, inf }
 0x3f7   : > { %v3839_v9 = vmax.f32 %v3819_v31, 0.0  ;;  %v4030_v45 = vmul.f32 %v9081_v38, %v9081_v38  ;;  %v9153_v31 = vpop.xlane.xlu1 %3877  ;;  %vm3911_vm7 = vcmp.eq.f32.partialorder %v9149_v1, 0.0 }
 0x3f8   : > { %v3766_v26 = vpop.f32.mrb[122].mxu0  ;;  %vm3916_vm10 = vcmp.eq.f32.partialorder %v9153_v31, inf  ;;  %vm3918_vm12 = vcmp.eq.f32.partialorder %v9153_v31, 0.0 }
 0x3f9   : > { %v9087_v17 = vmul.f32 %v3839_v9, %v3820_v6  ;;  %v3821_v34 = vadd.f32 %v9009_v63, %v3766_v26  ;;  %4057 = vadd.xlane.f32.xlu1 %v4030_v45  ;;  %v3768_v50 = vpop.f32.mrb[123].mxu0  ;;  %v9151_v37 = vpop.xlane.xlu0 %3879 }
 0x3fa   : > { %v3822_v52 = vadd.f32 %v9011_v47, %v3768_v50  ;;  %6006 = vrsqrt.f32 %v9151_v37  ;;  %vm3923_vm6 = vcmp.eq.f32.partialorder %v9151_v37, inf  ;;  %vm3925_vm15 = vcmp.eq.f32.partialorder %v9151_v37, 0.0 }
 0x3fb   : > { %v3840_v60 = vmax.f32 %v3821_v34, 0.0  ;;  %v4031_v62 = vmul.f32 %v9087_v17, %v9087_v17  ;;  %v9157_v6 = vpop.xlane.xlu1 %3881 }
 0x3fc   : > { %v3772_v53 = vpop.f32.mrb[124].mxu0  ;;  %vm3930_vm1 = vcmp.eq.f32.partialorder %v9157_v6, inf }
 0x3fd   : > { %v9093_v21 = vmul.f32 %v3840_v60, %v3822_v52  ;;  %v3823_v51 = vadd.f32 %v9009_v63, %v3772_v53  ;;  %4059 = vadd.xlane.f32.xlu0 %v4031_v62  ;;  %v3774_v15 = vpop.f32.mrb[125].mxu0  ;;  %v9155_v32 = vpop.xlane.xlu0 %3883 }
 0x3fe   : > { %v3824_v12 = vadd.f32 %v9011_v47, %v3774_v15  ;;  %vm3937_vm0 = vcmp.eq.f32.partialorder %v9155_v32, inf }
 0x3ff   : > { %v3841_v43 = vmax.f32 %v3823_v51, 0.0  ;;  %v4032_v0 = vmul.f32 %v9093_v21, %v9093_v21  ;;  %v9161_v45 = vpop.xlane.xlu1 %3885 }
 0x400   : > { %v3778_v59 = vpop.f32.mrb[126].mxu0  ;;  %v6005_v52 = vpop.eup %6004 }
 0x401   : > { %v9099_v44 = vmul.f32 %v3841_v43, %v3824_v12  ;;  %v3825_v36 = vadd.f32 %v9009_v63, %v3778_v59  ;;  %4061 = vadd.xlane.f32.xlu1 %v4032_v0  ;;  %v3780_v5 = vpop.f32.mrb[127].mxu0  ;;  %v9159_v9 = vpop.xlane.xlu0 %3887  ;;  %v3908_v51 = vmul.f32 %v6005_v52, %v9149_v1  ;;  %v3912_v59 = vand.u32 2147483648, %v9149_v1 }
 0x402   : > { %v3826_v19 = vadd.f32 %v9011_v47, %v3780_v5  ;;  %v9115_v47 = vld [vmem:[%s7653_s18 + $0x50] sm:$0xff]  ;;  %v3940_v52 = vand.u32 2147483648, %v9155_v32 }
 0x403   : > { %v3842_v14 = vmax.f32 %v3825_v36, 0.0  ;;  %v4033_v58 = vmul.f32 %v9099_v44, %v9099_v44  ;;  %v3869_v25 = vmul.f32 %v9115_v47, %v9115_v47  ;;  %v9165_v34 = vpop.xlane.xlu1 %3889 }
 0x404   : > { %v6007_v60 = vpop.eup %6006 }
 0x405   : > { %v9105_v48 = vmul.f32 %v3842_v14, %v3826_v19  ;;  %4063 = vadd.xlane.f32.xlu0 %v4033_v58  ;;  %v3922_v15 = vmul.f32 %v6007_v60, %v9151_v37  ;;  %v3910_v19 = vsel %vm3909_vm5, %v9149_v1, %v3908_v51  ;;  %v3926_v58 = vand.u32 2147483648, %v9151_v37 }
 0x406   : > { %vm3939_vm5 = vcmp.eq.f32.partialorder %v9155_v32, 0.0 }
 0x407   : > { %v4034_v63 = vmul.f32 %v9105_v48, %v9105_v48  ;;  %v9184_v14 = vsel %vm3923_vm6, %v9151_v37, %v3922_v15  ;;  %vm3951_vm6 = vcmp.eq.f32.partialorder %v9159_v9, inf }
 0x409   : > { %3891 = vadd.xlane.f32.xlu0 %v3867_v56  ;;  %4065 = vadd.xlane.f32.xlu1 %v4034_v63  ;;  %v3919_v63 = vand.u32 2147483648, %v9153_v31 }
 0x40d   : > { %3895 = vadd.xlane.f32.xlu0 %v3869_v25  ;;  %3893 = vadd.xlane.f32.xlu1 %v3868_v22 }
 0x411   : > { %3899 = vadd.xlane.f32.xlu0 %v3871_v4  ;;  %3897 = vadd.xlane.f32.xlu1 %v3870_v2 }
 0x415   : > { %3903 = vadd.xlane.f32.xlu0 %v3873_v40  ;;  %3901 = vadd.xlane.f32.xlu1 %v3872_v33 }
 0x419   : > { %3905 = vadd.xlane.f32.xlu1 %v3874_v49 }
 0x45a   : > { %v4036_v26 = vpop.xlane.xlu0 %4035 }
 0x45b   : > { %6008 = vrsqrt.f32 %v4036_v26  ;;  %vm4069_vm8 = vcmp.eq.f32.partialorder %v4036_v26, inf  ;;  %v4072_v0 = vand.u32 2147483648, %v4036_v26  ;;  %vm4071_vm9 = vcmp.eq.f32.partialorder %v4036_v26, 0.0 }
 0x45e   : > { %v4038_v50 = vpop.xlane.xlu0 %4037 }
 0x45f   : > { %6010 = vrsqrt.f32 %v4038_v50  ;;  %vm4076_vm13 = vcmp.eq.f32.partialorder %v4038_v50, inf  ;;  %v4079_v40 = vand.u32 2147483648, %v4038_v50  ;;  %vm4078_vm14 = vcmp.eq.f32.partialorder %v4038_v50, 0.0 }
 0x460   : > { %6012 = vrsqrt.f32 %v9153_v31 }
 0x462   : > { %v9168_v62 = vpop.xlane.xlu1 %4039 }
 0x463   : > { %6014 = vrsqrt.f32 %v9168_v62  ;;  %vm4083_vm3 = vcmp.eq.f32.partialorder %v9168_v62, inf  ;;  %vm4085_vm4 = vcmp.eq.f32.partialorder %v9168_v62, 0.0 }
 0x464   : > { %6016 = vrsqrt.f32 %v9155_v32 }
 0x465   : > { %v6009_v53 = vpop.eup %6008 }
 0x466   : > { %v4068_v12 = vmul.f32 %v6009_v53, %v4036_v26  ;;  %v9176_v43 = vpop.xlane.xlu1 %4041 }
 0x467   : > { %6018 = vrsqrt.f32 %v9176_v43  ;;  %v4093_v1 = vand.u32 2147483648, %v9176_v43 }
 0x468   : > { %6020 = vrsqrt.f32 %v9157_v6  ;;  %v4070_v36 = vsel %vm4069_vm8, %v4036_v26, %v4068_v12 }
 0x469   : > { %v6011_v5 = vpop.eup %6010  ;;  %v4073_v56 = vsel %vm4071_vm9, %v4072_v0, %v4070_v36  ;;  %v4086_v0 = vand.u32 2147483648, %v9168_v62  ;;  %v3933_v36 = vand.u32 2147483648, %v9157_v6  ;;  %vm4090_vm9 = vcmp.eq.f32.partialorder %v9176_v43, inf }
 0x46a   : > { %vm4179_vm11 = vcmp.eq.f32.partialorder %v4073_v56, 0.0  ;;  %v4075_v25 = vmul.f32 %v6011_v5, %v4038_v50  ;;  %v9189_v22 = vpop.xlane.xlu0 %4043  ;;  %v6013_v4 = vpop.eup %6012 }
 0x46b   : > { %v4195_v2 = vsel %vm4179_vm11, 1.0, %v4073_v56  ;;  %6022 = vrsqrt.f32 %v9189_v22  ;;  %v3915_v51 = vmul.f32 %v6013_v4, %v9153_v31 }
 0x46c   : > { %6024 = vrsqrt.f32 %v9159_v9  ;;  %v4211_v33 = vadd.f32 1e-06, %v4195_v2  ;;  %v4077_v49 = vsel %vm4076_vm13, %v4038_v50, %v4075_v25  ;;  %v3954_v2 = vand.u32 2147483648, %v9159_v9 }
 0x46d   : > { %v6015_v26 = vpop.eup %6014  ;;  %6026 = vrsqrt.f32 %v9161_v45  ;;  %v4080_v60 = vsel %vm4078_vm14, %v4079_v40, %v4077_v49  ;;  %vm4097_vm13 = vcmp.eq.f32.partialorder %v9189_v22, inf  ;;  %vm4099_vm14 = vcmp.eq.f32.partialorder %v9189_v22, 0.0 }
 0x46e   : > { %v6017_v53 = vpop.eup %6016  ;;  %6028 = vrcp.f32 %v4211_v33  ;;  %vm4180_vm2 = vcmp.eq.f32.partialorder %v4080_v60, 0.0  ;;  %v4082_v15 = vmul.f32 %v6015_v26, %v9168_v62  ;;  %v9201_v50 = vpop.xlane.xlu1 %4045  ;;  %v3913_v33 = vsel %vm3911_vm7, %v3912_v59, %v3910_v19 }
 0x46f   : > { %v4196_v12 = vsel %vm4180_vm2, 1.0, %v4080_v60  ;;  %6030 = vrsqrt.f32 %v9201_v50  ;;  %v3936_v4 = vmul.f32 %v6017_v53, %v9155_v32  ;;  %v3917_v26 = vsel %vm3916_vm10, %v9153_v31, %v3915_v51 }
 0x470   : > { %v4212_v5 = vadd.f32 1e-06, %v4196_v12  ;;  %v4084_v56 = vsel %vm4083_vm3, %v9168_v62, %v4082_v15  ;;  %vm4092_vm7 = vcmp.eq.f32.partialorder %v9176_v43, 0.0  ;;  %vm3944_vm10 = vcmp.eq.f32.partialorder %v9161_v45, inf }
 0x471   : > { %v6019_v25 = vpop.eup %6018  ;;  %v4087_v40 = vsel %vm4085_vm4, %v4086_v0, %v4084_v56  ;;  %v3938_v15 = vsel %vm3937_vm0, %v9155_v32, %v3936_v4  ;;  %v3947_v0 = vand.u32 2147483648, %v9161_v45  ;;  %v3927_v31 = vsel %vm3925_vm15, %v3926_v58, %v9184_v14 }
 0x472   : > { %v6021_v49 = vpop.eup %6020  ;;  %6032 = vrcp.f32 %v4212_v5  ;;  %vm4181_vm8 = vcmp.eq.f32.partialorder %v4087_v40, 0.0  ;;  %v4089_v62 = vmul.f32 %v6019_v25, %v9176_v43  ;;  %v9219_v60 = vpop.xlane.xlu0 %4047  ;;  %vm4104_vm15 = vcmp.eq.f32.partialorder %v9201_v50, inf }
 0x473   : > { %v4197_v53 = vsel %vm4181_vm8, 1.0, %v4087_v40  ;;  %6034 = vrsqrt.f32 %v9219_v60  ;;  %v3929_v12 = vmul.f32 %v6021_v49, %v9157_v6  ;;  %v4100_v49 = vand.u32 2147483648, %v9189_v22 }
 0x474   : > { %6036 = vrsqrt.f32 %v9165_v34  ;;  %v4213_v59 = vadd.f32 1e-06, %v4197_v53  ;;  %v4091_v19 = vsel %vm4090_vm9, %v9176_v43, %v4089_v62  ;;  %v3920_v43 = vsel %vm3918_vm12, %v3919_v63, %v3917_v26 }
 0x475   : > { %v6023_v51 = vpop.eup %6022  ;;  %v4094_v5 = vsel %vm4092_vm7, %v4093_v1, %v4091_v19  ;;  %v3931_v26 = vsel %vm3930_vm1, %v9157_v6, %v3929_v12  ;;  %vm3932_vm12 = vcmp.eq.f32.partialorder %v9157_v6, 0.0  ;;  %v4107_v14 = vand.u32 2147483648, %v9201_v50 }
 0x476   : > { %v6025_v56 = vpop.eup %6024  ;;  %6038 = vrcp.f32 %v4213_v59  ;;  %vm4182_vm11 = vcmp.eq.f32.partialorder %v4094_v5, 0.0  ;;  %v4096_v25 = vmul.f32 %v6023_v51, %v9189_v22  ;;  %v9234_v40 = vpop.xlane.xlu1 %4049  ;;  %vm4106_vm1 = vcmp.eq.f32.partialorder %v9201_v50, 0.0 }
 0x477   : > { %v6027_v4 = vpop.eup %6026  ;;  %v4198_v62 = vsel %vm4182_vm11, 1.0, %v4094_v5  ;;  %6040 = vrsqrt.f32 %v9234_v40  ;;  %v3950_v19 = vmul.f32 %v6025_v56, %v9159_v9  ;;  %vm4111_vm3 = vcmp.eq.f32.partialorder %v9219_v60, inf }
 0x478   : > { %v6029_v53 = vpop.eup %6028  ;;  %v4214_v1 = vadd.f32 1e-06, %v4198_v62  ;;  %v4098_v59 = vsel %vm4097_vm13, %v9189_v22, %v4096_v25  ;;  %v3943_v25 = vmul.f32 %v6027_v4, %v9161_v45  ;;  %vm3953_vm4 = vcmp.eq.f32.partialorder %v9159_v9, 0.0 }
 0x479   : > { %v6031_v63 = vpop.eup %6030  ;;  %v4101_v51 = vsel %vm4099_vm14, %v4100_v49, %v4098_v59  ;;  %v4228_v5 = vmul.f32 %v6029_v53, %v3913_v33  ;;  %v9267_v49 = vsel %vm3951_vm6, %v9159_v9, %v3950_v19  ;;  %v3941_v59 = vsel %vm3939_vm5, %v3940_v52, %v3938_v15 }
 0x47a   : > { %6042 = vrcp.f32 %v4214_v1  ;;  %vm4183_vm0 = vcmp.eq.f32.partialorder %v4101_v51, 0.0  ;;  %v4103_v22 = vmul.f32 %v6031_v63, %v9201_v50  ;;  %v9257_v62 = vpop.xlane.xlu0 %4051  ;;  %v4114_v19 = vand.u32 2147483648, %v9219_v60 }
 0x47b   : > { %v4199_v37 = vsel %vm4183_vm0, 1.0, %v4101_v51  ;;  %6044 = vrsqrt.f32 %v9257_v62  ;;  %v4259_v33 = vmul.f32 0.5, %v4228_v5  ;;  %v9283_v32 = vsel %vm3944_vm10, %v9161_v45, %v3943_v25 }
 0x47c   : > { %v6033_v58 = vpop.eup %6032  ;;  %v4215_v12 = vadd.f32 1e-06, %v4199_v37  ;;  %v4105_v56 = vsel %vm4104_vm15, %v9201_v50, %v4103_v22  ;;  %vm4113_vm5 = vcmp.eq.f32.partialorder %v9219_v60, 0.0  ;;  %vm3946_vm8 = vcmp.eq.f32.partialorder %v9161_v45, 0.0 }
 0x47d   : > { %v6035_v4 = vpop.eup %6034  ;;  %v4108_v53 = vsel %vm4106_vm1, %v4107_v14, %v4105_v56  ;;  %v4230_v1 = vmul.f32 %v6033_v58, %v3920_v43  ;;  %v4275_v5 = vmin.f32 %v4259_v33, 1.0  ;;  %vm3958_vm9 = vcmp.eq.f32.partialorder %v9165_v34, inf }
 0x47e   : > { %v6037_v63 = vpop.eup %6036  ;;  %6046 = vrcp.f32 %v4215_v12  ;;  %vm4184_vm2 = vcmp.eq.f32.partialorder %v4108_v53, 0.0  ;;  %v4110_v51 = vmul.f32 %v6035_v4, %v9219_v60  ;;  %v9274_v50 = vpop.xlane.xlu1 %4053  ;;  %vm4118_vm7 = vcmp.eq.f32.partialorder %v9234_v40, inf }
 0x47f   : > { %v4200_v22 = vsel %vm4184_vm2, 1.0, %v4108_v53  ;;  %6048 = vrsqrt.f32 %v9274_v50  ;;  %v4291_v15 = vmul.f32 %v4275_v5, %v9015_v7  ;;  %v3957_v14 = vmul.f32 %v6037_v63, %v9165_v34 }
 0x480   : > { %v6039_v43 = vpop.eup %6038  ;;  %v4112_v52 = vsel %vm4111_vm3, %v9219_v60, %v4110_v51  ;;  %v4260_v12 = vmul.f32 0.5, %v4230_v1  ;;  %v4216_v33 = vadd.f32 1e-06, %v4200_v22  ;;  %vm4120_vm10 = vcmp.eq.f32.partialorder %v9234_v40, 0.0 }
 0x481   : > { %v6041_v37 = vpop.eup %6040  ;;  %v4115_v58 = vsel %vm4113_vm5, %v4114_v19, %v4112_v52  ;;  %v4232_v56 = vmul.f32 %v6039_v43, %v3927_v31  ;;  %v9293_v25 = vadd.f32 %v8716_v57, %v4291_v15  ;;  %v3961_v31 = vand.u32 2147483648, %v9165_v34 }
 0x482   : > { %vm4185_vm6 = vcmp.eq.f32.partialorder %v4115_v58, 0.0  ;;  %v4117_v4 = vmul.f32 %v6041_v37, %v9234_v40  ;;  %v9290_v53 = vpop.xlane.xlu0 %4055  ;;  %v3934_v57 = vsel %vm3932_vm12, %v3933_v36, %v3931_v26  ;;  %v4121_v51 = vand.u32 2147483648, %v9234_v40 }
 0x483   : > { %v4201_v7 = vsel %vm4185_vm6, 1.0, %v4115_v58  ;;  %6050 = vrsqrt.f32 %v9290_v53  ;;  %4323 = vadd.xlane.f32.xlu0 %v9293_v25  ;;  %v4276_v5 = vmin.f32 %v4260_v12, 1.0  ;;  %v4261_v22 = vmul.f32 0.5, %v4232_v56 }
 0x484   : > { %v6043_v60 = vpop.eup %6042  ;;  %v4119_v1 = vsel %vm4118_vm7, %v9234_v40, %v4117_v4  ;;  %6052 = vrcp.f32 %v4216_v33  ;;  %v4217_v43 = vadd.f32 1e-06, %v4201_v7  ;;  %v4372_v37 = vmul.f32 %v9293_v25, %v9293_v25 }
 0x485   : > { %v6045_v63 = vpop.eup %6044  ;;  %v4234_v19 = vmul.f32 %v6043_v60, %v3934_v57  ;;  %v4122_v58 = vsel %vm4120_vm10, %v4121_v51, %v4119_v1  ;;  %vm4125_vm11 = vcmp.eq.f32.partialorder %v9257_v62, inf  ;;  %v4128_v6 = vand.u32 2147483648, %v9257_v62 }
 0x486   : > { %v4124_v52 = vmul.f32 %v6045_v63, %v9257_v62  ;;  %v9309_v15 = vpop.xlane.xlu1 %4057  ;;  %v9319_v40 = vsel %vm3958_vm9, %v9165_v34, %v3957_v14  ;;  %vm4127_vm13 = vcmp.eq.f32.partialorder %v9257_v62, 0.0  ;;  %v4292_v12 = vmul.f32 %v4276_v5, %v9021_v13 }
 0x487   : > { %6054 = vrsqrt.f32 %v9309_v15  ;;  %4388 = vadd.xlane.f32.xlu0 %v4372_v37  ;;  %v4277_v4 = vmin.f32 %v4261_v22, 1.0  ;;  %v4262_v7 = vmul.f32 0.5, %v4234_v19  ;;  %vm4186_vm14 = vcmp.eq.f32.partialorder %v4122_v58, 0.0 }
 0x488   : > { %v6047_v36 = vpop.eup %6046  ;;  %v4126_v26 = vsel %vm4125_vm11, %v9257_v62, %v4124_v52  ;;  %6056 = vrcp.f32 %v4217_v43  ;;  %v9326_v57 = vadd.f32 %v8981_v39, %v4292_v12  ;;  %vm4132_vm12 = vcmp.eq.f32.partialorder %v9274_v50, inf  ;;  %v6168_v52 = vld [vmem:[%s7653_s18 + $0x10] sm:$0xff] }
 0x489   : > { %v6049_v56 = vpop.eup %6048  ;;  %v4129_v33 = vsel %vm4127_vm13, %v4128_v6, %v4126_v26  ;;  %v4236_v60 = vmul.f32 %v6047_v36, %v3941_v59  ;;  %v4135_v62 = vand.u32 2147483648, %v9274_v50  ;;  %v9338_v13 = vsel %vm3953_vm4, %v3954_v2, %v9267_v49 }
 0x48a   : > { %v4131_v1 = vmul.f32 %v6049_v56, %v9274_v50  ;;  %v9328_v14 = vpop.xlane.xlu0 %4059  ;;  %vm4187_vm0 = vcmp.eq.f32.partialorder %v4129_v33, 0.0  ;;  %vm4134_vm15 = vcmp.eq.f32.partialorder %v9274_v50, 0.0  ;;  %4325 = vadd.xlane.f32.xlu1 %v9326_v57  ;;  %v4293_v59 = vmul.f32 %v4277_v4, %v9027_v16 }
 0x48b   : > { %6058 = vrsqrt.f32 %v9328_v14  ;;  %v4202_v51 = vsel %vm4186_vm14, 1.0, %v4122_v58  ;;  %v4278_v22 = vmin.f32 %v4262_v7, 1.0  ;;  %v4263_v19 = vmul.f32 0.5, %v4236_v60 }
 0x48c   : > { %v4133_v39 = vsel %vm4132_vm12, %v9274_v50, %v4131_v1  ;;  %v9346_v9 = vadd.f32 %v6168_v52, %v4293_v59  ;;  %v4373_v2 = vmul.f32 %v9326_v57, %v9326_v57  ;;  %v3948_v16 = vsel %vm3946_vm8, %v3947_v0, %v9283_v32 }
 0x48d   : > { %v6051_v63 = vpop.eup %6050  ;;  %v4136_v5 = vsel %vm4134_vm15, %v4135_v62, %v4133_v39  ;;  %v4203_v50 = vsel %vm4187_vm0, 1.0, %v4129_v33  ;;  %vm4139_vm1 = vcmp.eq.f32.partialorder %v9290_v53, inf  ;;  %v4142_v37 = vand.u32 2147483648, %v9290_v53 }
 0x48e   : > { %v4138_v43 = vmul.f32 %v6051_v63, %v9290_v53  ;;  %v9350_v49 = vpop.xlane.xlu1 %4061  ;;  %v6053_v58 = vpop.eup %6052  ;;  %v4218_v6 = vadd.f32 1e-06, %v4202_v51  ;;  %vm4188_vm2 = vcmp.eq.f32.partialorder %v4136_v5, 0.0  ;;  %vm4141_vm3 = vcmp.eq.f32.partialorder %v9290_v53, 0.0  ;;  %4327 = vadd.xlane.f32.xlu0 %v9346_v9  ;;  %4390 = vadd.xlane.f32.xlu1 %v4373_v2 }
 0x48f   : > { %6060 = vrsqrt.f32 %v9350_v49  ;;  %vm4146_vm4 = vcmp.eq.f32.partialorder %v9309_v15, inf  ;;  %v4294_v32 = vmul.f32 %v4278_v22, %v9033_v20  ;;  %v4279_v26 = vmin.f32 %v4263_v19, 1.0 }
 0x490   : > { %v4140_v36 = vsel %vm4139_vm1, %v9290_v53, %v4138_v43  ;;  %vm3960_vm5 = vcmp.eq.f32.partialorder %v9165_v34, 0.0  ;;  %v4219_v12 = vadd.f32 1e-06, %v4203_v50  ;;  %v4149_v33 = vand.u32 2147483648, %v9309_v15 }
 0x491   : > { %v6055_v45 = vpop.eup %6054  ;;  %v4143_v0 = vsel %vm4141_vm3, %v4142_v37, %v4140_v36  ;;  %v4374_v53 = vmul.f32 %v9346_v9, %v9346_v9  ;;  %v4204_v7 = vsel %vm4188_vm2, 1.0, %v4136_v5  ;;  %v9375_v60 = vadd.f32 %v8991_v10, %v4294_v32 }
 0x492   : > { %v4145_v56 = vmul.f32 %v6055_v45, %v9309_v15  ;;  %v9371_v4 = vpop.xlane.xlu0 %4063  ;;  %v4238_v20 = vmul.f32 %v6053_v58, %v3948_v16  ;;  %v6057_v1 = vpop.eup %6056  ;;  %vm4189_vm6 = vcmp.eq.f32.partialorder %v4143_v0, 0.0  ;;  %vm4148_vm8 = vcmp.eq.f32.partialorder %v9309_v15, 0.0 }
 0x493   : > { %6062 = vrsqrt.f32 %v9371_v4  ;;  %4392 = vadd.xlane.f32.xlu0 %v4374_v53  ;;  %vm4153_vm9 = vcmp.eq.f32.partialorder %v9328_v14, inf  ;;  %vm4155_vm7 = vcmp.eq.f32.partialorder %v9328_v14, 0.0  ;;  %4329 = vadd.xlane.f32.xlu1 %v9375_v60  ;;  %v4295_v10 = vmul.f32 %v4279_v26, %v9039_v18 }
 0x494   : > { %6064 = vrcp.f32 %v4218_v6  ;;  %v4147_v62 = vsel %vm4146_vm4, %v9309_v15, %v4145_v56  ;;  %v4220_v63 = vadd.f32 1e-06, %v4204_v7  ;;  %v4156_v5 = vand.u32 2147483648, %v9328_v14 }
 0x495   : > { %v6059_v39 = vpop.eup %6058  ;;  %v4150_v59 = vsel %vm4148_vm8, %v4149_v33, %v4147_v62  ;;  %6066 = vrcp.f32 %v4219_v12  ;;  %v4205_v19 = vsel %vm4189_vm6, 1.0, %v4143_v0  ;;  %v9394_v43 = vadd.f32 %v8986_v41, %v4295_v10 }
 0x496   : > { %v4152_v51 = vmul.f32 %v6059_v39, %v9328_v14  ;;  %v9388_v22 = vpop.xlane.xlu0 %3891  ;;  %v9390_v15 = vpop.xlane.xlu1 %4065  ;;  %v4375_v52 = vmul.f32 %v9375_v60, %v9375_v60  ;;  %v4264_v2 = vmul.f32 0.5, %v4238_v20  ;;  %vm4190_vm10 = vcmp.eq.f32.partialorder %v4150_v59, 0.0 }
 0x497   : > { %6068 = vrsqrt.f32 %v9388_v22  ;;  %v4240_v16 = vmul.f32 %v6057_v1, %v9338_v13  ;;  %vm4160_vm11 = vcmp.eq.f32.partialorder %v9350_v49, inf  ;;  %vm4162_vm13 = vcmp.eq.f32.partialorder %v9350_v49, 0.0  ;;  %4331 = vadd.xlane.f32.xlu0 %v9394_v43 }
 0x498   : > { %v4154_v18 = vsel %vm4153_vm9, %v9328_v14, %v4152_v51  ;;  %4394 = vadd.xlane.f32.xlu1 %v4375_v52  ;;  %6070 = vrsqrt.f32 %v9390_v15  ;;  %v4221_v41 = vadd.f32 1e-06, %v4205_v19  ;;  %v4163_v6 = vand.u32 2147483648, %v9350_v49 }
 0x499   : > { %v6061_v50 = vpop.eup %6060  ;;  %v4157_v37 = vsel %vm4155_vm7, %v4156_v5, %v4154_v18  ;;  %v4206_v14 = vsel %vm4190_vm10, 1.0, %v4150_v59  ;;  %v4376_v45 = vmul.f32 %v9394_v43, %v9394_v43  ;;  %v4280_v0 = vmin.f32 %v4264_v2, 1.0 }
 0x49a   : > { %vm4191_vm14 = vcmp.eq.f32.partialorder %v4157_v37, 0.0  ;;  %v4159_v58 = vmul.f32 %v6061_v50, %v9350_v49  ;;  %v9409_v13 = vpop.xlane.xlu0 %3895  ;;  %v9411_v36 = vpop.xlane.xlu1 %3893  ;;  %v4265_v12 = vmul.f32 0.5, %v4240_v16  ;;  %v3962_v7 = vsel %vm3960_vm5, %v3961_v31, %v9319_v40 }
 0x49b   : > { %6072 = vrsqrt.f32 %v9409_v13  ;;  %v4207_v32 = vsel %vm4191_vm14, 1.0, %v4157_v37  ;;  %4396 = vadd.xlane.f32.xlu0 %v4376_v45  ;;  %v4296_v53 = vmul.f32 %v4280_v0, %v9045_v35  ;;  %v4222_v1 = vadd.f32 1e-06, %v4206_v14 }
 0x49c   : > { %6074 = vrcp.f32 %v4220_v63  ;;  %v4161_v26 = vsel %vm4160_vm11, %v9350_v49, %v4159_v58  ;;  %vm4167_vm12 = vcmp.eq.f32.partialorder %v9371_v4, inf  ;;  %vm4169_vm0 = vcmp.eq.f32.partialorder %v9371_v4, 0.0 }
 0x49d   : > { %v6063_v56 = vpop.eup %6062  ;;  %v4164_v33 = vsel %vm4162_vm13, %v4163_v6, %v4161_v26  ;;  %6076 = vrsqrt.f32 %v9411_v36  ;;  %v4223_v35 = vadd.f32 1e-06, %v4207_v32  ;;  %v4170_v59 = vand.u32 2147483648, %v9371_v4 }
 0x49e   : > { %v6065_v20 = vpop.eup %6064  ;;  %v4166_v62 = vmul.f32 %v6063_v56, %v9371_v4  ;;  %v9432_v49 = vpop.xlane.xlu0 %3899  ;;  %6078 = vrcp.f32 %v4221_v41  ;;  %v9438_v10 = vadd.f32 %v9001_v54, %v4296_v53  ;;  %vm4192_vm15 = vcmp.eq.f32.partialorder %v4164_v33, 0.0 }
 0x49f   : > { %v9434_v39 = vpop.xlane.xlu1 %3897  ;;  %v9440_v34 = vpop.eup %6066  ;;  %vm3965_vm1 = vcmp.eq.f32.partialorder %v9388_v22, inf  ;;  %v4281_v40 = vmin.f32 %v4265_v12, 1.0  ;;  %6080 = vrsqrt.f32 %v9432_v49  ;;  %v3968_v51 = vand.u32 2147483648, %v9388_v22 }
 0x4a0   : > { %v4168_v31 = vsel %vm4167_vm12, %v9371_v4, %v4166_v62  ;;  %vm4174_vm2 = vcmp.eq.f32.partialorder %v9390_v15, inf  ;;  %vm4176_vm3 = vcmp.eq.f32.partialorder %v9390_v15, 0.0  ;;  %4333 = vadd.xlane.f32.xlu1 %v9438_v10  ;;  %6082 = vrcp.f32 %v4222_v1 }
 0x4a1   : > { %v4171_v63 = vsel %vm4169_vm0, %v4170_v59, %v4168_v31  ;;  %v6069_v54 = vpop.eup %6068  ;;  %v4177_v5 = vand.u32 2147483648, %v9390_v15  ;;  %vm3979_vm4 = vcmp.eq.f32.partialorder %v9409_v13, inf  ;;  %v4297_v4 = vmul.f32 %v4281_v40, %v9051_v24 }
 0x4a2   : > { %v6071_v52 = vpop.eup %6070  ;;  %v4208_v2 = vsel %vm4192_vm15, 1.0, %v4164_v33  ;;  %vm3967_vm5 = vcmp.eq.f32.partialorder %v9388_v22, 0.0  ;;  %v3982_v18 = vand.u32 2147483648, %v9409_v13  ;;  %v4377_v16 = vmul.f32 %v9438_v10, %v9438_v10  ;;  %v9460_v50 = vpop.xlane.xlu0 %3903 }
 0x4a3   : > { %v9452_v19 = vpop.xlane.xlu1 %3901  ;;  %6084 = vrsqrt.f32 %v9434_v39  ;;  %vm4193_vm6 = vcmp.eq.f32.partialorder %v4171_v63, 0.0  ;;  %v4173_v24 = vmul.f32 %v6071_v52, %v9390_v15  ;;  %v9464_v37 = vadd.f32 %v8996_v8, %v4297_v4 }
 0x4a4   : > { %6086 = vrcp.f32 %v4223_v35  ;;  %v3964_v58 = vmul.f32 %v6069_v54, %v9388_v22  ;;  %vm3981_vm8 = vcmp.eq.f32.partialorder %v9409_v13, 0.0  ;;  %vm3972_vm9 = vcmp.eq.f32.partialorder %v9411_v36, inf  ;;  %4398 = vadd.xlane.f32.xlu1 %v4377_v16 }
 0x4a5   : > { %v6073_v41 = vpop.eup %6072  ;;  %vm3974_vm7 = vcmp.eq.f32.partialorder %v9411_v36, 0.0  ;;  %v4242_v6 = vmul.f32 %v6065_v20, %v3962_v7  ;;  %v4224_v45 = vadd.f32 1e-06, %v4208_v2  ;;  %v4175_v0 = vsel %vm4174_vm2, %v9390_v15, %v4173_v24  ;;  %4335 = vadd.xlane.f32.xlu0 %v9464_v37 }
 0x4a6   : > { %v6075_v14 = vpop.eup %6074  ;;  %v3975_v8 = vand.u32 2147483648, %v9411_v36  ;;  %6088 = vrsqrt.f32 %v9460_v50  ;;  %v4209_v26 = vsel %vm4193_vm6, 1.0, %v4171_v63  ;;  %v4178_v12 = vsel %vm4176_vm3, %v4177_v5, %v4175_v0 }
 0x4a7   : > { %v6077_v32 = vpop.eup %6076  ;;  %v3978_v56 = vmul.f32 %v6073_v41, %v9409_v13  ;;  %v4266_v33 = vmul.f32 0.5, %v4242_v6  ;;  %vm4194_vm10 = vcmp.eq.f32.partialorder %v4178_v12, 0.0  ;;  %vm3993_vm11 = vcmp.eq.f32.partialorder %v9432_v49, inf  ;;  %v9484_v20 = vpop.xlane.xlu1 %3905  ;;  %v6169_v41 = vld [vmem:[%s7653_s18 + $0x38] sm:$0xff]  ;;  %s354_s18 = sand.u32 1, %s6240_s28  }
 0x4a8   : > { %v3971_v53 = vmul.f32 %v6077_v32, %v9411_v36  ;;  %v4378_v7 = vmul.f32 %v9464_v37, %v9464_v37  ;;  %v6079_v1 = vpop.eup %6078  ;;  %v3966_v62 = vsel %vm3965_vm1, %v9388_v22, %v3964_v58  ;;  %v4210_v15 = vsel %vm4194_vm10, 1.0, %v4178_v12  ;;  %s4718_s17 = sshll.u32 %s354_s18, 7  ;;  %s9712_s24 = scalar_lea.sflag [#allocation3], %s354_s18 }
 0x4a9   : > { %v4282_v35 = vmin.f32 %v4266_v33, 1.0  ;;  %6090 = vrsqrt.f32 %v9452_v19  ;;  %v6081_v59 = vpop.eup %6080  ;;  %v4225_v31 = vadd.f32 1e-06, %v4209_v26  ;;  %vm3995_vm13 = vcmp.eq.f32.partialorder %v9432_v49, 0.0  ;;  %s9623_s9 = scalar_lea.vmem [#allocation2], %s4718_s17 }
 0x4aa   : > { %6092 = vrcp.f32 %v4224_v45  ;;  %v3973_v40 = vsel %vm3972_vm9, %v9411_v36, %v3971_v53  ;;  %4400 = vadd.xlane.f32.xlu0 %v4378_v7  ;;  %v3980_v63 = vsel %vm3979_vm4, %v9409_v13, %v3978_v56  ;;  %v3992_v54 = vmul.f32 %v6081_v59, %v9432_v49  ;;  %v6083_v4 = vpop.eup %6082  ;;  %s4610_s22 = sshll.u32 %s9623_s9, 4  ;;  %s9706_s22 = int_to_ptr.vmem [resolvable:$true] %s4610_s22 }
 0x4ab   : > { %v4298_v5 = vmul.f32 %v4282_v35, %v9057_v28  ;;  %6094 = vrsqrt.f32 %v9484_v20  ;;  %v4226_v52 = vadd.f32 1e-06, %v4210_v15  ;;  %v3996_v2 = vand.u32 2147483648, %v9432_v49  ;;  %s6170_s17 = scalar_lea.vmem %s9706_s22, 2048  ;;  %p6177_p4 = scmp.lt.s32.totalorder %s9706_s22, %s6175_s13 }
 0x4ac   : > { %vm3986_vm14 = vcmp.eq.f32.partialorder %v9434_v39, inf  ;;  %v3969_v16 = vsel %vm3967_vm5, %v3968_v51, %v3966_v62  ;;  %vm3988_vm12 = vcmp.eq.f32.partialorder %v9434_v39, 0.0  ;;  %v3976_v6 = vsel %vm3974_vm7, %v3975_v8, %v3973_v40  ;;  %p6171_p1 = scmp.ne.s32.totalorder %s9706_s22, %s6170_s17  ;;  %p6178_p6 = scmp.lt.s32.totalorder %s6176_s30, %s6170_s17 }
 0x4ad   : > { %v6085_v24 = vpop.eup %6084  ;;  %v9508_v58 = vadd.f32 %v6169_v41, %v4298_v5  ;;  %v4244_v28 = vmul.f32 %v9440_v34, %v3969_v16  ;;  %v3989_v32 = vand.u32 2147483648, %v9434_v39  ;;  %v4246_v26 = vmul.f32 %v6075_v14, %v3976_v6 }
 0x4ae   : > { %v6087_v45 = vpop.eup %6086  ;;  %v3985_v0 = vmul.f32 %v6085_v24, %v9434_v39  ;;  %v3983_v22 = vsel %vm3981_vm8, %v3982_v18, %v3980_v63  ;;  %6096 = vrcp.f32 %v4225_v31  ;;  %v3994_v51 = vsel %vm3993_vm11, %v9432_v49, %v3992_v54  ;;  %p6172_p2 = pnand %p6171_p1, %p6369_p5  ;;  %p6179_p8 = por %p6178_p6, %p6177_p4 }
 0x4af   : > { %4337 = vadd.xlane.f32.xlu1 %v9508_v58  ;;  %v4267_v34 = vmul.f32 0.5, %v4244_v28  ;;  %v4248_v12 = vmul.f32 %v6079_v1, %v3983_v22  ;;  %6098 = vrcp.f32 %v4226_v52  ;;  %vm4007_vm0 = vcmp.eq.f32.partialorder %v9460_v50, inf }
 0x4b0   : > { %v6089_v36 = vpop.eup %6088  ;;  %v3987_v8 = vsel %vm3986_vm14, %v9434_v39, %v3985_v0  ;;  %v4268_v14 = vmul.f32 0.5, %v4246_v26  ;;  %v4379_v13 = vmul.f32 %v9508_v58, %v9508_v58  ;;  %v4010_v53 = vand.u32 2147483648, %v9460_v50  ;;  %p6173_p3 = pneg %p6172_p2 }
 0x4b1   : > { %v4283_v18 = vmin.f32 %v4267_v34, 1.0  ;;  %v4269_v56 = vmul.f32 0.5, %v4248_v12  ;;  %v3990_v33 = vsel %vm3988_vm12, %v3989_v32, %v3987_v8  ;;  %v3997_v62 = vsel %vm3995_vm13, %v3996_v2, %v3994_v51 }
 0x4b2   : > { %v4284_v7 = vmin.f32 %v4268_v14, 1.0  ;;  %v4250_v1 = vmul.f32 %v6083_v4, %v3990_v33  ;;  %v4006_v35 = vmul.f32 %v6089_v36, %v9460_v50  ;;  %vm4000_vm15 = vcmp.eq.f32.partialorder %v9452_v19, inf  ;;  %p6180_p9 = pnand %p6179_p8, %p6173_p3 }
 0x4b3   : > { %v6091_v15 = vpop.eup %6090  ;;  %vm4002_vm1 = vcmp.eq.f32.partialorder %v9452_v19, 0.0  ;;  %4402 = vadd.xlane.f32.xlu1 %v4379_v13  ;;  %v4299_v59 = vmul.f32 %v4283_v18, %v9063_v11  ;;  %v4003_v40 = vand.u32 2147483648, %v9452_v19  ;;  %vm4014_vm2 = vcmp.eq.f32.partialorder %v9484_v20, inf }
 0x4b4   : > { %v6093_v31 = vpop.eup %6092  ;;  %v3999_v39 = vmul.f32 %v6091_v15, %v9452_v19  ;;  %v4300_v63 = vmul.f32 %v4284_v7, %v9069_v27  ;;  %v4270_v54 = vmul.f32 0.5, %v4250_v1  ;;  %v4285_v4 = vmin.f32 %v4269_v56, 1.0 }
 0x4b5   : > { %v6095_v49 = vpop.eup %6094  ;;  %v9541_v5 = vadd.f32 %v9108_v23, %v4299_v59  ;;  %v4252_v52 = vmul.f32 %v6087_v45, %v3997_v62  ;;  %v4008_v27 = vsel %vm4007_vm0, %v9460_v50, %v4006_v35  ;;  %vm4009_vm3 = vcmp.eq.f32.partialorder %v9460_v50, 0.0 }
 0x4b6   : > { %v4001_v2 = vsel %vm4000_vm15, %v9452_v19, %v3999_v39  ;;  %v4013_v11 = vmul.f32 %v6095_v49, %v9484_v20  ;;  %v9546_v16 = vadd.f32 %v9120_v29, %v4300_v63  ;;  %v4286_v24 = vmin.f32 %v4270_v54, 1.0 }
 0x4b7   : > { %v4017_v41 = vand.u32 2147483648, %v9484_v20  ;;  %4339 = vadd.xlane.f32.xlu0 %v9541_v5  ;;  %v4004_v23 = vsel %vm4002_vm1, %v4003_v40, %v4001_v2  ;;  %vm4016_vm4 = vcmp.eq.f32.partialorder %v9484_v20, 0.0  ;;  %v4380_v45 = vmul.f32 %v9541_v5, %v9541_v5 }
 0x4b8   : > { %v4015_v28 = vsel %vm4014_vm2, %v9484_v20, %v4013_v11  ;;  %4341 = vadd.xlane.f32.xlu1 %v9546_v16  ;;  %v4254_v29 = vmul.f32 %v6093_v31, %v4004_v23  ;;  %v6097_v6 = vpop.eup %6096  ;;  %v4301_v0 = vmul.f32 %v4285_v4, %v9075_v61  ;;  %v4271_v32 = vmul.f32 0.5, %v4252_v52 }
 0x4b9   : > { %v6099_v26 = vpop.eup %6098  ;;  %v4381_v22 = vmul.f32 %v9546_v16, %v9546_v16  ;;  %v4302_v19 = vmul.f32 %v4286_v24, %v9081_v38  ;;  %v4011_v20 = vsel %vm4009_vm3, %v4010_v53, %v4008_v27  ;;  %v4018_v34 = vsel %vm4016_vm4, %v4017_v41, %v4015_v28 }
 0x4ba   : > { %v4272_v51 = vmul.f32 0.5, %v4254_v29  ;;  %v9568_v12 = vadd.f32 %v9115_v47, %v4301_v0  ;;  %v4287_v36 = vmin.f32 %v4271_v32, 1.0  ;;  %v4256_v8 = vmul.f32 %v6097_v6, %v4011_v20 }
 0x4bb   : > { %4404 = vadd.xlane.f32.xlu0 %v4380_v45  ;;  %v9571_v61 = vadd.f32 %v9130_v42, %v4302_v19  ;;  %v4258_v13 = vmul.f32 %v6099_v26, %v4018_v34  ;;  %v9612_v26 = vld [vmem:[%s9770_s6] ss:$0 sm:$0xff] }
 0x4bc   : > { %4406 = vadd.xlane.f32.xlu1 %v4381_v22  ;;  %v4288_v14 = vmin.f32 %v4272_v51, 1.0  ;;  %v4382_v38 = vmul.f32 %v9568_v12, %v9568_v12  ;;  %v4303_v50 = vmul.f32 %v4287_v36, %v9087_v17  ;;  %v4273_v18 = vmul.f32 0.5, %v4256_v8 }
 0x4bd   : > { %v4383_v47 = vmul.f32 %v9571_v61, %v9571_v61  ;;  %v4274_v33 = vmul.f32 0.5, %v4258_v13 }
 0x4be   : > { %v4304_v56 = vmul.f32 %v4288_v14, %v9093_v21  ;;  %v9582_v42 = vadd.f32 %v9125_v46, %v4303_v50  ;;  %v4289_v53 = vmin.f32 %v4273_v18, 1.0  ;;  %v9619_v14 = vld [vmem:[%s9771_s7] ss:$0 sm:$0xff] }
 0x4bf   : > { %4343 = vadd.xlane.f32.xlu0 %v9568_v12  ;;  %v4290_v1 = vmin.f32 %v4274_v33, 1.0 }
 0x4c0   : > { %4345 = vadd.xlane.f32.xlu1 %v9571_v61  ;;  %v9585_v7 = vadd.f32 %v9140_v3, %v4304_v56  ;;  %v4384_v17 = vmul.f32 %v9582_v42, %v9582_v42  ;;  %v4305_v21 = vmul.f32 %v4289_v53, %v9099_v44 }
 0x4c1   : > { %v4306_v46 = vmul.f32 %v4290_v1, %v9105_v48 }
 0x4c2   : > { %v4385_v62 = vmul.f32 %v9585_v7, %v9585_v7  ;;  %v9596_v3 = vadd.f32 %v9135_v55, %v4305_v21 }
 0x4c3   : > { %4408 = vadd.xlane.f32.xlu0 %v4382_v38  ;;  %v9599_v15 = vadd.f32 %v9145_v30, %v4306_v46 }
 0x4c4   : > { %4410 = vadd.xlane.f32.xlu1 %v4383_v47  ;;  %v4386_v44 = vmul.f32 %v9596_v3, %v9596_v3 }
 0x4c5   : > { %v4387_v35 = vmul.f32 %v9599_v15, %v9599_v15 }
 0x4c7   : > { %4347 = vadd.xlane.f32.xlu0 %v9582_v42 }
 0x4c8   : > { %4349 = vadd.xlane.f32.xlu1 %v9585_v7 }
 0x4cb   : > { %4412 = vadd.xlane.f32.xlu0 %v4384_v17 }
 0x4cc   : > { %4414 = vadd.xlane.f32.xlu1 %v4385_v62 }
 0x4cf   : > { %4351 = vadd.xlane.f32.xlu0 %v9596_v3 }
 0x4d0   : > { %4353 = vadd.xlane.f32.xlu1 %v9599_v15 }
 0x4d3   : > { %4416 = vadd.xlane.f32.xlu0 %v4386_v44 }
 0x4d4   : > { %4418 = vadd.xlane.f32.xlu1 %v4387_v35 }
 0x510   : > { %v4324_v48 = vpop.xlane.xlu0 %4323 }
 0x511   : > { %v4356_v59 = vmul.f32 0.0078125, %v4324_v48 }
 0x513   : > { %v4436_v55 = vmul.f32 %v4356_v59, %v4356_v59  ;;  %v4468_v0 = vsub.f32 %v9293_v25, %v4356_v59 }
 0x514   : > { %v4389_v31 = vpop.xlane.xlu0 %4388 }
 0x515   : > { %v4420_v39 = vmul.f32 0.0078125, %v4389_v31 }
 0x517   : > { %v4452_v40 = vsub.f32 %v4420_v39, %v4436_v55  ;;  %v4326_v30 = vpop.xlane.xlu1 %4325 }
 0x518   : > { %v4357_v54 = vmul.f32 0.0078125, %v4326_v30 }
 0x519   : > { %v4484_v63 = vadd.f32 1e-05, %v4452_v40 }
 0x51a   : > { %v4437_v52 = vmul.f32 %v4357_v54, %v4357_v54  ;;  %v4469_v33 = vsub.f32 %v9326_v57, %v4357_v54 }
 0x51b   : > { %6100 = vrsqrt.f32 %v4484_v63  ;;  %v4328_v49 = vpop.xlane.xlu0 %4327  ;;  %v4391_v4 = vpop.xlane.xlu1 %4390 }
 0x51c   : > { %v4358_v2 = vmul.f32 0.0078125, %v4328_v49  ;;  %v4421_v11 = vmul.f32 0.0078125, %v4391_v4 }
 0x51e   : > { %v4453_v24 = vsub.f32 %v4421_v11, %v4437_v52  ;;  %v4438_v41 = vmul.f32 %v4358_v2, %v4358_v2  ;;  %v4470_v44 = vsub.f32 %v9346_v9, %v4358_v2 }
 0x520   : > { %v4393_v27 = vpop.xlane.xlu0 %4392  ;;  %v4485_v23 = vadd.f32 1e-05, %v4453_v24  ;;  %v4330_v29 = vpop.xlane.xlu1 %4329 }
 0x521   : > { %v4422_v28 = vmul.f32 0.0078125, %v4393_v27  ;;  %v4359_v6 = vmul.f32 0.0078125, %v4330_v29 }
 0x522   : > { %6102 = vrsqrt.f32 %v4485_v23 }
 0x523   : > { %v4454_v45 = vsub.f32 %v4422_v28, %v4438_v41  ;;  %v4439_v34 = vmul.f32 %v4359_v6, %v4359_v6  ;;  %v4471_v49 = vsub.f32 %v9375_v60, %v4359_v6 }
 0x524   : > { %v4332_v19 = vpop.xlane.xlu0 %4331 }
 0x525   : > { %v6101_v32 = vpop.eup %6100  ;;  %v4486_v22 = vadd.f32 1e-05, %v4454_v45  ;;  %v4395_v51 = vpop.xlane.xlu1 %4394  ;;  %v4360_v36 = vmul.f32 0.0078125, %v4332_v19 }
 0x526   : > { %v4516_v20 = vmul.f32 %v6101_v32, %v4468_v0  ;;  %v4423_v8 = vmul.f32 0.0078125, %v4395_v51 }
 0x527   : > { %6104 = vrsqrt.f32 %v4486_v22  ;;  %v4440_v18 = vmul.f32 %v4360_v36, %v4360_v36  ;;  %v4472_v41 = vsub.f32 %v9394_v43, %v4360_v36 }
 0x528   : > { %v4539_v25 = vmul.f32 %v9612_v26, %v4516_v20  ;;  %v4455_v13 = vsub.f32 %v4423_v8, %v4439_v34  ;;  %v4397_v38 = vpop.xlane.xlu0 %4396 }
 0x529   : > { %v4424_v56 = vmul.f32 0.0078125, %v4397_v38 }
 0x52a   : > { %v4562_v50 = vadd.f32 %v9619_v14, %v4539_v25  ;;  %v4487_v47 = vadd.f32 1e-05, %v4455_v13 }
 0x52b   : > { %v4456_v53 = vsub.f32 %v4424_v56, %v4440_v18 }
 0x52c   : > { %4578 = vst [vmem:[%s9623_s9] sm:$0xff] %v4562_v50  ;;  %6106 = vrsqrt.f32 %v4487_v47  ;;  %v6103_v1 = vpop.eup %6102 }
 0x52d   : > { %v4334_v17 = vpop.xlane.xlu1 %4333  ;;  %v4517_v21 = vmul.f32 %v6103_v1, %v4469_v33  ;;  %v4488_v62 = vadd.f32 1e-05, %v4456_v53 }
 0x52e   : > { %v4361_v46 = vmul.f32 0.0078125, %v4334_v17 }
 0x52f   : > { %v4540_v35 = vmul.f32 %v9612_v26, %v4517_v21  ;;  %6108 = vrsqrt.f32 %v4488_v62 }
 0x530   : > { %v4441_v57 = vmul.f32 %v4361_v46, %v4361_v46  ;;  %v4473_v34 = vsub.f32 %v9438_v10, %v4361_v46 }
 0x531   : > { %v6105_v48 = vpop.eup %6104  ;;  %v4399_v59 = vpop.xlane.xlu1 %4398  ;;  %v4563_v31 = vadd.f32 %v9619_v14, %v4540_v35 }
 0x532   : > { %v4518_v55 = vmul.f32 %v6105_v48, %v4470_v44  ;;  %v4336_v39 = vpop.xlane.xlu0 %4335  ;;  %v4425_v40 = vmul.f32 0.0078125, %v4399_v59 }
 0x533   : > { %v4362_v30 = vmul.f32 0.0078125, %v4336_v39  ;;  %4579 = vst [vmem:[%s9623_s9 + $0x8] sm:$0xff] %v4563_v31 }
 0x534   : > { %v4541_v63 = vmul.f32 %v9612_v26, %v4518_v55  ;;  %v4457_v54 = vsub.f32 %v4425_v40, %v4441_v57 }
 0x535   : > { %v4442_v24 = vmul.f32 %v4362_v30, %v4362_v30  ;;  %v4474_v33 = vsub.f32 %v9464_v37, %v4362_v30 }
 0x536   : > { %v6107_v9 = vpop.eup %6106  ;;  %v4564_v4 = vadd.f32 %v9619_v14, %v4541_v63  ;;  %v4489_v52 = vadd.f32 1e-05, %v4457_v54 }
 0x537   : > { %v4401_v2 = vpop.xlane.xlu0 %4400  ;;  %v4519_v11 = vmul.f32 %v6107_v9, %v4471_v49 }
 0x538   : > { %v4426_v27 = vmul.f32 0.0078125, %v4401_v2  ;;  %4580 = vst [vmem:[%s9623_s9 + $0x10] sm:$0xff] %v4564_v4  ;;  %6110 = vrsqrt.f32 %v4489_v52 }
 0x539   : > { %v4542_v23 = vmul.f32 %v9612_v26, %v4519_v11  ;;  %v6109_v29 = vpop.eup %6108 }
 0x53a   : > { %v4458_v28 = vsub.f32 %v4426_v27, %v4442_v24  ;;  %v4520_v6 = vmul.f32 %v6109_v29, %v4472_v41 }
 0x53b   : > { %v4565_v60 = vadd.f32 %v9619_v14, %v4542_v23 }
 0x53c   : > { %v4490_v45 = vadd.f32 1e-05, %v4458_v28  ;;  %v4338_v0 = vpop.xlane.xlu1 %4337  ;;  %v4543_v22 = vmul.f32 %v9612_v26, %v4520_v6 }
 0x53d   : > { %v4363_v32 = vmul.f32 0.0078125, %v4338_v0  ;;  %4581 = vst [vmem:[%s9623_s9 + $0x18] sm:$0xff] %v4565_v60 }
 0x53e   : > { %6112 = vrsqrt.f32 %v4490_v45  ;;  %v4566_v19 = vadd.f32 %v9619_v14, %v4543_v22 }
 0x53f   : > { %v4443_v20 = vmul.f32 %v4363_v32, %v4363_v32  ;;  %v4475_v54 = vsub.f32 %v9508_v58, %v4363_v32 }
 0x540   : > { %v4403_v51 = vpop.xlane.xlu1 %4402  ;;  %4582 = vst [vmem:[%s9623_s9 + $0x20] sm:$0xff] %v4566_v19 }
 0x541   : > { %v4427_v43 = vmul.f32 0.0078125, %v4403_v51 }
 0x542   : > { %v6111_v36 = vpop.eup %6110 }
 0x543   : > { %v4459_v8 = vsub.f32 %v4427_v43, %v4443_v20  ;;  %v4521_v25 = vmul.f32 %v6111_v36, %v4473_v34 }
 0x544   : > { %v4340_v13 = vpop.xlane.xlu0 %4339 }
 0x545   : > { %v4491_v38 = vadd.f32 1e-05, %v4459_v8  ;;  %v4364_v50 = vmul.f32 0.0078125, %v4340_v13  ;;  %v4342_v18 = vpop.xlane.xlu1 %4341  ;;  %v4544_v47 = vmul.f32 %v9612_v26, %v4521_v25 }
 0x546   : > { %v4365_v56 = vmul.f32 0.0078125, %v4342_v18 }
 0x547   : > { %6114 = vrsqrt.f32 %v4491_v38  ;;  %v4567_v1 = vadd.f32 %v9619_v14, %v4544_v47  ;;  %v4444_v10 = vmul.f32 %v4364_v50, %v4364_v50  ;;  %v4476_v22 = vsub.f32 %v9541_v5, %v4364_v50 }
 0x548   : > { %v6113_v53 = vpop.eup %6112  ;;  %v4405_v17 = vpop.xlane.xlu0 %4404  ;;  %v4445_v44 = vmul.f32 %v4365_v56, %v4365_v56  ;;  %v4477_v20 = vsub.f32 %v9546_v16, %v4365_v56 }
 0x549   : > { %v4522_v21 = vmul.f32 %v6113_v53, %v4474_v33  ;;  %v4428_v62 = vmul.f32 0.0078125, %v4405_v17  ;;  %v4407_v46 = vpop.xlane.xlu1 %4406  ;;  %4583 = vst [vmem:[%s9623_s9 + $0x28] sm:$0xff] %v4567_v1 }
 0x54a   : > { %v4429_v35 = vmul.f32 0.0078125, %v4407_v46 }
 0x54b   : > { %v4545_v48 = vmul.f32 %v9612_v26, %v4522_v21  ;;  %v4460_v59 = vsub.f32 %v4428_v62, %v4444_v10 }
 0x54c   : > { %v4344_v31 = vpop.xlane.xlu0 %4343  ;;  %v4461_v55 = vsub.f32 %v4429_v35, %v4445_v44 }
 0x54d   : > { %v4568_v37 = vadd.f32 %v9619_v14, %v4545_v48  ;;  %v4492_v57 = vadd.f32 1e-05, %v4460_v59  ;;  %v9649_v39 = vmul.f32 0.0078125, %v4344_v31  ;;  %v4346_v40 = vpop.xlane.xlu1 %4345 }
 0x54e   : > { %v4493_v30 = vadd.f32 1e-05, %v4461_v55  ;;  %v9651_v63 = vmul.f32 0.0078125, %v4346_v40 }
 0x54f   : > { %4584 = vst [vmem:[%s9623_s9 + $0x30] sm:$0xff] %v4568_v37  ;;  %6116 = vrsqrt.f32 %v4492_v57  ;;  %v4446_v4 = vmul.f32 %v9649_v39, %v9649_v39  ;;  %v4478_v46 = vsub.f32 %v9568_v12, %v9649_v39 }
 0x550   : > { %6118 = vrsqrt.f32 %v4493_v30  ;;  %v4409_v49 = vpop.xlane.xlu0 %4408  ;;  %v4447_v24 = vmul.f32 %v9651_v63, %v9651_v63  ;;  %v4479_v48 = vsub.f32 %v9571_v61, %v9651_v63 }
 0x551   : > { %v6115_v9 = vpop.eup %6114  ;;  %v4430_v52 = vmul.f32 0.0078125, %v4409_v49  ;;  %v4411_v2 = vpop.xlane.xlu1 %4410 }
 0x552   : > { %v4523_v11 = vmul.f32 %v6115_v9, %v4475_v54  ;;  %v4431_v27 = vmul.f32 0.0078125, %v4411_v2 }
 0x553   : > { %v4462_v41 = vsub.f32 %v4430_v52, %v4446_v4 }
 0x554   : > { %v4546_v23 = vmul.f32 %v9612_v26, %v4523_v11  ;;  %v4348_v28 = vpop.xlane.xlu0 %4347  ;;  %v4463_v29 = vsub.f32 %v4431_v27, %v4447_v24 }
 0x555   : > { %v4494_v58 = vadd.f32 1e-05, %v4462_v41  ;;  %v9660_v60 = vmul.f32 0.0078125, %v4348_v28  ;;  %v4350_v6 = vpop.xlane.xlu1 %4349 }
 0x556   : > { %v4569_v45 = vadd.f32 %v9619_v14, %v4546_v23  ;;  %v4495_v0 = vadd.f32 1e-05, %v4463_v29  ;;  %v4369_v32 = vmul.f32 0.0078125, %v4350_v6 }
 0x557   : > { %6120 = vrsqrt.f32 %v4494_v58  ;;  %v4448_v43 = vmul.f32 %v9660_v60, %v9660_v60  ;;  %v4480_v2 = vsub.f32 %v9582_v42, %v9660_v60 }
 0x558   : > { %4585 = vst [vmem:[%s9623_s9 + $0x38] sm:$0xff] %v4569_v45  ;;  %6122 = vrsqrt.f32 %v4495_v0  ;;  %v4413_v19 = vpop.xlane.xlu0 %4412  ;;  %v4449_v13 = vmul.f32 %v4369_v32, %v4369_v32  ;;  %v4481_v24 = vsub.f32 %v9585_v7, %v4369_v32 }
 0x559   : > { %v6117_v51 = vpop.eup %6116  ;;  %v4432_v34 = vmul.f32 0.0078125, %v4413_v19  ;;  %v4415_v36 = vpop.xlane.xlu1 %4414 }
 0x55a   : > { %v6119_v8 = vpop.eup %6118  ;;  %v4524_v25 = vmul.f32 %v6117_v51, %v4476_v22  ;;  %v4433_v38 = vmul.f32 0.0078125, %v4415_v36 }
 0x55b   : > { %v4525_v18 = vmul.f32 %v6119_v8, %v4477_v20  ;;  %v4464_v47 = vsub.f32 %v4432_v34, %v4448_v43 }
 0x55c   : > { %v4547_v33 = vmul.f32 %v9612_v26, %v4524_v25  ;;  %v4352_v5 = vpop.xlane.xlu0 %4351  ;;  %v4465_v50 = vsub.f32 %v4433_v38, %v4449_v13 }
 0x55d   : > { %v4548_v53 = vmul.f32 %v9612_v26, %v4525_v18  ;;  %v4496_v16 = vadd.f32 1e-05, %v4464_v47  ;;  %v4370_v56 = vmul.f32 0.0078125, %v4352_v5  ;;  %v4354_v1 = vpop.xlane.xlu1 %4353 }
 0x55e   : > { %v4570_v17 = vadd.f32 %v9619_v14, %v4547_v33  ;;  %v4497_v21 = vadd.f32 1e-05, %v4465_v50  ;;  %v4371_v10 = vmul.f32 0.0078125, %v4354_v1 }
 0x55f   : > { %v4571_v62 = vadd.f32 %v9619_v14, %v4548_v53  ;;  %6124 = vrsqrt.f32 %v4496_v16  ;;  %v4450_v59 = vmul.f32 %v4370_v56, %v4370_v56  ;;  %v4482_v42 = vsub.f32 %v9596_v3, %v4370_v56 }
 0x560   : > { %4586 = vst [vmem:[%s9623_s9 + $0x40] sm:$0xff] %v4570_v17  ;;  %6126 = vrsqrt.f32 %v4497_v21  ;;  %v4417_v44 = vpop.xlane.xlu0 %4416  ;;  %v4451_v40 = vmul.f32 %v4371_v10, %v4371_v10  ;;  %v4483_v7 = vsub.f32 %v9599_v15, %v4371_v10 }
 0x561   : > { %v6121_v35 = vpop.eup %6120  ;;  %4587 = vst [vmem:[%s9623_s9 + $0x48] sm:$0xff] %v4571_v62  ;;  %v4434_v31 = vmul.f32 0.0078125, %v4417_v44  ;;  %v4419_v55 = vpop.xlane.xlu1 %4418 }
 0x562   : > { %v6123_v37 = vpop.eup %6122  ;;  %v4526_v57 = vmul.f32 %v6121_v35, %v4478_v46  ;;  %v4435_v30 = vmul.f32 0.0078125, %v4419_v55 }
 0x563   : > { %v4527_v54 = vmul.f32 %v6123_v37, %v4479_v48  ;;  %v4466_v49 = vsub.f32 %v4434_v31, %v4450_v59 }
 0x564   : > { %v4549_v12 = vmul.f32 %v9612_v26, %v4526_v57  ;;  %v4467_v39 = vsub.f32 %v4435_v30, %v4451_v40 }
 0x565   : > { %v4550_v9 = vmul.f32 %v9612_v26, %v4527_v54  ;;  %v4498_v4 = vadd.f32 1e-05, %v4466_v49 }
 0x566   : > { %v4572_v52 = vadd.f32 %v9619_v14, %v4549_v12  ;;  %v4499_v61 = vadd.f32 1e-05, %v4467_v39 }
 0x567   : > { %v4573_v63 = vadd.f32 %v9619_v14, %v4550_v9  ;;  %6128 = vrsqrt.f32 %v4498_v4 }
 0x568   : > { %4588 = vst [vmem:[%s9623_s9 + $0x50] sm:$0xff] %v4572_v52  ;;  %6130 = vrsqrt.f32 %v4499_v61 }
 0x569   : > { %v6125_v11 = vpop.eup %6124  ;;  %4589 = vst [vmem:[%s9623_s9 + $0x58] sm:$0xff] %v4573_v63 }
 0x56a   : > { %v6127_v27 = vpop.eup %6126  ;;  %v4528_v41 = vmul.f32 %v6125_v11, %v4480_v2 }
 0x56b   : > { %v4529_v23 = vmul.f32 %v6127_v27, %v4481_v24 }
 0x56c   : > { %v4551_v28 = vmul.f32 %v9612_v26, %v4528_v41 }
 0x56d   : > { %v4552_v29 = vmul.f32 %v9612_v26, %v4529_v23 }
 0x56e   : > { %v4574_v58 = vadd.f32 %v9619_v14, %v4551_v28 }
 0x56f   : > { %v4575_v6 = vadd.f32 %v9619_v14, %v4552_v29 }
 0x570   : > { %4590 = vst [vmem:[%s9623_s9 + $0x60] sm:$0xff] %v4574_v58 }
 0x571   : > { %v6129_v60 = vpop.eup %6128  ;;  %4591 = vst [vmem:[%s9623_s9 + $0x68] sm:$0xff] %v4575_v6 }
 0x572   : > { %v6131_v45 = vpop.eup %6130  ;;  %v4530_v0 = vmul.f32 %v6129_v60, %v4482_v42 }
 0x573   : > { %v4531_v32 = vmul.f32 %v6131_v45, %v4483_v7 }
 0x574   : > { %v4553_v22 = vmul.f32 %v9612_v26, %v4530_v0 }
 0x575   : > { %v4554_v3 = vmul.f32 %v9612_v26, %v4531_v32 }
 0x576   : > { %v4576_v19 = vadd.f32 %v9619_v14, %v4553_v22 }
 0x577   : > { %v4577_v51 = vadd.f32 %v9619_v14, %v4554_v3 }
 0x578   : > { %4592 = vst [vmem:[%s9623_s9 + $0x70] sm:$0xff] %v4576_v19 }
 0x579   : > { %4593 = vst [vmem:[%s9623_s9 + $0x78] sm:$0xff] %v4577_v51 }
 0x57a   : > { %6183 = shalt.err (!%p6180_p9)
}
 0x57b   : > { %s6184_s18 = scalar_lea.hbm %s9701_s16, 2048  ;;  %s6188_s26 = scalar_lea.hbm %s9772_s8, 16384 }
 0x57c   : > { %p6185_p10 = scmp.ne.s32.totalorder %s9701_s16, %s6184_s18  ;;  %p6189_p13 = scmp.lt.u32.totalorder %s9701_s16, %s9772_s8 }
 0x57d   : > { %p6190_p0 = scmp.lt.u32.totalorder %s6188_s26, %s6184_s18  ;;  %p6192_p2 = scmp.lt.u32.totalorder %s6184_s18, %s9701_s16 }
 0x57e   : > { %p6186_p11 = pnand %p6185_p10, %p6369_p5 }
 0x57f   : > { %p6191_p1 = por %p6190_p0, %p6189_p13 }
 0x580   : > { %p6187_p12 = pneg %p6186_p11 }
 0x581   : > { %p6193_p3 = por %p6192_p2, %p6191_p1 }
 0x583   : > { %p6194_p4 = pnand %p6193_p3, %p6187_p12 }
 0x585   : > { %6197 = shalt.err (!%p6194_p4)
}
 0x586   : > { %s6269_s17 = smov 128   ;;  %s6270_s30 = smov 8  }
 0x587   : > { %5929 = dma.vmem_to_hbm [thread:$0]  (%p6369_p5), %s9706_s22, 2048, %s9701_s16, %s9712_s24, %s6269_s17, %s6269_s17, %s6270_s30  }
 0x588 PF: > { %p5935_p6 = scmp.ge.s32.totalorder %s6264_s12, 2  ;;  %s4625_s9 = sand.u32 1, %s6236_s27  }
 0x589   : > { %s4626_s18 = scalar_lea.sflag [#allocation3], %s4625_s9 }
 0x58a   : > { %p5932_p8 = pnand %p5935_p6, %p6375_p7 }
 0x58c   : > { %6231 = dma.done.wait (!%p5932_p8), %s4626_s18, 2048  }
 0x58d   : > { %6233 = vsyncadd (!%p5932_p8), %s4626_s18, 4294965248  ;;  %s21_s12 = sadd.s32 1, %s6264_s12   ;;  %s10340_s27 = smov %s6240_s28 }
 0x58e   : > { %p18_p9 = scmp.ge.s32.totalorder %s21_s12, 10   ;;  %s10341_s28 = smov %s6244_s29 }
 0x58f   : > { %s10342_s29 = smov %s6385_s25  ;;  %s10343_s30 = smov %s6256_s10 }
 0x590   : > { %s10344_s9 = smov %s6260_s11  ;;  %s10345_s10 = smov %s10348_s14 }
 0x591   : > { %s10346_s11 = smov %s10352_s15  ;;  %20 = sbr.rel (!%p18_p9) target bundleno = 5 (0x5), region = 96 }
 0x598   :  { %4631 = vsyncpa [#allocation3], 1 }
 0x599   :  { %4633 = vsyncpa [#allocation3 + $0x1], 1 }

</bundles_post_ra>
